<compile_context>
chip_gen: v7x
topology: tpu7x:2x2x1
jax: 0.10.0
libtpu: 0.0.40
codegen_flags: <defaults>
</compile_context>

<pallas_src>
import functools

import jax
import jax.numpy as jnp
from jax.experimental import pallas as pl
from jax.experimental.pallas import tpu as pltpu


def _maps_per_step(num_maps):
    for mt in (8, 4, 2):
        if num_maps % mt == 0:
            return mt
    return 1


# ---------------------------------------------------------------------------
# Kernel 1: fused (linear1 @ linear2) image transform + L2 normalize.
#   xf, xl : (M, C, S)  raw channel-major feature maps (reshaped NCHW views)
#   w*_t   : (D, C)     folded weight, pre-transposed in the wrapper (tiny)
#   b*     : (1, D)     folded bias
# Outputs: (M, S, D) L2-normalized features for frontal and lateral maps.
# ---------------------------------------------------------------------------
def _image_transform_call(xf, xl, wf_t, bf, wl_t, bl):
    M, C, S = xf.shape
    D = wf_t.shape[0]
    MT = _maps_per_step(M)

    def kernel(xf_ref, xl_ref, wf_ref, bf_ref, wl_ref, bl_ref, of_ref, ol_ref):
        def one_map(x_ref, w_ref, b_ref, o_ref, i):
            ht = jnp.dot(w_ref[...], x_ref[i],
                         preferred_element_type=jnp.float32)        # (D, S)
            h = ht.T + b_ref[...]                                    # (S, D)
            ssq = jnp.sum(h * h, axis=-1, keepdims=True)
            # F.normalize(p=2, dim=-1, eps=1e-12) -> h * rsqrt(max(ssq, 1e-24))
            o_ref[i] = h * jax.lax.rsqrt(jnp.maximum(ssq, 1e-24))

        def body(i, carry):
            one_map(xf_ref, wf_ref, bf_ref, of_ref, i)
            one_map(xl_ref, wl_ref, bl_ref, ol_ref, i)
            return carry

        jax.lax.fori_loop(0, MT, body, 0, unroll=True)

    cost = pl.CostEstimate(
        flops=2 * 2 * M * C * S * D,
        transcendentals=2 * M * S,
        bytes_accessed=4 * (2 * M * C * S + 2 * M * S * D + 2 * (D * C + D)))

    return pl.pallas_call(
        kernel,
        out_shape=(jax.ShapeDtypeStruct((M, S, D), jnp.float32),
                   jax.ShapeDtypeStruct((M, S, D), jnp.float32)),
        grid=(M // MT,),
        in_specs=[
            pl.BlockSpec((MT, C, S), lambda g: (g, 0, 0)),
            pl.BlockSpec((MT, C, S), lambda g: (g, 0, 0)),
            pl.BlockSpec((D, C), lambda g: (0, 0)),
            pl.BlockSpec((1, D), lambda g: (0, 0)),
            pl.BlockSpec((D, C), lambda g: (0, 0)),
            pl.BlockSpec((1, D), lambda g: (0, 0)),
        ],
        out_specs=(pl.BlockSpec((MT, S, D), lambda g: (g, 0, 0)),
                   pl.BlockSpec((MT, S, D), lambda g: (g, 0, 0))),
        compiler_params=pltpu.CompilerParams(
            dimension_semantics=("parallel",),
            vmem_limit_bytes=32 * 1024 * 1024),
        cost_estimate=cost,
    )(xf, xl, wf_t, bf, wl_t, bl)


# ---------------------------------------------------------------------------
# Kernel 2: fused sentence transform + all six attention problems.
# grid=(B,), one batch element per step; rows-per-batch RPB = 2 + 4*NN:
#   row 0        : frontal positive   vs positive sentence
#   row 1        : lateral positive   vs positive sentence
#   rows 2..     : frontal positive   vs the NN negative sentences
#   rows 2+NN..  : lateral positive   vs the NN negative sentences
#   rows 2+2NN.. : NN frontal negatives vs positive sentence
#   rows 2+3NN.. : NN lateral negatives vs positive sentence
# Output: one slab (B, RPB, S+1); columns [0, S) = attention weights, column S
# = the attention-weighted distance.  One full-block store per step.
# ---------------------------------------------------------------------------
def _attention_call(uf, ul, unf, unl, xsp, xsn, ws12, bs12, au, num_negatives):
    B, S, D = uf.shape
    NN = num_negatives
    Cs = ws12.shape[0]
    RPB = 2 + 4 * NN
    SW = S + 1

    def kernel(uf_ref, ul_ref, unf_ref, unl_ref, xsp_ref, xsn_ref,
               ws_ref, bs_ref, au_ref, out_ref):
        def transform(x):          # fused sentence linear + L2 normalize
            h = jnp.dot(x, ws_ref[...],
                        preferred_element_type=jnp.float32) + bs_ref[...]
            ssq = jnp.sum(h * h, axis=-1, keepdims=True)
            return h * jax.lax.rsqrt(jnp.maximum(ssq, 1e-24))

        vs = transform(xsp_ref[0])             # (1, D)   positive sentence
        vns = transform(xsn_ref[0])            # (NN, D)  negative sentences

        uf_b = uf_ref[0]                       # (S, D)
        ul_b = ul_ref[0]                       # (S, D)
        unf_b = unf_ref[0]                     # (NN, S, D)
        unl_b = unl_ref[0]                     # (NN, S, D)
        au = au_ref[...]                       # (1, D)

        def rowdot(rows, maps2d):              # (r, D) x (S, D) -> (r, S), MXU
            return jnp.einsum('rd,sd->rs', rows, maps2d,
                              preferred_element_type=jnp.float32)

        def softmax(scores):                   # softmax along S
            m = jnp.max(scores, axis=-1, keepdims=True)
            e = jnp.exp(scores - m)
            return e * pl.reciprocal(jnp.sum(e, axis=-1, keepdims=True),
                                     approx=True)

        def wdist(uv, attn):
            # u_s and v are unit-norm: ||u_s - v|| = sqrt(max(2 - 2 u_s.v, 0))
            d = jnp.sqrt(jnp.maximum(2.0 - 2.0 * uv, 0.0))
            return jnp.sum(d * attn, axis=-1, keepdims=True)       # (rows, 1)

        # Attention weights: the sentence / bias terms of the score are
        # constant along S and cancel inside softmax, so weights depend only
        # on u . a_u; groups 3/4 therefore reuse the group-1/2 weights.
        a1 = softmax(rowdot(au, uf_b))                              # (1, S)
        a2 = softmax(rowdot(au, ul_b))                              # (1, S)
        a3 = jnp.broadcast_to(a1, (NN, S))
        a4 = jnp.broadcast_to(a2, (NN, S))
        a5 = softmax(jnp.sum(unf_b * au[None], axis=-1))            # (NN, S)
        a6 = softmax(jnp.sum(unl_b * au[None], axis=-1))            # (NN, S)

        # Cosine terms for the distances (no (rows, S, D) diff tensor).
        uv1 = rowdot(vs, uf_b)                                      # (1, S)
        uv2 = rowdot(vs, ul_b)
        uv3 = rowdot(vns, uf_b)                                     # (NN, S)
        uv4 = rowdot(vns, ul_b)
        uv5 = jnp.sum(unf_b * vs[None], axis=-1)                    # (NN, S)
        uv6 = jnp.sum(unl_b * vs[None], axis=-1)

        attn_rows = jnp.concatenate([a1, a2, a3, a4, a5, a6], axis=0)
        wd_rows = jnp.concatenate(
            [wdist(uv1, a1), wdist(uv2, a2), wdist(uv3, a3),
             wdist(uv4, a4), wdist(uv5, a5), wdist(uv6, a6)], axis=0)
        # one lane-contiguous full-block store per step
        out_ref[0] = jnp.concatenate([attn_rows, wd_rows], axis=1)  # (RPB, S+1)

    cost = pl.CostEstimate(
        flops=2 * B * D * ((1 + NN) * Cs + (2 + 2 * NN) * S * 3),
        transcendentals=3 * B * RPB * S,
        bytes_accessed=4 * (B * ((2 + 2 * NN) * S * D + (1 + NN) * Cs
                                 + RPB * SW) + Cs * D + 3 * D))

    return pl.pallas_call(
        kernel,
        out_shape=jax.ShapeDtypeStruct((B, RPB, SW), jnp.float32),
        grid=(B,),
        in_specs=[
            pl.BlockSpec((1, S, D), lambda b: (b, 0, 0)),
            pl.BlockSpec((1, S, D), lambda b: (b, 0, 0)),
            pl.BlockSpec((1, NN, S, D), lambda b: (b, 0, 0, 0)),
            pl.BlockSpec((1, NN, S, D), lambda b: (b, 0, 0, 0)),
            pl.BlockSpec((1, 1, Cs), lambda b: (b, 0, 0)),
            pl.BlockSpec((1, NN, Cs), lambda b: (b, 0, 0)),
            pl.BlockSpec((Cs, D), lambda b: (0, 0)),
            pl.BlockSpec((1, D), lambda b: (0, 0)),
            pl.BlockSpec((1, D), lambda b: (0, 0)),
        ],
        out_specs=pl.BlockSpec((1, RPB, SW), lambda b: (b, 0, 0)),
        compiler_params=pltpu.CompilerParams(
            dimension_semantics=("parallel",),
            vmem_limit_bytes=32 * 1024 * 1024),
        cost_estimate=cost,
    )(uf, ul, unf, unl, xsp, xsn, ws12, bs12, au)


# ---------------------------------------------------------------------------
# RankModel forward (training=True path).
# ---------------------------------------------------------------------------
def rank_model_forward(params, u_frontal, u_lateral, v_sent,
                       u_neg_frontal, u_neg_lateral, v_neg_sent,
                       num_negatives, image_hidden, transform_dim):
    p = params
    D = transform_dim
    B = u_frontal.shape[0]
    NN = num_negatives
    BN = B * NN
    S = u_frontal.shape[-2] * u_frontal.shape[-1]

    # ---- weight folding (dropout == identity, no relu / batchnorm) ----
    wf_t = (p["wf"] @ p["w2"]).T                 # (D, C)  frontal, pre-transposed
    wl_t = (p["wl"] @ p["w2"]).T                 # (D, C)  lateral
    bf12 = p["bf"] @ p["w2"] + p["b2"]           # (1, D)
    bl12 = p["bl"] @ p["w2"] + p["b2"]
    ws12 = p["ws"] @ p["w2"]                     # (Cs, D) sentence
    bs12 = p["bs"] @ p["w2"] + p["b2"]
    au = (p["wa_u"] @ p["vp"].T).T               # (1, D)  attention, v-folded
    # wa_h / ba only shift the score by a per-row constant -> cancel in softmax.

    # ---- raw (maps, C, S) views of the NCHW inputs (reshape only, no copy) ----
    xf_pos = u_frontal.reshape(B, image_hidden, S)
    xl_pos = u_lateral.reshape(B, image_hidden, S)
    xf_neg = u_neg_frontal.reshape(BN, image_hidden, S)
    xl_neg = u_neg_lateral.reshape(BN, image_hidden, S)

    uf_feat, ul_feat = _image_transform_call(xf_pos, xl_pos, wf_t, bf12, wl_t, bl12)
    unf_feat, unl_feat = _image_transform_call(xf_neg, xl_neg, wf_t, bf12, wl_t, bl12)

    slab = _attention_call(
        uf_feat, ul_feat,
        unf_feat.reshape(B, NN, S, D), unl_feat.reshape(B, NN, S, D),
        v_sent.reshape(B, 1, -1), v_neg_sent.reshape(B, NN, -1),
        ws12, bs12, au, NN)                      # (B, 2 + 4*NN, S + 1)

    A = slab[..., :S]                            # attention weights
    W = slab[..., S]                             # weighted distances (B, RPB)

    uf_v_attn = A[:, 0, :]
    ul_v_attn = A[:, 1, :]
    uf_vn_attn = A[:, 2:2 + NN, :].reshape(BN, S)
    ul_vn_attn = A[:, 2 + NN:2 + 2 * NN, :].reshape(BN, S)
    unf_v_attn = A[:, 2 + 2 * NN:2 + 3 * NN, :].reshape(BN, S)
    unl_v_attn = A[:, 2 + 3 * NN:2 + 4 * NN, :].reshape(BN, S)

    u_v_d = 0.5 * (W[:, 0] + W[:, 1])
    u_v_d_rep = jnp.repeat(u_v_d, NN)
    u_v_neg_d = (0.5 * (W[:, 2:2 + NN] + W[:, 2 + NN:2 + 2 * NN])).reshape(BN)
    u_neg_v_d = (0.5 * (W[:, 2 + 2 * NN:2 + 3 * NN]
                        + W[:, 2 + 3 * NN:2 + 4 * NN])).reshape(BN)

    return (u_v_d_rep, u_v_neg_d, u_neg_v_d,
            uf_v_attn, ul_v_attn, uf_vn_attn, ul_vn_attn,
            unf_v_attn, unl_v_attn)


# ---------------------------------------------------------------------------
# Pure-JAX reference (unfused, mirrors the PyTorch module step by step).
# ---------------------------------------------------------------------------
def image_to_rows(x, image_hidden):
    N = x.shape[0]
    S = x.shape[-2] * x.shape[-1]
    rows = x.reshape(N, image_hidden, S).transpose(0, 2, 1).reshape(N * S, image_hidden)
    return rows, N, S


def ref_transform(x2d, w1, b1, w2, b2):
    h = x2d @ w1 + b1
    h = h @ w2 + b2
    return h / jnp.maximum(jnp.linalg.norm(h, axis=-1, keepdims=True), 1e-12)


def ref_attn(u, v, wa_u, wa_h, ba, vp):
    H = jnp.broadcast_to(v[:, None, :], u.shape)
    energy = jnp.einsum("bsd,de->bse", u, wa_u) + (H @ wa_h) + ba
    scores = jnp.sum(energy * vp, axis=-1)
    attn = jax.nn.softmax(scores, axis=-1)
    d = jnp.linalg.norm(u - H, axis=-1)
    return jnp.sum(d * attn, axis=-1), attn


def ref_forward(params, u_frontal, u_lateral, v_sent,
                u_neg_frontal, u_neg_lateral, v_neg_sent,
                num_negatives, image_hidden, transform_dim):
    p = params
    D = transform_dim

    def img(x, w, b):
        rows, N, S = image_to_rows(x, image_hidden)
        return ref_transform(rows, w, b, p["w2"], p["b2"]).reshape(N, S, D)

    B = u_frontal.shape[0]
    uf = img(u_frontal, p["wf"], p["bf"])
    ul = img(u_lateral, p["wl"], p["bl"])
    vs = ref_transform(v_sent, p["ws"], p["bs"], p["w2"], p["b2"])
    S = uf.shape[1]

    a = functools.partial(ref_attn, wa_u=p["wa_u"], wa_h=p["wa_h"],
                          ba=p["ba"], vp=p["vp"])
    uf_v_d, uf_v_attn = a(uf, vs)
    ul_v_d, ul_v_attn = a(ul, vs)
    u_v_d = 0.5 * (uf_v_d + ul_v_d)

    BN = B * num_negatives
    unf = img(u_neg_frontal.reshape(BN, image_hidden, *u_neg_frontal.shape[-2:]),
              p["wf"], p["bf"])
    unl = img(u_neg_lateral.reshape(BN, image_hidden, *u_neg_lateral.shape[-2:]),
              p["wl"], p["bl"])
    vns = ref_transform(v_neg_sent.reshape(BN, -1), p["ws"], p["bs"], p["w2"], p["b2"])

    uf_rep = jnp.broadcast_to(uf[:, None], (B, num_negatives, S, D)).reshape(BN, S, D)
    ul_rep = jnp.broadcast_to(ul[:, None], (B, num_negatives, S, D)).reshape(BN, S, D)
    vs_rep = jnp.broadcast_to(vs[:, None], (B, num_negatives, D)).reshape(BN, D)

    uf_vn_d, uf_vn_attn = a(uf_rep, vns)
    ul_vn_d, ul_vn_attn = a(ul_rep, vns)
    unf_v_d, unf_v_attn = a(unf, vs_rep)
    unl_v_d, unl_v_attn = a(unl, vs_rep)

    return (jnp.repeat(u_v_d, num_negatives),
            0.5 * (uf_vn_d + ul_vn_d),
            0.5 * (unf_v_d + unl_v_d),
            uf_v_attn, ul_v_attn, uf_vn_attn, ul_vn_attn, unf_v_attn, unl_v_attn)


# ---------------------------------------------------------------------------
if __name__ == "__main__":
    B = 2                 # batch
    NUM_NEG = 2           # args.num_negatives
    C_IMG = 32            # image_hidden_size
    C_SENT = 24           # sentence_hidden_size
    HS = WS = 4           # spatial -> seq_len = 16
    D = 32                # args.transform_dim

    key = jax.random.PRNGKey(0)
    ks = jax.random.split(key, 16)

    def unif(k, shape, scale):
        return jax.random.uniform(k, shape, jnp.float32, -scale, scale)

    params = {
        # Linear weights stored pre-transposed: (in_features, out_features)
        "wf": unif(ks[0], (C_IMG, D), 1.0 / jnp.sqrt(C_IMG)),
        "bf": unif(ks[1], (1, D), 1.0 / jnp.sqrt(C_IMG)),
        "wl": unif(ks[2], (C_IMG, D), 1.0 / jnp.sqrt(C_IMG)),
        "bl": unif(ks[3], (1, D), 1.0 / jnp.sqrt(C_IMG)),
        "ws": unif(ks[4], (C_SENT, D), 1.0 / jnp.sqrt(C_SENT)),
        "bs": unif(ks[5], (1, D), 1.0 / jnp.sqrt(C_SENT)),
        # FeatureTransform.linear2
        "w2": unif(ks[6], (D, D), 1.0 / jnp.sqrt(D)),
        "b2": unif(ks[7], (1, D), 1.0 / jnp.sqrt(D)),
        # Attn: nn.Linear(2D, D) split into the u-half and H-half of W^T
        "wa_u": unif(ks[8], (D, D), 1.0 / jnp.sqrt(2 * D)),
        "wa_h": unif(ks[9], (D, D), 1.0 / jnp.sqrt(2 * D)),
        "ba": unif(ks[10], (1, D), 1.0 / jnp.sqrt(2 * D)),
        "vp": unif(ks[11], (1, D), 1.0 / jnp.sqrt(D)),
    }

    u_frontal = jax.random.normal(ks[12], (B, C_IMG, HS, WS), jnp.float32)
    u_lateral = jax.random.normal(ks[13], (B, C_IMG, HS, WS), jnp.float32)
    v_sent = jax.random.normal(ks[14], (B, C_SENT), jnp.float32)
    kn = jax.random.split(ks[15], 3)
    u_neg_frontal = jax.random.normal(kn[0], (B, NUM_NEG, C_IMG, HS, WS), jnp.float32)
    u_neg_lateral = jax.random.normal(kn[1], (B, NUM_NEG, C_IMG, HS, WS), jnp.float32)
    v_neg_sent = jax.random.normal(kn[2], (B, NUM_NEG, C_SENT), jnp.float32)

    fwd = jax.jit(rank_model_forward, static_argnums=(7, 8, 9))
    outs = fwd(params, u_frontal, u_lateral, v_sent,
               u_neg_frontal, u_neg_lateral, v_neg_sent,
               NUM_NEG, C_IMG, D)
    outs = jax.block_until_ready(outs)

    refs = ref_forward(params, u_frontal, u_lateral, v_sent,
                       u_neg_frontal, u_neg_lateral, v_neg_sent,
                       NUM_NEG, C_IMG, D)

    for o, r in zip(outs, refs):
        assert o.shape == r.shape, (o.shape, r.shape)
        err = float(jnp.max(jnp.abs(o - r)))
        # 2e-3: covers the approx-reciprocal softmax and the unit-norm
        # distance identity vs. the unfused f32 reference.
        assert err < 2e-3, err

    print("KERNEL_OK")
</pallas_src>

<mosaic_0001>
module attributes {stable_mosaic.version = 11 : i64} {
  func.func @kernel(%arg0: i32, %arg1: memref<2x32x16xf32, #tpu.memory_space<vmem>>, %arg2: memref<2x32x16xf32, #tpu.memory_space<vmem>>, %arg3: memref<32x32xf32, #tpu.memory_space<vmem>>, %arg4: memref<1x32xf32, #tpu.memory_space<vmem>>, %arg5: memref<32x32xf32, #tpu.memory_space<vmem>>, %arg6: memref<1x32xf32, #tpu.memory_space<vmem>>, %arg7: memref<2x16x32xf32, #tpu.memory_space<vmem>>, %arg8: memref<2x16x32xf32, #tpu.memory_space<vmem>>) attributes {dimension_semantics = [#tpu.dimension_semantics<parallel>], iteration_bounds = array<i64: 1>, scalar_prefetch = 0 : i64, scratch_operands = 0 : i64, tpu.core_type = #tpu.core_type<tc>, window_params = [{transform_indices = @transform_0, window_bounds = array<i64: 2, 32, 16>}, {transform_indices = @transform_1, window_bounds = array<i64: 2, 32, 16>}, {pipeline_mode = #tpu.pipeline_mode<synchronous>, transform_indices = @transform_2, window_bounds = array<i64: 32, 32>}, {pipeline_mode = #tpu.pipeline_mode<synchronous>, transform_indices = @transform_3, window_bounds = array<i64: 1, 32>}, {pipeline_mode = #tpu.pipeline_mode<synchronous>, transform_indices = @transform_4, window_bounds = array<i64: 32, 32>}, {pipeline_mode = #tpu.pipeline_mode<synchronous>, transform_indices = @transform_5, window_bounds = array<i64: 1, 32>}, {transform_indices = @transform_6, window_bounds = array<i64: 2, 16, 32>}, {transform_indices = @transform_7, window_bounds = array<i64: 2, 16, 32>}]} {
    %c0_i32 = arith.constant 0 : i32
    %c0 = arith.constant 0 : index
    %c0_0 = arith.constant 0 : index
    %0 = vector.load %arg3[%c0, %c0_0] : memref<32x32xf32, #tpu.memory_space<vmem>>, vector<32x32xf32>
    %1 = arith.index_cast %c0_i32 : i32 to index
    %c0_1 = arith.constant 0 : index
    %c0_2 = arith.constant 0 : index
    %2 = vector.load %arg1[%1, %c0_1, %c0_2] : memref<2x32x16xf32, #tpu.memory_space<vmem>>, vector<1x32x16xf32>
    %3 = vector.shape_cast %2 : vector<1x32x16xf32> to vector<32x16xf32>
    %cst = arith.constant dense<0.000000e+00> : vector<32x16xf32>
    %4 = tpu.matmul %0, %3, %cst {dimension_numbers = #tpu.dot_dimension_numbers<[1], [0], [0], [1], [0, 0, 1, 1], [], []>} : vector<32x32xf32>, vector<32x16xf32>, vector<32x16xf32> -> vector<32x16xf32>
    %5 = tpu.transpose %4, [1, 0] : vector<32x16xf32> -> vector<16x32xf32>
    %c0_3 = arith.constant 0 : index
    %c0_4 = arith.constant 0 : index
    %6 = vector.load %arg4[%c0_3, %c0_4] : memref<1x32xf32, #tpu.memory_space<vmem>>, vector<1x32xf32>
    %7 = vector.broadcast %6 : vector<1x32xf32> to vector<16x32xf32>
    %8 = arith.addf %5, %7 : vector<16x32xf32>
    %9 = arith.mulf %8, %8 : vector<16x32xf32>
    %cst_5 = arith.constant dense<0.000000e+00> : vector<16xf32>
    %10 = vector.multi_reduction <add>, %9, %cst_5 [1] : vector<16x32xf32> to vector<16xf32>
    %11 = vector.shape_cast %10 : vector<16xf32> to vector<16x1xf32>
    %cst_6 = arith.constant 1.000000e-24 : f32
    %12 = vector.broadcast %cst_6 : f32 to vector<16x1xf32>
    %13 = arith.maximumf %11, %12 : vector<16x1xf32>
    %14 = math.rsqrt %13 : vector<16x1xf32>
    %15 = vector.broadcast %14 : vector<16x1xf32> to vector<16x32xf32>
    %16 = arith.mulf %8, %15 : vector<16x32xf32>
    %17 = arith.index_cast %c0_i32 : i32 to index
    %c0_7 = arith.constant 0 : index
    %c0_8 = arith.constant 0 : index
    %18 = vector.load %arg7[%17, %c0_7, %c0_8] : memref<2x16x32xf32, #tpu.memory_space<vmem>>, vector<1x16x32xf32>
    %19 = vector.shape_cast %18 : vector<1x16x32xf32> to vector<16x32xf32>
    %20 = vector.shape_cast %16 : vector<16x32xf32> to vector<1x16x32xf32>
    tpu.vector_store %arg7[%17, %c0_7, %c0_8], %20 {strides = array<i32>} : memref<2x16x32xf32, #tpu.memory_space<vmem>>, vector<1x16x32xf32>,
    %c0_9 = arith.constant 0 : index
    %c0_10 = arith.constant 0 : index
    %21 = vector.load %arg5[%c0_9, %c0_10] : memref<32x32xf32, #tpu.memory_space<vmem>>, vector<32x32xf32>
    %22 = arith.index_cast %c0_i32 : i32 to index
    %c0_11 = arith.constant 0 : index
    %c0_12 = arith.constant 0 : index
    %23 = vector.load %arg2[%22, %c0_11, %c0_12] : memref<2x32x16xf32, #tpu.memory_space<vmem>>, vector<1x32x16xf32>
    %24 = vector.shape_cast %23 : vector<1x32x16xf32> to vector<32x16xf32>
    %cst_13 = arith.constant dense<0.000000e+00> : vector<32x16xf32>
    %25 = tpu.matmul %21, %24, %cst_13 {dimension_numbers = #tpu.dot_dimension_numbers<[1], [0], [0], [1], [0, 0, 1, 1], [], []>} : vector<32x32xf32>, vector<32x16xf32>, vector<32x16xf32> -> vector<32x16xf32>
    %26 = tpu.transpose %25, [1, 0] : vector<32x16xf32> -> vector<16x32xf32>
    %c0_14 = arith.constant 0 : index
    %c0_15 = arith.constant 0 : index
    %27 = vector.load %arg6[%c0_14, %c0_15] : memref<1x32xf32, #tpu.memory_space<vmem>>, vector<1x32xf32>
    %28 = vector.broadcast %27 : vector<1x32xf32> to vector<16x32xf32>
    %29 = arith.addf %26, %28 : vector<16x32xf32>
    %30 = arith.mulf %29, %29 : vector<16x32xf32>
    %cst_16 = arith.constant dense<0.000000e+00> : vector<16xf32>
    %31 = vector.multi_reduction <add>, %30, %cst_16 [1] : vector<16x32xf32> to vector<16xf32>
    %32 = vector.shape_cast %31 : vector<16xf32> to vector<16x1xf32>
    %cst_17 = arith.constant 1.000000e-24 : f32
    %33 = vector.broadcast %cst_17 : f32 to vector<16x1xf32>
    %34 = arith.maximumf %32, %33 : vector<16x1xf32>
    %35 = math.rsqrt %34 : vector<16x1xf32>
    %36 = vector.broadcast %35 : vector<16x1xf32> to vector<16x32xf32>
    %37 = arith.mulf %29, %36 : vector<16x32xf32>
    %38 = arith.index_cast %c0_i32 : i32 to index
    %c0_18 = arith.constant 0 : index
    %c0_19 = arith.constant 0 : index
    %39 = vector.load %arg8[%38, %c0_18, %c0_19] : memref<2x16x32xf32, #tpu.memory_space<vmem>>, vector<1x16x32xf32>
    %40 = vector.shape_cast %39 : vector<1x16x32xf32> to vector<16x32xf32>
    %41 = vector.shape_cast %37 : vector<16x32xf32> to vector<1x16x32xf32>
    tpu.vector_store %arg8[%38, %c0_18, %c0_19], %41 {strides = array<i32>} : memref<2x16x32xf32, #tpu.memory_space<vmem>>, vector<1x16x32xf32>,
    %c1_i32 = arith.constant 1 : i32
    %c0_20 = arith.constant 0 : index
    %c0_21 = arith.constant 0 : index
    %42 = vector.load %arg3[%c0_20, %c0_21] : memref<32x32xf32, #tpu.memory_space<vmem>>, vector<32x32xf32>
    %43 = arith.index_cast %c1_i32 : i32 to index
    %c0_22 = arith.constant 0 : index
    %c0_23 = arith.constant 0 : index
    %44 = vector.load %arg1[%43, %c0_22, %c0_23] : memref<2x32x16xf32, #tpu.memory_space<vmem>>, vector<1x32x16xf32>
    %45 = vector.shape_cast %44 : vector<1x32x16xf32> to vector<32x16xf32>
    %cst_24 = arith.constant dense<0.000000e+00> : vector<32x16xf32>
    %46 = tpu.matmul %42, %45, %cst_24 {dimension_numbers = #tpu.dot_dimension_numbers<[1], [0], [0], [1], [0, 0, 1, 1], [], []>} : vector<32x32xf32>, vector<32x16xf32>, vector<32x16xf32> -> vector<32x16xf32>
    %47 = tpu.transpose %46, [1, 0] : vector<32x16xf32> -> vector<16x32xf32>
    %c0_25 = arith.constant 0 : index
    %c0_26 = arith.constant 0 : index
    %48 = vector.load %arg4[%c0_25, %c0_26] : memref<1x32xf32, #tpu.memory_space<vmem>>, vector<1x32xf32>
    %49 = vector.broadcast %48 : vector<1x32xf32> to vector<16x32xf32>
    %50 = arith.addf %47, %49 : vector<16x32xf32>
    %51 = arith.mulf %50, %50 : vector<16x32xf32>
    %cst_27 = arith.constant dense<0.000000e+00> : vector<16xf32>
    %52 = vector.multi_reduction <add>, %51, %cst_27 [1] : vector<16x32xf32> to vector<16xf32>
    %53 = vector.shape_cast %52 : vector<16xf32> to vector<16x1xf32>
    %cst_28 = arith.constant 1.000000e-24 : f32
    %54 = vector.broadcast %cst_28 : f32 to vector<16x1xf32>
    %55 = arith.maximumf %53, %54 : vector<16x1xf32>
    %56 = math.rsqrt %55 : vector<16x1xf32>
    %57 = vector.broadcast %56 : vector<16x1xf32> to vector<16x32xf32>
    %58 = arith.mulf %50, %57 : vector<16x32xf32>
    %59 = arith.index_cast %c1_i32 : i32 to index
    %c0_29 = arith.constant 0 : index
    %c0_30 = arith.constant 0 : index
    %60 = vector.load %arg7[%59, %c0_29, %c0_30] : memref<2x16x32xf32, #tpu.memory_space<vmem>>, vector<1x16x32xf32>
    %61 = vector.shape_cast %60 : vector<1x16x32xf32> to vector<16x32xf32>
    %62 = vector.shape_cast %58 : vector<16x32xf32> to vector<1x16x32xf32>
    tpu.vector_store %arg7[%59, %c0_29, %c0_30], %62 {strides = array<i32>} : memref<2x16x32xf32, #tpu.memory_space<vmem>>, vector<1x16x32xf32>,
    %c0_31 = arith.constant 0 : index
    %c0_32 = arith.constant 0 : index
    %63 = vector.load %arg5[%c0_31, %c0_32] : memref<32x32xf32, #tpu.memory_space<vmem>>, vector<32x32xf32>
    %64 = arith.index_cast %c1_i32 : i32 to index
    %c0_33 = arith.constant 0 : index
    %c0_34 = arith.constant 0 : index
    %65 = vector.load %arg2[%64, %c0_33, %c0_34] : memref<2x32x16xf32, #tpu.memory_space<vmem>>, vector<1x32x16xf32>
    %66 = vector.shape_cast %65 : vector<1x32x16xf32> to vector<32x16xf32>
    %cst_35 = arith.constant dense<0.000000e+00> : vector<32x16xf32>
    %67 = tpu.matmul %63, %66, %cst_35 {dimension_numbers = #tpu.dot_dimension_numbers<[1], [0], [0], [1], [0, 0, 1, 1], [], []>} : vector<32x32xf32>, vector<32x16xf32>, vector<32x16xf32> -> vector<32x16xf32>
    %68 = tpu.transpose %67, [1, 0] : vector<32x16xf32> -> vector<16x32xf32>
    %c0_36 = arith.constant 0 : index
    %c0_37 = arith.constant 0 : index
    %69 = vector.load %arg6[%c0_36, %c0_37] : memref<1x32xf32, #tpu.memory_space<vmem>>, vector<1x32xf32>
    %70 = vector.broadcast %69 : vector<1x32xf32> to vector<16x32xf32>
    %71 = arith.addf %68, %70 : vector<16x32xf32>
    %72 = arith.mulf %71, %71 : vector<16x32xf32>
    %cst_38 = arith.constant dense<0.000000e+00> : vector<16xf32>
    %73 = vector.multi_reduction <add>, %72, %cst_38 [1] : vector<16x32xf32> to vector<16xf32>
    %74 = vector.shape_cast %73 : vector<16xf32> to vector<16x1xf32>
    %cst_39 = arith.constant 1.000000e-24 : f32
    %75 = vector.broadcast %cst_39 : f32 to vector<16x1xf32>
    %76 = arith.maximumf %74, %75 : vector<16x1xf32>
    %77 = math.rsqrt %76 : vector<16x1xf32>
    %78 = vector.broadcast %77 : vector<16x1xf32> to vector<16x32xf32>
    %79 = arith.mulf %71, %78 : vector<16x32xf32>
    %80 = arith.index_cast %c1_i32 : i32 to index
    %c0_40 = arith.constant 0 : index
    %c0_41 = arith.constant 0 : index
    %81 = vector.load %arg8[%80, %c0_40, %c0_41] : memref<2x16x32xf32, #tpu.memory_space<vmem>>, vector<1x16x32xf32>
    %82 = vector.shape_cast %81 : vector<1x16x32xf32> to vector<16x32xf32>
    %83 = vector.shape_cast %79 : vector<16x32xf32> to vector<1x16x32xf32>
    tpu.vector_store %arg8[%80, %c0_40, %c0_41], %83 {strides = array<i32>} : memref<2x16x32xf32, #tpu.memory_space<vmem>>, vector<1x16x32xf32>,
    %c2_i32 = arith.constant 2 : i32
    return
  }
  func.func @transform_0(%arg0: i32) -> (i32, i32, i32) {
    %c0_i32 = arith.constant 0 : i32
    %c0_i32_0 = arith.constant 0 : i32
    %c0_i32_1 = arith.constant 0 : i32
    return %arg0, %c0_i32, %c0_i32_0 : i32, i32, i32
  }
  func.func @transform_1(%arg0: i32) -> (i32, i32, i32) {
    %c0_i32 = arith.constant 0 : i32
    %c0_i32_0 = arith.constant 0 : i32
    %c0_i32_1 = arith.constant 0 : i32
    return %arg0, %c0_i32, %c0_i32_0 : i32, i32, i32
  }
  func.func @transform_2(%arg0: i32) -> (i32, i32) {
    %c0_i32 = arith.constant 0 : i32
    %c0_i32_0 = arith.constant 0 : i32
    %c0_i32_1 = arith.constant 0 : i32
    return %c0_i32, %c0_i32_0 : i32, i32
  }
  func.func @transform_3(%arg0: i32) -> (i32, i32) {
    %c0_i32 = arith.constant 0 : i32
    %c0_i32_0 = arith.constant 0 : i32
    %c0_i32_1 = arith.constant 0 : i32
    return %c0_i32, %c0_i32_0 : i32, i32
  }
  func.func @transform_4(%arg0: i32) -> (i32, i32) {
    %c0_i32 = arith.constant 0 : i32
    %c0_i32_0 = arith.constant 0 : i32
    %c0_i32_1 = arith.constant 0 : i32
    return %c0_i32, %c0_i32_0 : i32, i32
  }
  func.func @transform_5(%arg0: i32) -> (i32, i32) {
    %c0_i32 = arith.constant 0 : i32
    %c0_i32_0 = arith.constant 0 : i32
    %c0_i32_1 = arith.constant 0 : i32
    return %c0_i32, %c0_i32_0 : i32, i32
  }
  func.func @transform_6(%arg0: i32) -> (i32, i32, i32) {
    %c0_i32 = arith.constant 0 : i32
    %c0_i32_0 = arith.constant 0 : i32
    %c0_i32_1 = arith.constant 0 : i32
    return %arg0, %c0_i32, %c0_i32_0 : i32, i32, i32
  }
  func.func @transform_7(%arg0: i32) -> (i32, i32, i32) {
    %c0_i32 = arith.constant 0 : i32
    %c0_i32_0 = arith.constant 0 : i32
    %c0_i32_1 = arith.constant 0 : i32
    return %arg0, %c0_i32, %c0_i32_0 : i32, i32, i32
  }
}

module attributes {stable_mosaic.version = 11 : i64} {
  func.func @kernel(%arg0: i32, %arg1: memref<4x32x16xf32, #tpu.memory_space<vmem>>, %arg2: memref<4x32x16xf32, #tpu.memory_space<vmem>>, %arg3: memref<32x32xf32, #tpu.memory_space<vmem>>, %arg4: memref<1x32xf32, #tpu.memory_space<vmem>>, %arg5: memref<32x32xf32, #tpu.memory_space<vmem>>, %arg6: memref<1x32xf32, #tpu.memory_space<vmem>>, %arg7: memref<4x16x32xf32, #tpu.memory_space<vmem>>, %arg8: memref<4x16x32xf32, #tpu.memory_space<vmem>>) attributes {dimension_semantics = [#tpu.dimension_semantics<parallel>], iteration_bounds = array<i64: 1>, scalar_prefetch = 0 : i64, scratch_operands = 0 : i64, tpu.core_type = #tpu.core_type<tc>, window_params = [{transform_indices = @transform_0, window_bounds = array<i64: 4, 32, 16>}, {transform_indices = @transform_1, window_bounds = array<i64: 4, 32, 16>}, {pipeline_mode = #tpu.pipeline_mode<synchronous>, transform_indices = @transform_2, window_bounds = array<i64: 32, 32>}, {pipeline_mode = #tpu.pipeline_mode<synchronous>, transform_indices = @transform_3, window_bounds = array<i64: 1, 32>}, {pipeline_mode = #tpu.pipeline_mode<synchronous>, transform_indices = @transform_4, window_bounds = array<i64: 32, 32>}, {pipeline_mode = #tpu.pipeline_mode<synchronous>, transform_indices = @transform_5, window_bounds = array<i64: 1, 32>}, {transform_indices = @transform_6, window_bounds = array<i64: 4, 16, 32>}, {transform_indices = @transform_7, window_bounds = array<i64: 4, 16, 32>}]} {
    %c0_i32 = arith.constant 0 : i32
    %c0 = arith.constant 0 : index
    %c0_0 = arith.constant 0 : index
    %0 = vector.load %arg3[%c0, %c0_0] : memref<32x32xf32, #tpu.memory_space<vmem>>, vector<32x32xf32>
    %1 = arith.index_cast %c0_i32 : i32 to index
    %c0_1 = arith.constant 0 : index
    %c0_2 = arith.constant 0 : index
    %2 = vector.load %arg1[%1, %c0_1, %c0_2] : memref<4x32x16xf32, #tpu.memory_space<vmem>>, vector<1x32x16xf32>
    %3 = vector.shape_cast %2 : vector<1x32x16xf32> to vector<32x16xf32>
    %cst = arith.constant dense<0.000000e+00> : vector<32x16xf32>
    %4 = tpu.matmul %0, %3, %cst {dimension_numbers = #tpu.dot_dimension_numbers<[1], [0], [0], [1], [0, 0, 1, 1], [], []>} : vector<32x32xf32>, vector<32x16xf32>, vector<32x16xf32> -> vector<32x16xf32>
    %5 = tpu.transpose %4, [1, 0] : vector<32x16xf32> -> vector<16x32xf32>
    %c0_3 = arith.constant 0 : index
    %c0_4 = arith.constant 0 : index
    %6 = vector.load %arg4[%c0_3, %c0_4] : memref<1x32xf32, #tpu.memory_space<vmem>>, vector<1x32xf32>
    %7 = vector.broadcast %6 : vector<1x32xf32> to vector<16x32xf32>
    %8 = arith.addf %5, %7 : vector<16x32xf32>
    %9 = arith.mulf %8, %8 : vector<16x32xf32>
    %cst_5 = arith.constant dense<0.000000e+00> : vector<16xf32>
    %10 = vector.multi_reduction <add>, %9, %cst_5 [1] : vector<16x32xf32> to vector<16xf32>
    %11 = vector.shape_cast %10 : vector<16xf32> to vector<16x1xf32>
    %cst_6 = arith.constant 1.000000e-24 : f32
    %12 = vector.broadcast %cst_6 : f32 to vector<16x1xf32>
    %13 = arith.maximumf %11, %12 : vector<16x1xf32>
    %14 = math.rsqrt %13 : vector<16x1xf32>
    %15 = vector.broadcast %14 : vector<16x1xf32> to vector<16x32xf32>
    %16 = arith.mulf %8, %15 : vector<16x32xf32>
    %17 = arith.index_cast %c0_i32 : i32 to index
    %c0_7 = arith.constant 0 : index
    %c0_8 = arith.constant 0 : index
    %18 = vector.load %arg7[%17, %c0_7, %c0_8] : memref<4x16x32xf32, #tpu.memory_space<vmem>>, vector<1x16x32xf32>
    %19 = vector.shape_cast %18 : vector<1x16x32xf32> to vector<16x32xf32>
    %20 = vector.shape_cast %16 : vector<16x32xf32> to vector<1x16x32xf32>
    tpu.vector_store %arg7[%17, %c0_7, %c0_8], %20 {strides = array<i32>} : memref<4x16x32xf32, #tpu.memory_space<vmem>>, vector<1x16x32xf32>,
    %c0_9 = arith.constant 0 : index
    %c0_10 = arith.constant 0 : index
    %21 = vector.load %arg5[%c0_9, %c0_10] : memref<32x32xf32, #tpu.memory_space<vmem>>, vector<32x32xf32>
    %22 = arith.index_cast %c0_i32 : i32 to index
    %c0_11 = arith.constant 0 : index
    %c0_12 = arith.constant 0 : index
    %23 = vector.load %arg2[%22, %c0_11, %c0_12] : memref<4x32x16xf32, #tpu.memory_space<vmem>>, vector<1x32x16xf32>
    %24 = vector.shape_cast %23 : vector<1x32x16xf32> to vector<32x16xf32>
    %cst_13 = arith.constant dense<0.000000e+00> : vector<32x16xf32>
    %25 = tpu.matmul %21, %24, %cst_13 {dimension_numbers = #tpu.dot_dimension_numbers<[1], [0], [0], [1], [0, 0, 1, 1], [], []>} : vector<32x32xf32>, vector<32x16xf32>, vector<32x16xf32> -> vector<32x16xf32>
    %26 = tpu.transpose %25, [1, 0] : vector<32x16xf32> -> vector<16x32xf32>
    %c0_14 = arith.constant 0 : index
    %c0_15 = arith.constant 0 : index
    %27 = vector.load %arg6[%c0_14, %c0_15] : memref<1x32xf32, #tpu.memory_space<vmem>>, vector<1x32xf32>
    %28 = vector.broadcast %27 : vector<1x32xf32> to vector<16x32xf32>
    %29 = arith.addf %26, %28 : vector<16x32xf32>
    %30 = arith.mulf %29, %29 : vector<16x32xf32>
    %cst_16 = arith.constant dense<0.000000e+00> : vector<16xf32>
    %31 = vector.multi_reduction <add>, %30, %cst_16 [1] : vector<16x32xf32> to vector<16xf32>
    %32 = vector.shape_cast %31 : vector<16xf32> to vector<16x1xf32>
    %cst_17 = arith.constant 1.000000e-24 : f32
    %33 = vector.broadcast %cst_17 : f32 to vector<16x1xf32>
    %34 = arith.maximumf %32, %33 : vector<16x1xf32>
    %35 = math.rsqrt %34 : vector<16x1xf32>
    %36 = vector.broadcast %35 : vector<16x1xf32> to vector<16x32xf32>
    %37 = arith.mulf %29, %36 : vector<16x32xf32>
    %38 = arith.index_cast %c0_i32 : i32 to index
    %c0_18 = arith.constant 0 : index
    %c0_19 = arith.constant 0 : index
    %39 = vector.load %arg8[%38, %c0_18, %c0_19] : memref<4x16x32xf32, #tpu.memory_space<vmem>>, vector<1x16x32xf32>
    %40 = vector.shape_cast %39 : vector<1x16x32xf32> to vector<16x32xf32>
    %41 = vector.shape_cast %37 : vector<16x32xf32> to vector<1x16x32xf32>
    tpu.vector_store %arg8[%38, %c0_18, %c0_19], %41 {strides = array<i32>} : memref<4x16x32xf32, #tpu.memory_space<vmem>>, vector<1x16x32xf32>,
    %c1_i32 = arith.constant 1 : i32
    %c0_20 = arith.constant 0 : index
    %c0_21 = arith.constant 0 : index
    %42 = vector.load %arg3[%c0_20, %c0_21] : memref<32x32xf32, #tpu.memory_space<vmem>>, vector<32x32xf32>
    %43 = arith.index_cast %c1_i32 : i32 to index
    %c0_22 = arith.constant 0 : index
    %c0_23 = arith.constant 0 : index
    %44 = vector.load %arg1[%43, %c0_22, %c0_23] : memref<4x32x16xf32, #tpu.memory_space<vmem>>, vector<1x32x16xf32>
    %45 = vector.shape_cast %44 : vector<1x32x16xf32> to vector<32x16xf32>
    %cst_24 = arith.constant dense<0.000000e+00> : vector<32x16xf32>
    %46 = tpu.matmul %42, %45, %cst_24 {dimension_numbers = #tpu.dot_dimension_numbers<[1], [0], [0], [1], [0, 0, 1, 1], [], []>} : vector<32x32xf32>, vector<32x16xf32>, vector<32x16xf32> -> vector<32x16xf32>
    %47 = tpu.transpose %46, [1, 0] : vector<32x16xf32> -> vector<16x32xf32>
    %c0_25 = arith.constant 0 : index
    %c0_26 = arith.constant 0 : index
    %48 = vector.load %arg4[%c0_25, %c0_26] : memref<1x32xf32, #tpu.memory_space<vmem>>, vector<1x32xf32>
    %49 = vector.broadcast %48 : vector<1x32xf32> to vector<16x32xf32>
    %50 = arith.addf %47, %49 : vector<16x32xf32>
    %51 = arith.mulf %50, %50 : vector<16x32xf32>
    %cst_27 = arith.constant dense<0.000000e+00> : vector<16xf32>
    %52 = vector.multi_reduction <add>, %51, %cst_27 [1] : vector<16x32xf32> to vector<16xf32>
    %53 = vector.shape_cast %52 : vector<16xf32> to vector<16x1xf32>
    %cst_28 = arith.constant 1.000000e-24 : f32
    %54 = vector.broadcast %cst_28 : f32 to vector<16x1xf32>
    %55 = arith.maximumf %53, %54 : vector<16x1xf32>
    %56 = math.rsqrt %55 : vector<16x1xf32>
    %57 = vector.broadcast %56 : vector<16x1xf32> to vector<16x32xf32>
    %58 = arith.mulf %50, %57 : vector<16x32xf32>
    %59 = arith.index_cast %c1_i32 : i32 to index
    %c0_29 = arith.constant 0 : index
    %c0_30 = arith.constant 0 : index
    %60 = vector.load %arg7[%59, %c0_29, %c0_30] : memref<4x16x32xf32, #tpu.memory_space<vmem>>, vector<1x16x32xf32>
    %61 = vector.shape_cast %60 : vector<1x16x32xf32> to vector<16x32xf32>
    %62 = vector.shape_cast %58 : vector<16x32xf32> to vector<1x16x32xf32>
    tpu.vector_store %arg7[%59, %c0_29, %c0_30], %62 {strides = array<i32>} : memref<4x16x32xf32, #tpu.memory_space<vmem>>, vector<1x16x32xf32>,
    %c0_31 = arith.constant 0 : index
    %c0_32 = arith.constant 0 : index
    %63 = vector.load %arg5[%c0_31, %c0_32] : memref<32x32xf32, #tpu.memory_space<vmem>>, vector<32x32xf32>
    %64 = arith.index_cast %c1_i32 : i32 to index
    %c0_33 = arith.constant 0 : index
    %c0_34 = arith.constant 0 : index
    %65 = vector.load %arg2[%64, %c0_33, %c0_34] : memref<4x32x16xf32, #tpu.memory_space<vmem>>, vector<1x32x16xf32>
    %66 = vector.shape_cast %65 : vector<1x32x16xf32> to vector<32x16xf32>
    %cst_35 = arith.constant dense<0.000000e+00> : vector<32x16xf32>
    %67 = tpu.matmul %63, %66, %cst_35 {dimension_numbers = #tpu.dot_dimension_numbers<[1], [0], [0], [1], [0, 0, 1, 1], [], []>} : vector<32x32xf32>, vector<32x16xf32>, vector<32x16xf32> -> vector<32x16xf32>
    %68 = tpu.transpose %67, [1, 0] : vector<32x16xf32> -> vector<16x32xf32>
    %c0_36 = arith.constant 0 : index
    %c0_37 = arith.constant 0 : index
    %69 = vector.load %arg6[%c0_36, %c0_37] : memref<1x32xf32, #tpu.memory_space<vmem>>, vector<1x32xf32>
    %70 = vector.broadcast %69 : vector<1x32xf32> to vector<16x32xf32>
    %71 = arith.addf %68, %70 : vector<16x32xf32>
    %72 = arith.mulf %71, %71 : vector<16x32xf32>
    %cst_38 = arith.constant dense<0.000000e+00> : vector<16xf32>
    %73 = vector.multi_reduction <add>, %72, %cst_38 [1] : vector<16x32xf32> to vector<16xf32>
    %74 = vector.shape_cast %73 : vector<16xf32> to vector<16x1xf32>
    %cst_39 = arith.constant 1.000000e-24 : f32
    %75 = vector.broadcast %cst_39 : f32 to vector<16x1xf32>
    %76 = arith.maximumf %74, %75 : vector<16x1xf32>
    %77 = math.rsqrt %76 : vector<16x1xf32>
    %78 = vector.broadcast %77 : vector<16x1xf32> to vector<16x32xf32>
    %79 = arith.mulf %71, %78 : vector<16x32xf32>
    %80 = arith.index_cast %c1_i32 : i32 to index
    %c0_40 = arith.constant 0 : index
    %c0_41 = arith.constant 0 : index
    %81 = vector.load %arg8[%80, %c0_40, %c0_41] : memref<4x16x32xf32, #tpu.memory_space<vmem>>, vector<1x16x32xf32>
    %82 = vector.shape_cast %81 : vector<1x16x32xf32> to vector<16x32xf32>
    %83 = vector.shape_cast %79 : vector<16x32xf32> to vector<1x16x32xf32>
    tpu.vector_store %arg8[%80, %c0_40, %c0_41], %83 {strides = array<i32>} : memref<4x16x32xf32, #tpu.memory_space<vmem>>, vector<1x16x32xf32>,
    %c2_i32 = arith.constant 2 : i32
    %c0_42 = arith.constant 0 : index
    %c0_43 = arith.constant 0 : index
    %84 = vector.load %arg3[%c0_42, %c0_43] : memref<32x32xf32, #tpu.memory_space<vmem>>, vector<32x32xf32>
    %85 = arith.index_cast %c2_i32 : i32 to index
    %c0_44 = arith.constant 0 : index
    %c0_45 = arith.constant 0 : index
    %86 = vector.load %arg1[%85, %c0_44, %c0_45] : memref<4x32x16xf32, #tpu.memory_space<vmem>>, vector<1x32x16xf32>
    %87 = vector.shape_cast %86 : vector<1x32x16xf32> to vector<32x16xf32>
    %cst_46 = arith.constant dense<0.000000e+00> : vector<32x16xf32>
    %88 = tpu.matmul %84, %87, %cst_46 {dimension_numbers = #tpu.dot_dimension_numbers<[1], [0], [0], [1], [0, 0, 1, 1], [], []>} : vector<32x32xf32>, vector<32x16xf32>, vector<32x16xf32> -> vector<32x16xf32>
    %89 = tpu.transpose %88, [1, 0] : vector<32x16xf32> -> vector<16x32xf32>
    %c0_47 = arith.constant 0 : index
    %c0_48 = arith.constant 0 : index
    %90 = vector.load %arg4[%c0_47, %c0_48] : memref<1x32xf32, #tpu.memory_space<vmem>>, vector<1x32xf32>
    %91 = vector.broadcast %90 : vector<1x32xf32> to vector<16x32xf32>
    %92 = arith.addf %89, %91 : vector<16x32xf32>
    %93 = arith.mulf %92, %92 : vector<16x32xf32>
    %cst_49 = arith.constant dense<0.000000e+00> : vector<16xf32>
    %94 = vector.multi_reduction <add>, %93, %cst_49 [1] : vector<16x32xf32> to vector<16xf32>
    %95 = vector.shape_cast %94 : vector<16xf32> to vector<16x1xf32>
    %cst_50 = arith.constant 1.000000e-24 : f32
    %96 = vector.broadcast %cst_50 : f32 to vector<16x1xf32>
    %97 = arith.maximumf %95, %96 : vector<16x1xf32>
    %98 = math.rsqrt %97 : vector<16x1xf32>
    %99 = vector.broadcast %98 : vector<16x1xf32> to vector<16x32xf32>
    %100 = arith.mulf %92, %99 : vector<16x32xf32>
    %101 = arith.index_cast %c2_i32 : i32 to index
    %c0_51 = arith.constant 0 : index
    %c0_52 = arith.constant 0 : index
    %102 = vector.load %arg7[%101, %c0_51, %c0_52] : memref<4x16x32xf32, #tpu.memory_space<vmem>>, vector<1x16x32xf32>
    %103 = vector.shape_cast %102 : vector<1x16x32xf32> to vector<16x32xf32>
    %104 = vector.shape_cast %100 : vector<16x32xf32> to vector<1x16x32xf32>
    tpu.vector_store %arg7[%101, %c0_51, %c0_52], %104 {strides = array<i32>} : memref<4x16x32xf32, #tpu.memory_space<vmem>>, vector<1x16x32xf32>,
    %c0_53 = arith.constant 0 : index
    %c0_54 = arith.constant 0 : index
    %105 = vector.load %arg5[%c0_53, %c0_54] : memref<32x32xf32, #tpu.memory_space<vmem>>, vector<32x32xf32>
    %106 = arith.index_cast %c2_i32 : i32 to index
    %c0_55 = arith.constant 0 : index
    %c0_56 = arith.constant 0 : index
    %107 = vector.load %arg2[%106, %c0_55, %c0_56] : memref<4x32x16xf32, #tpu.memory_space<vmem>>, vector<1x32x16xf32>
    %108 = vector.shape_cast %107 : vector<1x32x16xf32> to vector<32x16xf32>
    %cst_57 = arith.constant dense<0.000000e+00> : vector<32x16xf32>
    %109 = tpu.matmul %105, %108, %cst_57 {dimension_numbers = #tpu.dot_dimension_numbers<[1], [0], [0], [1], [0, 0, 1, 1], [], []>} : vector<32x32xf32>, vector<32x16xf32>, vector<32x16xf32> -> vector<32x16xf32>
    %110 = tpu.transpose %109, [1, 0] : vector<32x16xf32> -> vector<16x32xf32>
    %c0_58 = arith.constant 0 : index
    %c0_59 = arith.constant 0 : index
    %111 = vector.load %arg6[%c0_58, %c0_59] : memref<1x32xf32, #tpu.memory_space<vmem>>, vector<1x32xf32>
    %112 = vector.broadcast %111 : vector<1x32xf32> to vector<16x32xf32>
    %113 = arith.addf %110, %112 : vector<16x32xf32>
    %114 = arith.mulf %113, %113 : vector<16x32xf32>
    %cst_60 = arith.constant dense<0.000000e+00> : vector<16xf32>
    %115 = vector.multi_reduction <add>, %114, %cst_60 [1] : vector<16x32xf32> to vector<16xf32>
    %116 = vector.shape_cast %115 : vector<16xf32> to vector<16x1xf32>
    %cst_61 = arith.constant 1.000000e-24 : f32
    %117 = vector.broadcast %cst_61 : f32 to vector<16x1xf32>
    %118 = arith.maximumf %116, %117 : vector<16x1xf32>
    %119 = math.rsqrt %118 : vector<16x1xf32>
    %120 = vector.broadcast %119 : vector<16x1xf32> to vector<16x32xf32>
    %121 = arith.mulf %113, %120 : vector<16x32xf32>
    %122 = arith.index_cast %c2_i32 : i32 to index
    %c0_62 = arith.constant 0 : index
    %c0_63 = arith.constant 0 : index
    %123 = vector.load %arg8[%122, %c0_62, %c0_63] : memref<4x16x32xf32, #tpu.memory_space<vmem>>, vector<1x16x32xf32>
    %124 = vector.shape_cast %123 : vector<1x16x32xf32> to vector<16x32xf32>
    %125 = vector.shape_cast %121 : vector<16x32xf32> to vector<1x16x32xf32>
    tpu.vector_store %arg8[%122, %c0_62, %c0_63], %125 {strides = array<i32>} : memref<4x16x32xf32, #tpu.memory_space<vmem>>, vector<1x16x32xf32>,
    %c3_i32 = arith.constant 3 : i32
    %c0_64 = arith.constant 0 : index
    %c0_65 = arith.constant 0 : index
    %126 = vector.load %arg3[%c0_64, %c0_65] : memref<32x32xf32, #tpu.memory_space<vmem>>, vector<32x32xf32>
    %127 = arith.index_cast %c3_i32 : i32 to index
    %c0_66 = arith.constant 0 : index
    %c0_67 = arith.constant 0 : index
    %128 = vector.load %arg1[%127, %c0_66, %c0_67] : memref<4x32x16xf32, #tpu.memory_space<vmem>>, vector<1x32x16xf32>
    %129 = vector.shape_cast %128 : vector<1x32x16xf32> to vector<32x16xf32>
    %cst_68 = arith.constant dense<0.000000e+00> : vector<32x16xf32>
    %130 = tpu.matmul %126, %129, %cst_68 {dimension_numbers = #tpu.dot_dimension_numbers<[1], [0], [0], [1], [0, 0, 1, 1], [], []>} : vector<32x32xf32>, vector<32x16xf32>, vector<32x16xf32> -> vector<32x16xf32>
    %131 = tpu.transpose %130, [1, 0] : vector<32x16xf32> -> vector<16x32xf32>
    %c0_69 = arith.constant 0 : index
    %c0_70 = arith.constant 0 : index
    %132 = vector.load %arg4[%c0_69, %c0_70] : memref<1x32xf32, #tpu.memory_space<vmem>>, vector<1x32xf32>
    %133 = vector.broadcast %132 : vector<1x32xf32> to vector<16x32xf32>
    %134 = arith.addf %131, %133 : vector<16x32xf32>
    %135 = arith.mulf %134, %134 : vector<16x32xf32>
    %cst_71 = arith.constant dense<0.000000e+00> : vector<16xf32>
    %136 = vector.multi_reduction <add>, %135, %cst_71 [1] : vector<16x32xf32> to vector<16xf32>
    %137 = vector.shape_cast %136 : vector<16xf32> to vector<16x1xf32>
    %cst_72 = arith.constant 1.000000e-24 : f32
    %138 = vector.broadcast %cst_72 : f32 to vector<16x1xf32>
    %139 = arith.maximumf %137, %138 : vector<16x1xf32>
    %140 = math.rsqrt %139 : vector<16x1xf32>
    %141 = vector.broadcast %140 : vector<16x1xf32> to vector<16x32xf32>
    %142 = arith.mulf %134, %141 : vector<16x32xf32>
    %143 = arith.index_cast %c3_i32 : i32 to index
    %c0_73 = arith.constant 0 : index
    %c0_74 = arith.constant 0 : index
    %144 = vector.load %arg7[%143, %c0_73, %c0_74] : memref<4x16x32xf32, #tpu.memory_space<vmem>>, vector<1x16x32xf32>
    %145 = vector.shape_cast %144 : vector<1x16x32xf32> to vector<16x32xf32>
    %146 = vector.shape_cast %142 : vector<16x32xf32> to vector<1x16x32xf32>
    tpu.vector_store %arg7[%143, %c0_73, %c0_74], %146 {strides = array<i32>} : memref<4x16x32xf32, #tpu.memory_space<vmem>>, vector<1x16x32xf32>,
    %c0_75 = arith.constant 0 : index
    %c0_76 = arith.constant 0 : index
    %147 = vector.load %arg5[%c0_75, %c0_76] : memref<32x32xf32, #tpu.memory_space<vmem>>, vector<32x32xf32>
    %148 = arith.index_cast %c3_i32 : i32 to index
    %c0_77 = arith.constant 0 : index
    %c0_78 = arith.constant 0 : index
    %149 = vector.load %arg2[%148, %c0_77, %c0_78] : memref<4x32x16xf32, #tpu.memory_space<vmem>>, vector<1x32x16xf32>
    %150 = vector.shape_cast %149 : vector<1x32x16xf32> to vector<32x16xf32>
    %cst_79 = arith.constant dense<0.000000e+00> : vector<32x16xf32>
    %151 = tpu.matmul %147, %150, %cst_79 {dimension_numbers = #tpu.dot_dimension_numbers<[1], [0], [0], [1], [0, 0, 1, 1], [], []>} : vector<32x32xf32>, vector<32x16xf32>, vector<32x16xf32> -> vector<32x16xf32>
    %152 = tpu.transpose %151, [1, 0] : vector<32x16xf32> -> vector<16x32xf32>
    %c0_80 = arith.constant 0 : index
    %c0_81 = arith.constant 0 : index
    %153 = vector.load %arg6[%c0_80, %c0_81] : memref<1x32xf32, #tpu.memory_space<vmem>>, vector<1x32xf32>
    %154 = vector.broadcast %153 : vector<1x32xf32> to vector<16x32xf32>
    %155 = arith.addf %152, %154 : vector<16x32xf32>
    %156 = arith.mulf %155, %155 : vector<16x32xf32>
    %cst_82 = arith.constant dense<0.000000e+00> : vector<16xf32>
    %157 = vector.multi_reduction <add>, %156, %cst_82 [1] : vector<16x32xf32> to vector<16xf32>
    %158 = vector.shape_cast %157 : vector<16xf32> to vector<16x1xf32>
    %cst_83 = arith.constant 1.000000e-24 : f32
    %159 = vector.broadcast %cst_83 : f32 to vector<16x1xf32>
    %160 = arith.maximumf %158, %159 : vector<16x1xf32>
    %161 = math.rsqrt %160 : vector<16x1xf32>
    %162 = vector.broadcast %161 : vector<16x1xf32> to vector<16x32xf32>
    %163 = arith.mulf %155, %162 : vector<16x32xf32>
    %164 = arith.index_cast %c3_i32 : i32 to index
    %c0_84 = arith.constant 0 : index
    %c0_85 = arith.constant 0 : index
    %165 = vector.load %arg8[%164, %c0_84, %c0_85] : memref<4x16x32xf32, #tpu.memory_space<vmem>>, vector<1x16x32xf32>
    %166 = vector.shape_cast %165 : vector<1x16x32xf32> to vector<16x32xf32>
    %167 = vector.shape_cast %163 : vector<16x32xf32> to vector<1x16x32xf32>
    tpu.vector_store %arg8[%164, %c0_84, %c0_85], %167 {strides = array<i32>} : memref<4x16x32xf32, #tpu.memory_space<vmem>>, vector<1x16x32xf32>,
    %c4_i32 = arith.constant 4 : i32
    return
  }
  func.func @transform_0(%arg0: i32) -> (i32, i32, i32) {
    %c0_i32 = arith.constant 0 : i32
    %c0_i32_0 = arith.constant 0 : i32
    %c0_i32_1 = arith.constant 0 : i32
    return %arg0, %c0_i32, %c0_i32_0 : i32, i32, i32
  }
  func.func @transform_1(%arg0: i32) -> (i32, i32, i32) {
    %c0_i32 = arith.constant 0 : i32
    %c0_i32_0 = arith.constant 0 : i32
    %c0_i32_1 = arith.constant 0 : i32
    return %arg0, %c0_i32, %c0_i32_0 : i32, i32, i32
  }
  func.func @transform_2(%arg0: i32) -> (i32, i32) {
    %c0_i32 = arith.constant 0 : i32
    %c0_i32_0 = arith.constant 0 : i32
    %c0_i32_1 = arith.constant 0 : i32
    return %c0_i32, %c0_i32_0 : i32, i32
  }
  func.func @transform_3(%arg0: i32) -> (i32, i32) {
    %c0_i32 = arith.constant 0 : i32
    %c0_i32_0 = arith.constant 0 : i32
    %c0_i32_1 = arith.constant 0 : i32
    return %c0_i32, %c0_i32_0 : i32, i32
  }
  func.func @transform_4(%arg0: i32) -> (i32, i32) {
    %c0_i32 = arith.constant 0 : i32
    %c0_i32_0 = arith.constant 0 : i32
    %c0_i32_1 = arith.constant 0 : i32
    return %c0_i32, %c0_i32_0 : i32, i32
  }
  func.func @transform_5(%arg0: i32) -> (i32, i32) {
    %c0_i32 = arith.constant 0 : i32
    %c0_i32_0 = arith.constant 0 : i32
    %c0_i32_1 = arith.constant 0 : i32
    return %c0_i32, %c0_i32_0 : i32, i32
  }
  func.func @transform_6(%arg0: i32) -> (i32, i32, i32) {
    %c0_i32 = arith.constant 0 : i32
    %c0_i32_0 = arith.constant 0 : i32
    %c0_i32_1 = arith.constant 0 : i32
    return %arg0, %c0_i32, %c0_i32_0 : i32, i32, i32
  }
  func.func @transform_7(%arg0: i32) -> (i32, i32, i32) {
    %c0_i32 = arith.constant 0 : i32
    %c0_i32_0 = arith.constant 0 : i32
    %c0_i32_1 = arith.constant 0 : i32
    return %arg0, %c0_i32, %c0_i32_0 : i32, i32, i32
  }
}

module attributes {stable_mosaic.version = 11 : i64} {
  func.func @kernel(%arg0: i32, %arg1: memref<1x16x32xf32, #tpu.memory_space<vmem>>, %arg2: memref<1x16x32xf32, #tpu.memory_space<vmem>>, %arg3: memref<1x2x16x32xf32, #tpu.memory_space<vmem>>, %arg4: memref<1x2x16x32xf32, #tpu.memory_space<vmem>>, %arg5: memref<1x1x24xf32, #tpu.memory_space<vmem>>, %arg6: memref<1x2x24xf32, #tpu.memory_space<vmem>>, %arg7: memref<24x32xf32, #tpu.memory_space<vmem>>, %arg8: memref<1x32xf32, #tpu.memory_space<vmem>>, %arg9: memref<1x32xf32, #tpu.memory_space<vmem>>, %arg10: memref<1x10x17xf32, #tpu.memory_space<vmem>>) attributes {dimension_semantics = [#tpu.dimension_semantics<parallel>], iteration_bounds = array<i64: 2>, scalar_prefetch = 0 : i64, scratch_operands = 0 : i64, tpu.core_type = #tpu.core_type<tc>, window_params = [{transform_indices = @transform_0, window_bounds = array<i64: 1, 16, 32>}, {transform_indices = @transform_1, window_bounds = array<i64: 1, 16, 32>}, {transform_indices = @transform_2, window_bounds = array<i64: 1, 2, 16, 32>}, {transform_indices = @transform_3, window_bounds = array<i64: 1, 2, 16, 32>}, {transform_indices = @transform_4, window_bounds = array<i64: 1, 1, 24>}, {transform_indices = @transform_5, window_bounds = array<i64: 1, 2, 24>}, {pipeline_mode = #tpu.pipeline_mode<synchronous>, transform_indices = @transform_6, window_bounds = array<i64: 24, 32>}, {pipeline_mode = #tpu.pipeline_mode<synchronous>, transform_indices = @transform_7, window_bounds = array<i64: 1, 32>}, {pipeline_mode = #tpu.pipeline_mode<synchronous>, transform_indices = @transform_8, window_bounds = array<i64: 1, 32>}, {transform_indices = @transform_9, window_bounds = array<i64: 1, 10, 17>}]} {
    %c0 = arith.constant 0 : index
    %c0_0 = arith.constant 0 : index
    %c0_1 = arith.constant 0 : index
    %0 = vector.load %arg5[%c0, %c0_0, %c0_1] : memref<1x1x24xf32, #tpu.memory_space<vmem>>, vector<1x1x24xf32>
    %1 = vector.shape_cast %0 : vector<1x1x24xf32> to vector<1x24xf32>
    %c0_2 = arith.constant 0 : index
    %c0_3 = arith.constant 0 : index
    %2 = vector.load %arg7[%c0_2, %c0_3] : memref<24x32xf32, #tpu.memory_space<vmem>>, vector<24x32xf32>
    %cst = arith.constant dense<0.000000e+00> : vector<1x32xf32>
    %3 = tpu.matmul %1, %2, %cst {dimension_numbers = #tpu.dot_dimension_numbers<[1], [0], [0], [1], [0, 0, 1, 1], [], []>} : vector<1x24xf32>, vector<24x32xf32>, vector<1x32xf32> -> vector<1x32xf32>
    %c0_4 = arith.constant 0 : index
    %c0_5 = arith.constant 0 : index
    %4 = vector.load %arg8[%c0_4, %c0_5] : memref<1x32xf32, #tpu.memory_space<vmem>>, vector<1x32xf32>
    %5 = arith.addf %3, %4 : vector<1x32xf32>
    %6 = arith.mulf %5, %5 : vector<1x32xf32>
    %cst_6 = arith.constant dense<0.000000e+00> : vector<1xf32>
    %7 = vector.multi_reduction <add>, %6, %cst_6 [1] : vector<1x32xf32> to vector<1xf32>
    %8 = vector.shape_cast %7 : vector<1xf32> to vector<1x1xf32>
    %cst_7 = arith.constant 1.000000e-24 : f32
    %9 = vector.broadcast %cst_7 : f32 to vector<1x1xf32>
    %10 = arith.maximumf %8, %9 : vector<1x1xf32>
    %11 = math.rsqrt %10 : vector<1x1xf32>
    %12 = vector.broadcast %11 : vector<1x1xf32> to vector<1x32xf32>
    %13 = arith.mulf %5, %12 : vector<1x32xf32>
    %c0_8 = arith.constant 0 : index
    %c0_9 = arith.constant 0 : index
    %c0_10 = arith.constant 0 : index
    %14 = vector.load %arg6[%c0_8, %c0_9, %c0_10] : memref<1x2x24xf32, #tpu.memory_space<vmem>>, vector<1x2x24xf32>
    %15 = vector.shape_cast %14 : vector<1x2x24xf32> to vector<2x24xf32>
    %c0_11 = arith.constant 0 : index
    %c0_12 = arith.constant 0 : index
    %16 = vector.load %arg7[%c0_11, %c0_12] : memref<24x32xf32, #tpu.memory_space<vmem>>, vector<24x32xf32>
    %cst_13 = arith.constant dense<0.000000e+00> : vector<2x32xf32>
    %17 = tpu.matmul %15, %16, %cst_13 {dimension_numbers = #tpu.dot_dimension_numbers<[1], [0], [0], [1], [0, 0, 1, 1], [], []>} : vector<2x24xf32>, vector<24x32xf32>, vector<2x32xf32> -> vector<2x32xf32>
    %c0_14 = arith.constant 0 : index
    %c0_15 = arith.constant 0 : index
    %18 = vector.load %arg8[%c0_14, %c0_15] : memref<1x32xf32, #tpu.memory_space<vmem>>, vector<1x32xf32>
    %19 = vector.broadcast %18 : vector<1x32xf32> to vector<2x32xf32>
    %20 = arith.addf %17, %19 : vector<2x32xf32>
    %21 = arith.mulf %20, %20 : vector<2x32xf32>
    %cst_16 = arith.constant dense<0.000000e+00> : vector<2xf32>
    %22 = vector.multi_reduction <add>, %21, %cst_16 [1] : vector<2x32xf32> to vector<2xf32>
    %23 = vector.shape_cast %22 : vector<2xf32> to vector<2x1xf32>
    %cst_17 = arith.constant 1.000000e-24 : f32
    %24 = vector.broadcast %cst_17 : f32 to vector<2x1xf32>
    %25 = arith.maximumf %23, %24 : vector<2x1xf32>
    %26 = math.rsqrt %25 : vector<2x1xf32>
    %27 = vector.broadcast %26 : vector<2x1xf32> to vector<2x32xf32>
    %28 = arith.mulf %20, %27 : vector<2x32xf32>
    %c0_18 = arith.constant 0 : index
    %c0_19 = arith.constant 0 : index
    %c0_20 = arith.constant 0 : index
    %29 = vector.load %arg1[%c0_18, %c0_19, %c0_20] : memref<1x16x32xf32, #tpu.memory_space<vmem>>, vector<1x16x32xf32>
    %30 = vector.shape_cast %29 : vector<1x16x32xf32> to vector<16x32xf32>
    %c0_21 = arith.constant 0 : index
    %c0_22 = arith.constant 0 : index
    %c0_23 = arith.constant 0 : index
    %31 = vector.load %arg2[%c0_21, %c0_22, %c0_23] : memref<1x16x32xf32, #tpu.memory_space<vmem>>, vector<1x16x32xf32>
    %32 = vector.shape_cast %31 : vector<1x16x32xf32> to vector<16x32xf32>
    %c0_24 = arith.constant 0 : index
    %c0_25 = arith.constant 0 : index
    %c0_26 = arith.constant 0 : index
    %c0_27 = arith.constant 0 : index
    %33 = vector.load %arg3[%c0_24, %c0_25, %c0_26, %c0_27] : memref<1x2x16x32xf32, #tpu.memory_space<vmem>>, vector<1x2x16x32xf32>
    %34 = vector.shape_cast %33 : vector<1x2x16x32xf32> to vector<2x16x32xf32>
    %c0_28 = arith.constant 0 : index
    %c0_29 = arith.constant 0 : index
    %c0_30 = arith.constant 0 : index
    %c0_31 = arith.constant 0 : index
    %35 = vector.load %arg4[%c0_28, %c0_29, %c0_30, %c0_31] : memref<1x2x16x32xf32, #tpu.memory_space<vmem>>, vector<1x2x16x32xf32>
    %36 = vector.shape_cast %35 : vector<1x2x16x32xf32> to vector<2x16x32xf32>
    %c0_32 = arith.constant 0 : index
    %c0_33 = arith.constant 0 : index
    %37 = vector.load %arg9[%c0_32, %c0_33] : memref<1x32xf32, #tpu.memory_space<vmem>>, vector<1x32xf32>
    "tpu.trace_start"() <{level = 10 : i32, message = "rd,sd->rs"}> : () -> ()
    %cst_34 = arith.constant dense<0.000000e+00> : vector<1x16xf32>
    %38 = tpu.matmul %37, %30, %cst_34 {dimension_numbers = #tpu.dot_dimension_numbers<[1], [1], [0], [0], [0, 0, 1, 0], [], []>} : vector<1x32xf32>, vector<16x32xf32>, vector<1x16xf32> -> vector<1x16xf32>
    "tpu.trace_stop"() : () -> ()
    %cst_35 = arith.constant dense<0xFF800000> : vector<1xf32>
    %39 = vector.multi_reduction <maximumf>, %38, %cst_35 [1] : vector<1x16xf32> to vector<1xf32>
    %40 = vector.shape_cast %39 : vector<1xf32> to vector<1x1xf32>
    %41 = vector.broadcast %40 : vector<1x1xf32> to vector<1x16xf32>
    %42 = arith.subf %38, %41 : vector<1x16xf32>
    %43 = math.exp %42 : vector<1x16xf32>
    %cst_36 = arith.constant dense<0.000000e+00> : vector<1xf32>
    %44 = vector.multi_reduction <add>, %43, %cst_36 [1] : vector<1x16xf32> to vector<1xf32>
    %45 = vector.shape_cast %44 : vector<1xf32> to vector<1x1xf32>
    %46 = tpu.reciprocal %45 {approx = true} : vector<1x1xf32> -> vector<1x1xf32>
    %47 = vector.broadcast %46 : vector<1x1xf32> to vector<1x16xf32>
    %48 = arith.mulf %43, %47 : vector<1x16xf32>
    "tpu.trace_start"() <{level = 10 : i32, message = "rd,sd->rs"}> : () -> ()
    %cst_37 = arith.constant dense<0.000000e+00> : vector<1x16xf32>
    %49 = tpu.matmul %37, %32, %cst_37 {dimension_numbers = #tpu.dot_dimension_numbers<[1], [1], [0], [0], [0, 0, 1, 0], [], []>} : vector<1x32xf32>, vector<16x32xf32>, vector<1x16xf32> -> vector<1x16xf32>
    "tpu.trace_stop"() : () -> ()
    %cst_38 = arith.constant dense<0xFF800000> : vector<1xf32>
    %50 = vector.multi_reduction <maximumf>, %49, %cst_38 [1] : vector<1x16xf32> to vector<1xf32>
    %51 = vector.shape_cast %50 : vector<1xf32> to vector<1x1xf32>
    %52 = vector.broadcast %51 : vector<1x1xf32> to vector<1x16xf32>
    %53 = arith.subf %49, %52 : vector<1x16xf32>
    %54 = math.exp %53 : vector<1x16xf32>
    %cst_39 = arith.constant dense<0.000000e+00> : vector<1xf32>
    %55 = vector.multi_reduction <add>, %54, %cst_39 [1] : vector<1x16xf32> to vector<1xf32>
    %56 = vector.shape_cast %55 : vector<1xf32> to vector<1x1xf32>
    %57 = tpu.reciprocal %56 {approx = true} : vector<1x1xf32> -> vector<1x1xf32>
    %58 = vector.broadcast %57 : vector<1x1xf32> to vector<1x16xf32>
    %59 = arith.mulf %54, %58 : vector<1x16xf32>
    %60 = vector.shape_cast %48 : vector<1x16xf32> to vector<1x16xf32>
    %61 = vector.broadcast %60 : vector<1x16xf32> to vector<2x16xf32>
    %62 = vector.shape_cast %59 : vector<1x16xf32> to vector<1x16xf32>
    %63 = vector.broadcast %62 : vector<1x16xf32> to vector<2x16xf32>
    %64 = vector.shape_cast %37 : vector<1x32xf32> to vector<1x1x32xf32>
    %65 = vector.broadcast %64 : vector<1x1x32xf32> to vector<2x16x32xf32>
    %66 = arith.mulf %34, %65 : vector<2x16x32xf32>
    %cst_40 = arith.constant dense<0.000000e+00> : vector<2x16xf32>
    %67 = vector.multi_reduction <add>, %66, %cst_40 [2] : vector<2x16x32xf32> to vector<2x16xf32>
    %cst_41 = arith.constant dense<0xFF800000> : vector<2xf32>
    %68 = vector.multi_reduction <maximumf>, %67, %cst_41 [1] : vector<2x16xf32> to vector<2xf32>
    %69 = vector.shape_cast %68 : vector<2xf32> to vector<2x1xf32>
    %70 = vector.broadcast %69 : vector<2x1xf32> to vector<2x16xf32>
    %71 = arith.subf %67, %70 : vector<2x16xf32>
    %72 = math.exp %71 : vector<2x16xf32>
    %cst_42 = arith.constant dense<0.000000e+00> : vector<2xf32>
    %73 = vector.multi_reduction <add>, %72, %cst_42 [1] : vector<2x16xf32> to vector<2xf32>
    %74 = vector.shape_cast %73 : vector<2xf32> to vector<2x1xf32>
    %75 = tpu.reciprocal %74 {approx = true} : vector<2x1xf32> -> vector<2x1xf32>
    %76 = vector.broadcast %75 : vector<2x1xf32> to vector<2x16xf32>
    %77 = arith.mulf %72, %76 : vector<2x16xf32>
    %78 = vector.shape_cast %37 : vector<1x32xf32> to vector<1x1x32xf32>
    %79 = vector.broadcast %78 : vector<1x1x32xf32> to vector<2x16x32xf32>
    %80 = arith.mulf %36, %79 : vector<2x16x32xf32>
    %cst_43 = arith.constant dense<0.000000e+00> : vector<2x16xf32>
    %81 = vector.multi_reduction <add>, %80, %cst_43 [2] : vector<2x16x32xf32> to vector<2x16xf32>
    %cst_44 = arith.constant dense<0xFF800000> : vector<2xf32>
    %82 = vector.multi_reduction <maximumf>, %81, %cst_44 [1] : vector<2x16xf32> to vector<2xf32>
    %83 = vector.shape_cast %82 : vector<2xf32> to vector<2x1xf32>
    %84 = vector.broadcast %83 : vector<2x1xf32> to vector<2x16xf32>
    %85 = arith.subf %81, %84 : vector<2x16xf32>
    %86 = math.exp %85 : vector<2x16xf32>
    %cst_45 = arith.constant dense<0.000000e+00> : vector<2xf32>
    %87 = vector.multi_reduction <add>, %86, %cst_45 [1] : vector<2x16xf32> to vector<2xf32>
    %88 = vector.shape_cast %87 : vector<2xf32> to vector<2x1xf32>
    %89 = tpu.reciprocal %88 {approx = true} : vector<2x1xf32> -> vector<2x1xf32>
    %90 = vector.broadcast %89 : vector<2x1xf32> to vector<2x16xf32>
    %91 = arith.mulf %86, %90 : vector<2x16xf32>
    "tpu.trace_start"() <{level = 10 : i32, message = "rd,sd->rs"}> : () -> ()
    %cst_46 = arith.constant dense<0.000000e+00> : vector<1x16xf32>
    %92 = tpu.matmul %13, %30, %cst_46 {dimension_numbers = #tpu.dot_dimension_numbers<[1], [1], [0], [0], [0, 0, 1, 0], [], []>} : vector<1x32xf32>, vector<16x32xf32>, vector<1x16xf32> -> vector<1x16xf32>
    %cst_47 = arith.constant dense<0.000000e+00> : vector<1x16xf32>
    %93 = tpu.matmul %13, %32, %cst_47 {dimension_numbers = #tpu.dot_dimension_numbers<[1], [1], [0], [0], [0, 0, 1, 0], [], []>} : vector<1x32xf32>, vector<16x32xf32>, vector<1x16xf32> -> vector<1x16xf32>
    %cst_48 = arith.constant dense<0.000000e+00> : vector<2x16xf32>
    %94 = tpu.matmul %28, %30, %cst_48 {dimension_numbers = #tpu.dot_dimension_numbers<[1], [1], [0], [0], [0, 0, 1, 0], [], []>} : vector<2x32xf32>, vector<16x32xf32>, vector<2x16xf32> -> vector<2x16xf32>
    %cst_49 = arith.constant dense<0.000000e+00> : vector<2x16xf32>
    %95 = tpu.matmul %28, %32, %cst_49 {dimension_numbers = #tpu.dot_dimension_numbers<[1], [1], [0], [0], [0, 0, 1, 0], [], []>} : vector<2x32xf32>, vector<16x32xf32>, vector<2x16xf32> -> vector<2x16xf32>
    "tpu.trace_stop"() : () -> ()
    %96 = vector.shape_cast %13 : vector<1x32xf32> to vector<1x1x32xf32>
    %97 = vector.broadcast %96 : vector<1x1x32xf32> to vector<2x16x32xf32>
    %98 = arith.mulf %34, %97 : vector<2x16x32xf32>
    %cst_50 = arith.constant dense<0.000000e+00> : vector<2x16xf32>
    %99 = vector.multi_reduction <add>, %98, %cst_50 [2] : vector<2x16x32xf32> to vector<2x16xf32>
    %100 = vector.shape_cast %13 : vector<1x32xf32> to vector<1x1x32xf32>
    %101 = vector.broadcast %100 : vector<1x1x32xf32> to vector<2x16x32xf32>
    %102 = arith.mulf %36, %101 : vector<2x16x32xf32>
    %cst_51 = arith.constant dense<0.000000e+00> : vector<2x16xf32>
    %103 = vector.multi_reduction <add>, %102, %cst_51 [2] : vector<2x16x32xf32> to vector<2x16xf32>
    %104 = tpu.concatenate %48, %59, %61, %63, %77, %91 in 0 : vector<1x16xf32>, vector<1x16xf32>, vector<2x16xf32>, vector<2x16xf32>, vector<2x16xf32>, vector<2x16xf32> -> vector<10x16xf32>
    %cst_52 = arith.constant 2.000000e+00 : f32
    %105 = vector.broadcast %cst_52 : f32 to vector<1x16xf32>
    %106 = arith.mulf %105, %92 : vector<1x16xf32>
    %cst_53 = arith.constant 2.000000e+00 : f32
    %107 = vector.broadcast %cst_53 : f32 to vector<1x16xf32>
    %108 = arith.subf %107, %106 : vector<1x16xf32>
    %cst_54 = arith.constant 0.000000e+00 : f32
    %109 = vector.broadcast %cst_54 : f32 to vector<1x16xf32>
    %110 = arith.maximumf %108, %109 : vector<1x16xf32>
    %111 = math.sqrt %110 : vector<1x16xf32>
    %112 = arith.mulf %111, %48 : vector<1x16xf32>
    %cst_55 = arith.constant dense<0.000000e+00> : vector<1xf32>
    %113 = vector.multi_reduction <add>, %112, %cst_55 [1] : vector<1x16xf32> to vector<1xf32>
    %114 = vector.shape_cast %113 : vector<1xf32> to vector<1x1xf32>
    %cst_56 = arith.constant 2.000000e+00 : f32
    %115 = vector.broadcast %cst_56 : f32 to vector<1x16xf32>
    %116 = arith.mulf %115, %93 : vector<1x16xf32>
    %cst_57 = arith.constant 2.000000e+00 : f32
    %117 = vector.broadcast %cst_57 : f32 to vector<1x16xf32>
    %118 = arith.subf %117, %116 : vector<1x16xf32>
    %cst_58 = arith.constant 0.000000e+00 : f32
    %119 = vector.broadcast %cst_58 : f32 to vector<1x16xf32>
    %120 = arith.maximumf %118, %119 : vector<1x16xf32>
    %121 = math.sqrt %120 : vector<1x16xf32>
    %122 = arith.mulf %121, %59 : vector<1x16xf32>
    %cst_59 = arith.constant dense<0.000000e+00> : vector<1xf32>
    %123 = vector.multi_reduction <add>, %122, %cst_59 [1] : vector<1x16xf32> to vector<1xf32>
    %124 = vector.shape_cast %123 : vector<1xf32> to vector<1x1xf32>
    %cst_60 = arith.constant 2.000000e+00 : f32
    %125 = vector.broadcast %cst_60 : f32 to vector<2x16xf32>
    %126 = arith.mulf %125, %94 : vector<2x16xf32>
    %cst_61 = arith.constant 2.000000e+00 : f32
    %127 = vector.broadcast %cst_61 : f32 to vector<2x16xf32>
    %128 = arith.subf %127, %126 : vector<2x16xf32>
    %cst_62 = arith.constant 0.000000e+00 : f32
    %129 = vector.broadcast %cst_62 : f32 to vector<2x16xf32>
    %130 = arith.maximumf %128, %129 : vector<2x16xf32>
    %131 = math.sqrt %130 : vector<2x16xf32>
    %132 = arith.mulf %131, %61 : vector<2x16xf32>
    %cst_63 = arith.constant dense<0.000000e+00> : vector<2xf32>
    %133 = vector.multi_reduction <add>, %132, %cst_63 [1] : vector<2x16xf32> to vector<2xf32>
    %134 = vector.shape_cast %133 : vector<2xf32> to vector<2x1xf32>
    %cst_64 = arith.constant 2.000000e+00 : f32
    %135 = vector.broadcast %cst_64 : f32 to vector<2x16xf32>
    %136 = arith.mulf %135, %95 : vector<2x16xf32>
    %cst_65 = arith.constant 2.000000e+00 : f32
    %137 = vector.broadcast %cst_65 : f32 to vector<2x16xf32>
    %138 = arith.subf %137, %136 : vector<2x16xf32>
    %cst_66 = arith.constant 0.000000e+00 : f32
    %139 = vector.broadcast %cst_66 : f32 to vector<2x16xf32>
    %140 = arith.maximumf %138, %139 : vector<2x16xf32>
    %141 = math.sqrt %140 : vector<2x16xf32>
    %142 = arith.mulf %141, %63 : vector<2x16xf32>
    %cst_67 = arith.constant dense<0.000000e+00> : vector<2xf32>
    %143 = vector.multi_reduction <add>, %142, %cst_67 [1] : vector<2x16xf32> to vector<2xf32>
    %144 = vector.shape_cast %143 : vector<2xf32> to vector<2x1xf32>
    %cst_68 = arith.constant 2.000000e+00 : f32
    %145 = vector.broadcast %cst_68 : f32 to vector<2x16xf32>
    %146 = arith.mulf %145, %99 : vector<2x16xf32>
    %cst_69 = arith.constant 2.000000e+00 : f32
    %147 = vector.broadcast %cst_69 : f32 to vector<2x16xf32>
    %148 = arith.subf %147, %146 : vector<2x16xf32>
    %cst_70 = arith.constant 0.000000e+00 : f32
    %149 = vector.broadcast %cst_70 : f32 to vector<2x16xf32>
    %150 = arith.maximumf %148, %149 : vector<2x16xf32>
    %151 = math.sqrt %150 : vector<2x16xf32>
    %152 = arith.mulf %151, %77 : vector<2x16xf32>
    %cst_71 = arith.constant dense<0.000000e+00> : vector<2xf32>
    %153 = vector.multi_reduction <add>, %152, %cst_71 [1] : vector<2x16xf32> to vector<2xf32>
    %154 = vector.shape_cast %153 : vector<2xf32> to vector<2x1xf32>
    %cst_72 = arith.constant 2.000000e+00 : f32
    %155 = vector.broadcast %cst_72 : f32 to vector<2x16xf32>
    %156 = arith.mulf %155, %103 : vector<2x16xf32>
    %cst_73 = arith.constant 2.000000e+00 : f32
    %157 = vector.broadcast %cst_73 : f32 to vector<2x16xf32>
    %158 = arith.subf %157, %156 : vector<2x16xf32>
    %cst_74 = arith.constant 0.000000e+00 : f32
    %159 = vector.broadcast %cst_74 : f32 to vector<2x16xf32>
    %160 = arith.maximumf %158, %159 : vector<2x16xf32>
    %161 = math.sqrt %160 : vector<2x16xf32>
    %162 = arith.mulf %161, %91 : vector<2x16xf32>
    %cst_75 = arith.constant dense<0.000000e+00> : vector<2xf32>
    %163 = vector.multi_reduction <add>, %162, %cst_75 [1] : vector<2x16xf32> to vector<2xf32>
    %164 = vector.shape_cast %163 : vector<2xf32> to vector<2x1xf32>
    %165 = tpu.concatenate %114, %124, %134, %144, %154, %164 in 0 : vector<1x1xf32>, vector<1x1xf32>, vector<2x1xf32>, vector<2x1xf32>, vector<2x1xf32>, vector<2x1xf32> -> vector<10x1xf32>
    %166 = tpu.concatenate %104, %165 in 1 : vector<10x16xf32>, vector<10x1xf32> -> vector<10x17xf32>
    %c0_76 = arith.constant 0 : index
    %c0_77 = arith.constant 0 : index
    %c0_78 = arith.constant 0 : index
    %167 = vector.load %arg10[%c0_76, %c0_77, %c0_78] : memref<1x10x17xf32, #tpu.memory_space<vmem>>, vector<1x10x17xf32>
    %168 = vector.shape_cast %167 : vector<1x10x17xf32> to vector<10x17xf32>
    %169 = vector.shape_cast %166 : vector<10x17xf32> to vector<1x10x17xf32>
    tpu.vector_store %arg10[%c0_76, %c0_77, %c0_78], %169 {strides = array<i32>} : memref<1x10x17xf32, #tpu.memory_space<vmem>>, vector<1x10x17xf32>,
    return
  }
  func.func @transform_0(%arg0: i32) -> (i32, i32, i32) {
    %c0_i32 = arith.constant 0 : i32
    %c0_i32_0 = arith.constant 0 : i32
    %c0_i32_1 = arith.constant 0 : i32
    return %arg0, %c0_i32, %c0_i32_0 : i32, i32, i32
  }
  func.func @transform_1(%arg0: i32) -> (i32, i32, i32) {
    %c0_i32 = arith.constant 0 : i32
    %c0_i32_0 = arith.constant 0 : i32
    %c0_i32_1 = arith.constant 0 : i32
    return %arg0, %c0_i32, %c0_i32_0 : i32, i32, i32
  }
  func.func @transform_2(%arg0: i32) -> (i32, i32, i32, i32) {
    %c0_i32 = arith.constant 0 : i32
    %c0_i32_0 = arith.constant 0 : i32
    %c0_i32_1 = arith.constant 0 : i32
    %c0_i32_2 = arith.constant 0 : i32
    return %arg0, %c0_i32, %c0_i32_0, %c0_i32_1 : i32, i32, i32, i32
  }
  func.func @transform_3(%arg0: i32) -> (i32, i32, i32, i32) {
    %c0_i32 = arith.constant 0 : i32
    %c0_i32_0 = arith.constant 0 : i32
    %c0_i32_1 = arith.constant 0 : i32
    %c0_i32_2 = arith.constant 0 : i32
    return %arg0, %c0_i32, %c0_i32_0, %c0_i32_1 : i32, i32, i32, i32
  }
  func.func @transform_4(%arg0: i32) -> (i32, i32, i32) {
    %c0_i32 = arith.constant 0 : i32
    %c0_i32_0 = arith.constant 0 : i32
    %c0_i32_1 = arith.constant 0 : i32
    return %arg0, %c0_i32, %c0_i32_0 : i32, i32, i32
  }
  func.func @transform_5(%arg0: i32) -> (i32, i32, i32) {
    %c0_i32 = arith.constant 0 : i32
    %c0_i32_0 = arith.constant 0 : i32
    %c0_i32_1 = arith.constant 0 : i32
    return %arg0, %c0_i32, %c0_i32_0 : i32, i32, i32
  }
  func.func @transform_6(%arg0: i32) -> (i32, i32) {
    %c0_i32 = arith.constant 0 : i32
    %c0_i32_0 = arith.constant 0 : i32
    %c0_i32_1 = arith.constant 0 : i32
    return %c0_i32, %c0_i32_0 : i32, i32
  }
  func.func @transform_7(%arg0: i32) -> (i32, i32) {
    %c0_i32 = arith.constant 0 : i32
    %c0_i32_0 = arith.constant 0 : i32
    %c0_i32_1 = arith.constant 0 : i32
    return %c0_i32, %c0_i32_0 : i32, i32
  }
  func.func @transform_8(%arg0: i32) -> (i32, i32) {
    %c0_i32 = arith.constant 0 : i32
    %c0_i32_0 = arith.constant 0 : i32
    %c0_i32_1 = arith.constant 0 : i32
    return %c0_i32, %c0_i32_0 : i32, i32
  }
  func.func @transform_9(%arg0: i32) -> (i32, i32, i32) {
    %c0_i32 = arith.constant 0 : i32
    %c0_i32_0 = arith.constant 0 : i32
    %c0_i32_1 = arith.constant 0 : i32
    return %arg0, %c0_i32, %c0_i32_0 : i32, i32, i32
  }
}

</mosaic_0001>

<bundles_post_ra>
// kernel: rank_model_forward.4
= control target key start
LH: loop header
LB: loop body
LE: loop exit
PB: predicated region body
PF: predicated region fallthrough
CT: control target
= control target key end

     0   :  { %vm33_vm0 = vcmask 261120   ;;  %s2117_s0 = inlined_call_operand.vmem [shape: f32[4,32,16], index: 0, kind: input, shape index: {}]   ;;  %s2118_s1 = inlined_call_operand.vmem [shape: f32[4,32,16], index: 1, kind: input, shape index: {}]   ;;  %s2119_s2 = inlined_call_operand.vmem [shape: f32[32,32], index: 2, kind: input, shape index: {}]   ;;  %s2120_s4 = inlined_call_operand.vmem [shape: f32[32,32], index: 4, kind: input, shape index: {}]   ;;  %s2121_s3 = inlined_call_operand.vmem [shape: f32[1,32], index: 3, kind: input, shape index: {}]   ;;  %s2122_s5 = inlined_call_operand.vmem [shape: f32[1,32], index: 5, kind: input, shape index: {}]   ;;  %s2123_s6 = inlined_call_operand.vmem [shape: f32[4,16,32], index: 6, kind: output, shape index: {0}]   ;;  %s2124_s7 = inlined_call_operand.vmem [shape: f32[4,16,32], index: 7, kind: output, shape index: {1}]  }
   0x1   :  { %v29_v0 = vld [vmem:[%s2117_s0] sm:$0xff]  ;;  %v30_v1 = vld [vmem:[%s2117_s0 + $0x8] sm:$0xff]  ;;  %v31_v5 = vld [vmem:[%s2117_s0 + $0x10] sm:$0xff] }
   0x2   :  { %v192_v2 = vld [vmem:[%s2118_s1] sm:$0xff]  ;;  %v1594_v3 = vpack.c.bf16 %v30_v1, %v29_v0  ;;  %v193_v4 = vld [vmem:[%s2118_s1 + $0x8] sm:$0xff]  ;;  %v32_v6 = vld [vmem:[%s2117_s0 + $0x18] sm:$0xff] }
   0x3   :  { %v1602_v7 = vpack.c.bf16 %v193_v4, %v192_v2  ;;  %v1598_v8 = vpack.c.bf16 %v32_v6, %v31_v5  ;;  %v194_v9 = vld [vmem:[%s2118_s1 + $0x10] sm:$0xff]  ;;  %v195_v10 = vld [vmem:[%s2118_s1 + $0x18] sm:$0xff]  ;;  %v1758_v11 = vld [vmem:[%s2119_s2] sm:$0xff] }
   0x4   :  { %1595 = vmatprep.subr.bf16.mxu0 %v1594_v3  ;;  %v1606_v12 = vpack.c.bf16 %v195_v10, %v194_v9  ;;  %1490 = vmatprep.mubr.msk.f32.mxu0 %vm33_vm0, %v1758_v11  ;;  %v1765_v13 = vld [vmem:[%s2120_s4] sm:$0xff]  ;;  %v1353_v15 = vld [vmem:[%s2117_s0 + $0x28] sm:$0xff]  ;;  %v1354_v20 = vld [vmem:[%s2117_s0 + $0x30] sm:$0xff] }
   0x5   :  { %1603 = vmatprep.subr.bf16.mxu1 %v1602_v7  ;;  %1597 = vmatpush3.bf16.msra.mxu0 %v1594_v3  ;;  %v1352_v14 = vld [vmem:[%s2117_s0 + $0x20] sm:$0xff]  ;;  %v1364_v18 = vld [vmem:[%s2118_s1 + $0x28] sm:$0xff]  ;;  %v1355_v21 = vld [vmem:[%s2117_s0 + $0x38] sm:$0xff] }
   0x6   :  { %1605 = vmatpush3.bf16.msra.mxu1 %v1602_v7  ;;  %1599 = vmatprep.subr.bf16.mxu0 %v1598_v8  ;;  %v1610_v16 = vpack.c.bf16 %v1353_v15, %v1352_v14  ;;  %v1363_v17 = vld [vmem:[%s2118_s1 + $0x20] sm:$0xff]  ;;  %v1790_v22 = vld [vmem:[%s2119_s2 + $0x8] sm:$0xff]  ;;  %v1365_v23 = vld [vmem:[%s2118_s1 + $0x30] sm:$0xff]  ;;  %v1614_v28 = vpack.c.bf16 %v1355_v21, %v1354_v20 }
   0x7   :  { %1607 = vmatprep.subr.bf16.mxu1 %v1606_v12  ;;  %1504 = vmatprep.mubr.msk.f32.mxu1 %vm33_vm0, %v1765_v13  ;;  %v1618_v19 = vpack.c.bf16 %v1364_v18, %v1363_v17  ;;  %v1366_v24 = vld [vmem:[%s2118_s1 + $0x38] sm:$0xff]  ;;  %v1801_v25 = vld [vmem:[%s2120_s4 + $0x8] sm:$0xff]  ;;  %v1806_v26 = vld [vmem:[%s2119_s2 + $0x10] sm:$0xff] }
   0x8   :  { %v1811_v27 = vld [vmem:[%s2120_s4 + $0x10] sm:$0xff]  ;;  %v1622_v29 = vpack.c.bf16 %v1366_v24, %v1365_v23  ;;  %v1374_v30 = vld [vmem:[%s2117_s0 + $0x40] sm:$0xff]  ;;  %v1375_v31 = vld [vmem:[%s2117_s0 + $0x48] sm:$0xff] }
   0x9   :  { %1601 = vmatpush3.bf16.msra.mxu0 %v1598_v8  ;;  %v1828_v32 = vld [vmem:[%s2119_s2 + $0x18] sm:$0xff]  ;;  %v1385_v33 = vld [vmem:[%s2118_s1 + $0x40] sm:$0xff]  ;;  %v1386_v34 = vld [vmem:[%s2118_s1 + $0x48] sm:$0xff]  ;;  %v1626_v36 = vpack.c.bf16 %v1375_v31, %v1374_v30 }
   0xa   :  { %1609 = vmatpush3.bf16.msra.mxu1 %v1606_v12  ;;  %1611 = vmatprep.subr.bf16.mxu0 %v1610_v16  ;;  %v1841_v35 = vld [vmem:[%s2120_s4 + $0x18] sm:$0xff]  ;;  %v1634_v37 = vpack.c.bf16 %v1386_v34, %v1385_v33  ;;  %v1376_v38 = vld [vmem:[%s2117_s0 + $0x50] sm:$0xff]  ;;  %v1396_v44 = vld [vmem:[%s2117_s0 + $0x60] sm:$0xff] }
   0xb   :  { %1619 = vmatprep.subr.bf16.mxu1 %v1618_v19  ;;  %v1377_v39 = vld [vmem:[%s2117_s0 + $0x58] sm:$0xff]  ;;  %v1387_v40 = vld [vmem:[%s2118_s1 + $0x50] sm:$0xff]  ;;  %v1397_v45 = vld [vmem:[%s2117_s0 + $0x68] sm:$0xff] }
   0xc   :  { %1491 = vmatmul.mubr.msk.f32.vlgmr.msra.gmra.mrb[0].mxu0 %vm33_vm0, %v1790_v22  ;;  %v1388_v41 = vld [vmem:[%s2118_s1 + $0x58] sm:$0xff]  ;;  %v1630_v42 = vpack.c.bf16 %v1377_v39, %v1376_v38  ;;  %v1407_v46 = vld [vmem:[%s2118_s1 + $0x60] sm:$0xff]  ;;  %v1408_v47 = vld [vmem:[%s2118_s1 + $0x68] sm:$0xff]  ;;  %v1642_v48 = vpack.c.bf16 %v1397_v45, %v1396_v44 }
   0xd   :  { %1505 = vmatmul.mubr.msk.f32.vlgmr.msra.gmra.mrb[0].mxu1 %vm33_vm0, %v1801_v25  ;;  %1493 = vmatprep.mubr.msk.f32.mxu0 %vm33_vm0, %v1806_v26  ;;  %v1638_v43 = vpack.c.bf16 %v1388_v41, %v1387_v40  ;;  %v1650_v49 = vpack.c.bf16 %v1408_v47, %v1407_v46  ;;  %v1398_v50 = vld [vmem:[%s2117_s0 + $0x70] sm:$0xff]  ;;  %v1399_v51 = vld [vmem:[%s2117_s0 + $0x78] sm:$0xff]  ;;  %v1934_v24 = vld [vmem:[%s2121_s3] ss:$0 sm:$0xff] }
   0xe   :  { %1507 = vmatprep.mubr.msk.f32.mxu1 %vm33_vm0, %v1811_v27  ;;  %1613 = vmatpush3.bf16.msra.mxu0 %v1610_v16  ;;  %v1409_v52 = vld [vmem:[%s2118_s1 + $0x70] sm:$0xff]  ;;  %v1410_v53 = vld [vmem:[%s2118_s1 + $0x78] sm:$0xff]  ;;  %v1646_v54 = vpack.c.bf16 %v1399_v51, %v1398_v50 }
   0xf   :  { %1621 = vmatpush3.bf16.msra.mxu1 %v1618_v19  ;;  %1615 = vmatprep.subr.bf16.mxu0 %v1614_v28  ;;  %v1654_v55 = vpack.c.bf16 %v1410_v53, %v1409_v52 }
  0x10   :  { %1494 = vmatmul.mubr.msk.f32.gmra.mrb[2].mxu0 %vm33_vm0, %v1828_v32  ;;  %1623 = vmatprep.subr.bf16.mxu1 %v1622_v29 }
  0x11   :  { %1508 = vmatmul.mubr.msk.f32.gmra.mrb[2].mxu1 %vm33_vm0, %v1841_v35  ;;  %1518 = vmatprep.mubr.msk.f32.mxu0 %vm33_vm0, %v1758_v11 }
  0x12   :  { %1617 = vmatpush3.bf16.msra.mxu0 %v1614_v28  ;;  %1532 = vmatprep.mubr.msk.f32.mxu1 %vm33_vm0, %v1765_v13 }
  0x13   :  { %1625 = vmatpush3.bf16.msra.mxu1 %v1622_v29  ;;  %1627 = vmatprep.subr.bf16.mxu0 %v1626_v36 }
  0x14   :  { %1635 = vmatprep.subr.bf16.mxu1 %v1634_v37 }
  0x15   :  { %1519 = vmatmul.mubr.msk.f32.vlgmr.msra.gmra.mrb[4].mxu0 %vm33_vm0, %v1790_v22 }
  0x16   :  { %1533 = vmatmul.mubr.msk.f32.vlgmr.msra.gmra.mrb[4].mxu1 %vm33_vm0, %v1801_v25  ;;  %1521 = vmatprep.mubr.msk.f32.mxu0 %vm33_vm0, %v1806_v26 }
  0x17   :  { %1535 = vmatprep.mubr.msk.f32.mxu1 %vm33_vm0, %v1811_v27  ;;  %1629 = vmatpush3.bf16.msra.mxu0 %v1626_v36 }
  0x18   :  { %1637 = vmatpush3.bf16.msra.mxu1 %v1634_v37  ;;  %1631 = vmatprep.subr.bf16.mxu0 %v1630_v42 }
  0x19   :  { %1522 = vmatmul.mubr.msk.f32.gmra.mrb[6].mxu0 %vm33_vm0, %v1828_v32  ;;  %1639 = vmatprep.subr.bf16.mxu1 %v1638_v43 }
  0x1a   :  { %1536 = vmatmul.mubr.msk.f32.gmra.mrb[6].mxu1 %vm33_vm0, %v1841_v35  ;;  %1546 = vmatprep.mubr.msk.f32.mxu0 %vm33_vm0, %v1758_v11 }
  0x1b   :  { %1633 = vmatpush3.bf16.msra.mxu0 %v1630_v42  ;;  %1560 = vmatprep.mubr.msk.f32.mxu1 %vm33_vm0, %v1765_v13 }
  0x1c   :  { %1641 = vmatpush3.bf16.msra.mxu1 %v1638_v43  ;;  %1643 = vmatprep.subr.bf16.mxu0 %v1642_v48 }
  0x1d   :  { %1651 = vmatprep.subr.bf16.mxu1 %v1650_v49 }
  0x1e   :  { %1547 = vmatmul.mubr.msk.f32.vlgmr.msra.gmra.mrb[8].mxu0 %vm33_vm0, %v1790_v22 }
  0x1f   :  { %1561 = vmatmul.mubr.msk.f32.vlgmr.msra.gmra.mrb[8].mxu1 %vm33_vm0, %v1801_v25  ;;  %1549 = vmatprep.mubr.msk.f32.mxu0 %vm33_vm0, %v1806_v26 }
  0x20   :  { %1563 = vmatprep.mubr.msk.f32.mxu1 %vm33_vm0, %v1811_v27  ;;  %1645 = vmatpush3.bf16.msra.mxu0 %v1642_v48 }
  0x21   :  { %1647 = vmatprep.subr.bf16.mxu0 %v1646_v54  ;;  %1653 = vmatpush3.bf16.msra.mxu1 %v1650_v49 }
  0x22   :  { %1550 = vmatmul.mubr.msk.f32.gmra.mrb[10].mxu0 %vm33_vm0, %v1828_v32  ;;  %1655 = vmatprep.subr.bf16.mxu1 %v1654_v55 }
  0x23   :  { %1564 = vmatmul.mubr.msk.f32.gmra.mrb[10].mxu1 %vm33_vm0, %v1841_v35  ;;  %1574 = vmatprep.mubr.msk.f32.mxu0 %vm33_vm0, %v1758_v11 }
  0x24   :  { %1649 = vmatpush3.bf16.msra.mxu0 %v1646_v54  ;;  %1588 = vmatprep.mubr.msk.f32.mxu1 %vm33_vm0, %v1765_v13 }
  0x25   :  { %1657 = vmatpush3.bf16.msra.mxu1 %v1654_v55 }
  0x27   :  { %1575 = vmatmul.mubr.msk.f32.vlgmr.msra.gmra.mrb[12].mxu0 %vm33_vm0, %v1790_v22 }
  0x28   :  { %1589 = vmatmul.mubr.msk.f32.vlgmr.msra.gmra.mrb[12].mxu1 %vm33_vm0, %v1801_v25  ;;  %1577 = vmatprep.mubr.msk.f32.mxu0 %vm33_vm0, %v1806_v26  ;;  %v1939_v25 = vld [vmem:[%s2122_s5] ss:$0 sm:$0xff] }
  0x29   :  { %1591 = vmatprep.mubr.msk.f32.mxu1 %vm33_vm0, %v1811_v27 }
  0x2b   :  { %1578 = vmatmul.mubr.msk.f32.gmra.mrb[14].mxu0 %vm33_vm0, %v1828_v32 }
  0x2c   :  { %1592 = vmatmul.mubr.msk.f32.gmra.mrb[14].mxu1 %vm33_vm0, %v1841_v35 }
  0xdf   :  { %v1492_v56 = vpop.f32.mrb[0].mxu0 }
  0xe0   :  { %v1506_v57 = vpop.f32.mrb[0].mxu1  ;;  %v112_v58 = vpop.f32.mrb[1].mxu0 }
  0xe1   :  { %v274_v59 = vpop.f32.mrb[1].mxu1  ;;  %131 = vxpose.xlu0.b32.start [1/4] (short) (narrow) %v112_v58, 16 }
  0xe2   :  { %293 = vxpose.xlu1.b32.start [1/4] (short) (narrow) %v274_v59, 16 }
  0xe3   :  { %v1495_v60 = vpop.f32.mrb[2].mxu0 }
  0xe4   :  { %v122_v61 = vpop.f32.mrb[3].mxu0  ;;  %v1509_v62 = vpop.f32.mrb[2].mxu1 }
  0xe5   :  { %132 = vxpose.xlu0.b32.cont [2/4] (short) (narrow) %v1492_v56, 16  ;;  %v284_v63 = vpop.f32.mrb[3].mxu1 }
  0xe6   :  { %294 = vxpose.xlu1.b32.cont [2/4] (short) (narrow) %v1506_v57, 16 }
  0xe8   :  { %v1520_v0 = vpop.f32.mrb[4].mxu0 }
  0xe9   :  { %133 = vxpose.xlu0.b32.cont [3/4] (short) (narrow) %v122_v61, 16  ;;  %v437_v1 = vpop.f32.mrb[5].mxu0  ;;  %v1534_v2 = vpop.f32.mrb[4].mxu1 }
  0xea   :  { %295 = vxpose.xlu1.b32.cont [3/4] (short) (narrow) %v284_v63, 16  ;;  %v601_v3 = vpop.f32.mrb[5].mxu1 }
  0xec   :  { %v1523_v4 = vpop.f32.mrb[6].mxu0 }
  0xed   :  { %134 = vxpose.xlu0.b32.end [4/4] (short) (narrow) %v1495_v60, 16  ;;  %v447_v5 = vpop.f32.mrb[7].mxu0  ;;  %v1537_v6 = vpop.f32.mrb[6].mxu1 }
  0xee   :  { %296 = vxpose.xlu1.b32.end [4/4] (short) (narrow) %v1509_v62, 16  ;;  %v611_v7 = vpop.f32.mrb[7].mxu1 }
  0xf1   :  { %456 = vxpose.xlu0.b32.start [1/4] (short) (narrow) %v437_v1, 16  ;;  %v1548_v8 = vpop.f32.mrb[8].mxu0 }
  0xf2   :  { %620 = vxpose.xlu1.b32.start [1/4] (short) (narrow) %v601_v3, 16  ;;  %v765_v9 = vpop.f32.mrb[9].mxu0  ;;  %v1562_v10 = vpop.f32.mrb[8].mxu1 }
  0xf3   :  { %v929_v11 = vpop.f32.mrb[9].mxu1 }
  0xf5   :  { %457 = vxpose.xlu0.b32.cont [2/4] (short) (narrow) %v1520_v0, 16  ;;  %v1551_v12 = vpop.f32.mrb[10].mxu0 }
  0xf6   :  { %621 = vxpose.xlu1.b32.cont [2/4] (short) (narrow) %v1534_v2, 16  ;;  %v775_v13 = vpop.f32.mrb[11].mxu0  ;;  %v1565_v14 = vpop.f32.mrb[10].mxu1 }
  0xf7   :  { %v939_v15 = vpop.f32.mrb[11].mxu1 }
  0xf9   :  { %458 = vxpose.xlu0.b32.cont [3/4] (short) (narrow) %v447_v5, 16 }
  0xfa   :  { %622 = vxpose.xlu1.b32.cont [3/4] (short) (narrow) %v611_v7, 16  ;;  %v1576_v16 = vpop.f32.mrb[12].mxu0 }
  0xfb   :  { %v1093_v17 = vpop.f32.mrb[13].mxu0  ;;  %v1590_v18 = vpop.f32.mrb[12].mxu1 }
  0xfc   :  { %v1257_v19 = vpop.f32.mrb[13].mxu1 }
  0xfd   :  { %459 = vxpose.xlu0.b32.end [4/4] (short) (narrow) %v1523_v4, 16 }
  0xfe   :  { %623 = vxpose.xlu1.b32.end [4/4] (short) (narrow) %v1537_v6, 16  ;;  %v1579_v20 = vpop.f32.mrb[14].mxu0 }
  0xff   :  { %v1103_v21 = vpop.f32.mrb[15].mxu0  ;;  %v1593_v22 = vpop.f32.mrb[14].mxu1 }
 0x100   :  { %v1267_v23 = vpop.f32.mrb[15].mxu1 }
 0x101   :  { %784 = vxpose.xlu0.b32.start [1/4] (short) (narrow) %v765_v9, 16 }
 0x102   :  { %948 = vxpose.xlu1.b32.start [1/4] (short) (narrow) %v929_v11, 16 }
 0x105   :  { %785 = vxpose.xlu0.b32.cont [2/4] (short) (narrow) %v1548_v8, 16 }
 0x106   :  { %949 = vxpose.xlu1.b32.cont [2/4] (short) (narrow) %v1562_v10, 16 }
 0x109   :  { %786 = vxpose.xlu0.b32.cont [3/4] (short) (narrow) %v775_v13, 16 }
 0x10a   :  { %950 = vxpose.xlu1.b32.cont [3/4] (short) (narrow) %v939_v15, 16 }
 0x10d   :  { %787 = vxpose.xlu0.b32.end [4/4] (short) (narrow) %v1551_v12, 16 }
 0x10e   :  { %951 = vxpose.xlu1.b32.end [4/4] (short) (narrow) %v1565_v14, 16 }
 0x111   :  { %1112 = vxpose.xlu0.b32.start [1/4] (short) (narrow) %v1093_v17, 16 }
 0x112   :  { %1276 = vxpose.xlu1.b32.start [1/4] (short) (narrow) %v1257_v19, 16 }
 0x115   :  { %1113 = vxpose.xlu0.b32.cont [2/4] (short) (narrow) %v1576_v16, 16 }
 0x116   :  { %1277 = vxpose.xlu1.b32.cont [2/4] (short) (narrow) %v1590_v18, 16 }
 0x119   :  { %1114 = vxpose.xlu0.b32.cont [3/4] (short) (narrow) %v1103_v21, 16 }
 0x11a   :  { %1278 = vxpose.xlu1.b32.cont [3/4] (short) (narrow) %v1267_v23, 16 }
 0x11d   :  { %1115 = vxpose.xlu0.b32.end [4/4] (short) (narrow) %v1579_v20, 16 }
 0x11e   :  { %1279 = vxpose.xlu1.b32.end [4/4] (short) (narrow) %v1593_v22, 16 }
 0x161   :  { %v147_v26 = vpop.trf.xlu0 }
 0x162   :  { %v309_v27 = vpop.trf.xlu1  ;;  %v1942_v28 = vadd.f32 %v1934_v24, %v147_v26 }
 0x163   :  { %v1945_v29 = vadd.f32 %v1939_v25, %v309_v27 }
 0x164   :  { %v172_v30 = vmul.f32 %v1942_v28, %v1942_v28 }
 0x165   :  { %v148_v31 = vpop.trf.xlu0  ;;  %v334_v32 = vmul.f32 %v1945_v29, %v1945_v29 }
 0x166   :  { %v310_v33 = vpop.trf.xlu1  ;;  %v1952_v34 = vadd.f32 %v1934_v24, %v148_v31  ;;  %v174_v35 = vsel %vm33_vm0, %v172_v30, 0.0 }
 0x167   :  { %v1956_v36 = vadd.f32 %v1939_v25, %v310_v33  ;;  %175 = vadd.xlane.f32.xlu1 %v174_v35  ;;  %v336_v37 = vsel %vm33_vm0, %v334_v32, 0.0 }
 0x168   :  { %337 = vadd.xlane.f32.xlu0 %v336_v37  ;;  %v173_v38 = vmul.f32 %v1952_v34, %v1952_v34 }
 0x169   :  { %v335_v39 = vmul.f32 %v1956_v36, %v1956_v36 }
 0x16a   :  { %v177_v40 = vsel %vm33_vm0, %v173_v38, 0.0 }
 0x16b   :  { %178 = vadd.xlane.f32.xlu1 %v177_v40  ;;  %v339_v41 = vsel %vm33_vm0, %v335_v39, 0.0 }
 0x16c   :  { %340 = vadd.xlane.f32.xlu0 %v339_v41 }
 0x171   :  { %v472_v42 = vpop.trf.xlu0 }
 0x172   :  { %v636_v43 = vpop.trf.xlu1  ;;  %v1966_v44 = vadd.f32 %v1934_v24, %v472_v42 }
 0x173   :  { %v1969_v45 = vadd.f32 %v1939_v25, %v636_v43 }
 0x174   :  { %v497_v46 = vmul.f32 %v1966_v44, %v1966_v44 }
 0x175   :  { %v473_v47 = vpop.trf.xlu0  ;;  %v661_v48 = vmul.f32 %v1969_v45, %v1969_v45 }
 0x176   :  { %v637_v49 = vpop.trf.xlu1  ;;  %v1976_v50 = vadd.f32 %v1934_v24, %v473_v47  ;;  %v499_v51 = vsel %vm33_vm0, %v497_v46, 0.0 }
 0x177   :  { %v1980_v52 = vadd.f32 %v1939_v25, %v637_v49  ;;  %500 = vadd.xlane.f32.xlu1 %v499_v51  ;;  %v663_v53 = vsel %vm33_vm0, %v661_v48, 0.0 }
 0x178   :  { %664 = vadd.xlane.f32.xlu0 %v663_v53  ;;  %v498_v54 = vmul.f32 %v1976_v50, %v1976_v50 }
 0x179   :  { %v662_v55 = vmul.f32 %v1980_v52, %v1980_v52 }
 0x17a   :  { %v502_v56 = vsel %vm33_vm0, %v498_v54, 0.0 }
 0x17b   :  { %503 = vadd.xlane.f32.xlu1 %v502_v56  ;;  %v666_v57 = vsel %vm33_vm0, %v662_v55, 0.0 }
 0x17c   :  { %667 = vadd.xlane.f32.xlu0 %v666_v57 }
 0x181   :  { %v800_v58 = vpop.trf.xlu0 }
 0x182   :  { %v964_v59 = vpop.trf.xlu1  ;;  %v1990_v60 = vadd.f32 %v1934_v24, %v800_v58 }
 0x183   :  { %v1993_v61 = vadd.f32 %v1939_v25, %v964_v59 }
 0x184   :  { %v825_v62 = vmul.f32 %v1990_v60, %v1990_v60 }
 0x185   :  { %v801_v63 = vpop.trf.xlu0  ;;  %v989_v0 = vmul.f32 %v1993_v61, %v1993_v61 }
 0x186   :  { %v2000_v1 = vadd.f32 %v1934_v24, %v801_v63  ;;  %v827_v2 = vsel %vm33_vm0, %v825_v62, 0.0  ;;  %v965_v3 = vpop.trf.xlu1 }
 0x187   :  { %828 = vadd.xlane.f32.xlu1 %v827_v2  ;;  %v991_v4 = vsel %vm33_vm0, %v989_v0, 0.0  ;;  %v2005_v5 = vadd.f32 %v1939_v25, %v965_v3 }
 0x188   :  { %992 = vadd.xlane.f32.xlu0 %v991_v4  ;;  %v826_v6 = vmul.f32 %v2000_v1, %v2000_v1 }
 0x189   :  { %v990_v7 = vmul.f32 %v2005_v5, %v2005_v5 }
 0x18a   :  { %v830_v8 = vsel %vm33_vm0, %v826_v6, 0.0 }
 0x18b   :  { %831 = vadd.xlane.f32.xlu1 %v830_v8  ;;  %v994_v9 = vsel %vm33_vm0, %v990_v7, 0.0 }
 0x18f   :  { %995 = vadd.xlane.f32.xlu1 %v994_v9 }
 0x191   :  { %v1128_v10 = vpop.trf.xlu0 }
 0x192   :  { %v2014_v11 = vadd.f32 %v1934_v24, %v1128_v10  ;;  %v1292_v12 = vpop.trf.xlu1 }
 0x193   :  { %v2019_v14 = vadd.f32 %v1939_v25, %v1292_v12 }
 0x194   :  { %v1153_v13 = vmul.f32 %v2014_v11, %v2014_v11 }
 0x195   :  { %v1129_v15 = vpop.trf.xlu0  ;;  %v1317_v21 = vmul.f32 %v2019_v14, %v2019_v14 }
 0x196   :  { %v2022_v16 = vadd.f32 %v1934_v24, %v1129_v15  ;;  %v1155_v17 = vsel %vm33_vm0, %v1153_v13, 0.0  ;;  %v1293_v18 = vpop.trf.xlu1 }
 0x197   :  { %1156 = vadd.xlane.f32.xlu0 %v1155_v17  ;;  %v2028_v20 = vadd.f32 %v1939_v25, %v1293_v18  ;;  %v1319_v23 = vsel %vm33_vm0, %v1317_v21, 0.0 }
 0x198   :  { %v1154_v19 = vmul.f32 %v2022_v16, %v2022_v16 }
 0x199   :  { %v1318_v24 = vmul.f32 %v2028_v20, %v2028_v20 }
 0x19a   :  { %v1158_v22 = vsel %vm33_vm0, %v1154_v19, 0.0 }
 0x19b   :  { %1159 = vadd.xlane.f32.xlu1 %v1158_v22  ;;  %v1322_v26 = vsel %vm33_vm0, %v1318_v24, 0.0 }
 0x19f   :  { %1320 = vadd.xlane.f32.xlu1 %v1319_v23 }
 0x1a3   :  { %1323 = vadd.xlane.f32.xlu1 %v1322_v26 }
 0x1f4   :  { %v176_v27 = vpop.xlane.xlu1 %175 }
 0x1f5   :  { %v180_v30 = vmax.f32 %v176_v27, 1e-24  ;;  %v338_v31 = vpop.xlane.xlu0 %337 }
 0x1f6   :  { %v342_v25 = vmax.f32 %v338_v31, 1e-24 }
 0x1f7   :  { %1659 = vrsqrt.f32 %v180_v30 }
 0x1f8   :  { %1661 = vrsqrt.f32 %v342_v25  ;;  %v179_v32 = vpop.xlane.xlu1 %178 }
 0x1f9   :  { %v181_v33 = vmax.f32 %v179_v32, 1e-24  ;;  %v341_v35 = vpop.xlane.xlu0 %340 }
 0x1fa   :  { %v343_v37 = vmax.f32 %v341_v35, 1e-24 }
 0x1fb   :  { %1663 = vrsqrt.f32 %v181_v33 }
 0x1fc   :  { %1665 = vrsqrt.f32 %v343_v37 }
 0x201   :  { %v1660_v38 = vpop.eup %1659 }
 0x202   :  { %v1662_v39 = vpop.eup %1661  ;;  %v184_v40 = vmul.f32 %v1660_v38, %v1942_v28 }
 0x203   :  { %v346_v41 = vmul.f32 %v1662_v39, %v1945_v29 }
 0x204   :  { %186 = vst.msk [vmem:[%s2123_s6] sm:$0xff] %vm33_vm0, %v184_v40  ;;  %v501_v42 = vpop.xlane.xlu1 %500 }
 0x205   :  { %v1664_v43 = vpop.eup %1663  ;;  %348 = vst.msk [vmem:[%s2124_s7] sm:$0xff] %vm33_vm0, %v346_v41  ;;  %v505_v46 = vmax.f32 %v501_v42, 1e-24  ;;  %v665_v47 = vpop.xlane.xlu0 %664 }
 0x206   :  { %v1666_v48 = vpop.eup %1665  ;;  %v185_v49 = vmul.f32 %v1664_v43, %v1952_v34  ;;  %v669_v28 = vmax.f32 %v665_v47, 1e-24 }
 0x207   :  { %v347_v29 = vmul.f32 %v1666_v48, %v1956_v36  ;;  %1667 = vrsqrt.f32 %v505_v46 }
 0x208   :  { %187 = vst.msk [vmem:[%s2123_s6 + $0x8] sm:$0xff] %vm33_vm0, %v185_v49  ;;  %1669 = vrsqrt.f32 %v669_v28  ;;  %v504_v51 = vpop.xlane.xlu1 %503 }
 0x209   :  { %349 = vst.msk [vmem:[%s2124_s7 + $0x8] sm:$0xff] %vm33_vm0, %v347_v29  ;;  %v506_v53 = vmax.f32 %v504_v51, 1e-24  ;;  %v668_v54 = vpop.xlane.xlu0 %667 }
 0x20a   :  { %v670_v55 = vmax.f32 %v668_v54, 1e-24 }
 0x20b   :  { %1671 = vrsqrt.f32 %v506_v53 }
 0x20c   :  { %1673 = vrsqrt.f32 %v670_v55 }
 0x211   :  { %v1668_v34 = vpop.eup %1667 }
 0x212   :  { %v1670_v36 = vpop.eup %1669  ;;  %v509_v56 = vmul.f32 %v1668_v34, %v1966_v44 }
 0x213   :  { %v673_v57 = vmul.f32 %v1670_v36, %v1969_v45 }
 0x214   :  { %1361 = vst.msk [vmem:[%s2123_s6 + $0x10] sm:$0xff] %vm33_vm0, %v509_v56  ;;  %v829_v58 = vpop.xlane.xlu1 %828 }
 0x215   :  { %v1672_v59 = vpop.eup %1671  ;;  %1372 = vst.msk [vmem:[%s2124_s7 + $0x10] sm:$0xff] %vm33_vm0, %v673_v57  ;;  %v833_v62 = vmax.f32 %v829_v58, 1e-24  ;;  %v993_v63 = vpop.xlane.xlu0 %992 }
 0x216   :  { %v1674_v0 = vpop.eup %1673  ;;  %v510_v2 = vmul.f32 %v1672_v59, %v1976_v50  ;;  %v997_v44 = vmax.f32 %v993_v63, 1e-24 }
 0x217   :  { %v674_v45 = vmul.f32 %v1674_v0, %v1980_v52  ;;  %1675 = vrsqrt.f32 %v833_v62 }
 0x218   :  { %1362 = vst.msk [vmem:[%s2123_s6 + $0x18] sm:$0xff] %vm33_vm0, %v510_v2  ;;  %1677 = vrsqrt.f32 %v997_v44  ;;  %v832_v3 = vpop.xlane.xlu1 %831 }
 0x219   :  { %1373 = vst.msk [vmem:[%s2124_s7 + $0x18] sm:$0xff] %vm33_vm0, %v674_v45  ;;  %v834_v4 = vmax.f32 %v832_v3, 1e-24 }
 0x21b   :  { %1679 = vrsqrt.f32 %v834_v4 }
 0x21c   :  { %v996_v6 = vpop.xlane.xlu1 %995 }
 0x21d   :  { %v998_v50 = vmax.f32 %v996_v6, 1e-24 }
 0x21f   :  { %1681 = vrsqrt.f32 %v998_v50 }
 0x221   :  { %v1676_v7 = vpop.eup %1675 }
 0x222   :  { %v1678_v52 = vpop.eup %1677  ;;  %v837_v8 = vmul.f32 %v1676_v7, %v1990_v60 }
 0x223   :  { %v1001_v9 = vmul.f32 %v1678_v52, %v1993_v61 }
 0x224   :  { %1383 = vst.msk [vmem:[%s2123_s6 + $0x20] sm:$0xff] %vm33_vm0, %v837_v8  ;;  %v1157_v10 = vpop.xlane.xlu0 %1156 }
 0x225   :  { %v1680_v12 = vpop.eup %1679  ;;  %1394 = vst.msk [vmem:[%s2124_s7 + $0x20] sm:$0xff] %vm33_vm0, %v1001_v9  ;;  %v1161_v13 = vmax.f32 %v1157_v10, 1e-24 }
 0x226   :  { %v838_v15 = vmul.f32 %v1680_v12, %v2000_v1 }
 0x227   :  { %1683 = vrsqrt.f32 %v1161_v13 }
 0x228   :  { %1384 = vst.msk [vmem:[%s2123_s6 + $0x28] sm:$0xff] %vm33_vm0, %v838_v15  ;;  %v1160_v60 = vpop.xlane.xlu1 %1159 }
 0x229   :  { %v1682_v61 = vpop.eup %1681  ;;  %v1162_v17 = vmax.f32 %v1160_v60, 1e-24 }
 0x22a   :  { %v1002_v18 = vmul.f32 %v1682_v61, %v2005_v5 }
 0x22b   :  { %1685 = vrsqrt.f32 %v1162_v17 }
 0x22c   :  { %1395 = vst.msk [vmem:[%s2124_s7 + $0x28] sm:$0xff] %vm33_vm0, %v1002_v18  ;;  %v1321_v19 = vpop.xlane.xlu1 %1320 }
 0x22d   :  { %v1325_v21 = vmax.f32 %v1321_v19, 1e-24 }
 0x22f   :  { %1687 = vrsqrt.f32 %v1325_v21 }
 0x230   :  { %v1324_v1 = vpop.xlane.xlu1 %1323 }
 0x231   :  { %v1684_v22 = vpop.eup %1683  ;;  %v1326_v23 = vmax.f32 %v1324_v1, 1e-24 }
 0x232   :  { %v1165_v24 = vmul.f32 %v1684_v22, %v2014_v11 }
 0x233   :  { %1689 = vrsqrt.f32 %v1326_v23 }
 0x234   :  { %1405 = vst.msk [vmem:[%s2123_s6 + $0x30] sm:$0xff] %vm33_vm0, %v1165_v24 }
 0x235   :  { %v1686_v5 = vpop.eup %1685 }
 0x236   :  { %v1166_v26 = vmul.f32 %v1686_v5, %v2022_v16 }
 0x238   :  { %1406 = vst.msk [vmem:[%s2123_s6 + $0x38] sm:$0xff] %vm33_vm0, %v1166_v26 }
 0x239   :  { %v1688_v27 = vpop.eup %1687 }
 0x23a   :  { %v1329_v30 = vmul.f32 %v1688_v27, %v2019_v14 }
 0x23c   :  { %1416 = vst.msk [vmem:[%s2124_s7 + $0x30] sm:$0xff] %vm33_vm0, %v1329_v30 }
 0x23d   :  { %v1690_v11 = vpop.eup %1689 }
 0x23e   :  { %v1330_v31 = vmul.f32 %v1690_v11, %v2028_v20 }
 0x240   :  { %1417 = vst.msk [vmem:[%s2124_s7 + $0x38] sm:$0xff] %vm33_vm0, %v1330_v31 }

// kernel: rank_model_forward.3
= control target key start
LH: loop header
LB: loop body
LE: loop exit
PB: predicated region body
PF: predicated region fallthrough
CT: control target
= control target key end

     0   :  { %vm33_vm0 = vcmask 261120   ;;  %s1029_s0 = inlined_call_operand.vmem [shape: f32[2,32,16], index: 0, kind: input, shape index: {}]   ;;  %s1030_s1 = inlined_call_operand.vmem [shape: f32[2,32,16], index: 1, kind: input, shape index: {}]   ;;  %s1031_s2 = inlined_call_operand.vmem [shape: f32[32,32], index: 2, kind: input, shape index: {}]   ;;  %s1032_s4 = inlined_call_operand.vmem [shape: f32[32,32], index: 4, kind: input, shape index: {}]   ;;  %s1033_s3 = inlined_call_operand.vmem [shape: f32[1,32], index: 3, kind: input, shape index: {}]   ;;  %s1034_s5 = inlined_call_operand.vmem [shape: f32[1,32], index: 5, kind: input, shape index: {}]   ;;  %s1035_s6 = inlined_call_operand.vmem [shape: f32[2,16,32], index: 6, kind: output, shape index: {0}]   ;;  %s1036_s7 = inlined_call_operand.vmem [shape: f32[2,16,32], index: 7, kind: output, shape index: {1}]  }
   0x1   :  { %v29_v0 = vld [vmem:[%s1029_s0] sm:$0xff]  ;;  %v30_v1 = vld [vmem:[%s1029_s0 + $0x8] sm:$0xff]  ;;  %v31_v5 = vld [vmem:[%s1029_s0 + $0x10] sm:$0xff] }
   0x2   :  { %v192_v2 = vld [vmem:[%s1030_s1] sm:$0xff]  ;;  %v806_v3 = vpack.c.bf16 %v30_v1, %v29_v0  ;;  %v193_v4 = vld [vmem:[%s1030_s1 + $0x8] sm:$0xff]  ;;  %v32_v6 = vld [vmem:[%s1029_s0 + $0x18] sm:$0xff] }
   0x3   :  { %v814_v7 = vpack.c.bf16 %v193_v4, %v192_v2  ;;  %v810_v8 = vpack.c.bf16 %v32_v6, %v31_v5  ;;  %v194_v9 = vld [vmem:[%s1030_s1 + $0x10] sm:$0xff]  ;;  %v195_v10 = vld [vmem:[%s1030_s1 + $0x18] sm:$0xff]  ;;  %v25_v11 = vld [vmem:[%s1031_s2] sm:$0xff] }
   0x4   :  { %807 = vmatprep.subr.bf16.mxu0 %v806_v3  ;;  %v818_v12 = vpack.c.bf16 %v195_v10, %v194_v9  ;;  %758 = vmatprep.mubr.msk.f32.mxu0 %vm33_vm0, %v25_v11  ;;  %v188_v13 = vld [vmem:[%s1032_s4] sm:$0xff]  ;;  %v697_v15 = vld [vmem:[%s1029_s0 + $0x28] sm:$0xff]  ;;  %v698_v20 = vld [vmem:[%s1029_s0 + $0x30] sm:$0xff] }
   0x5   :  { %815 = vmatprep.subr.bf16.mxu1 %v814_v7  ;;  %809 = vmatpush3.bf16.msra.mxu0 %v806_v3  ;;  %v696_v14 = vld [vmem:[%s1029_s0 + $0x20] sm:$0xff]  ;;  %v708_v18 = vld [vmem:[%s1030_s1 + $0x28] sm:$0xff]  ;;  %v699_v21 = vld [vmem:[%s1029_s0 + $0x38] sm:$0xff] }
   0x6   :  { %817 = vmatpush3.bf16.msra.mxu1 %v814_v7  ;;  %811 = vmatprep.subr.bf16.mxu0 %v810_v8  ;;  %v822_v16 = vpack.c.bf16 %v697_v15, %v696_v14  ;;  %v707_v17 = vld [vmem:[%s1030_s1 + $0x20] sm:$0xff]  ;;  %v26_v22 = vld [vmem:[%s1031_s2 + $0x8] sm:$0xff]  ;;  %v709_v23 = vld [vmem:[%s1030_s1 + $0x30] sm:$0xff]  ;;  %v826_v28 = vpack.c.bf16 %v699_v21, %v698_v20 }
   0x7   :  { %819 = vmatprep.subr.bf16.mxu1 %v818_v12  ;;  %772 = vmatprep.mubr.msk.f32.mxu1 %vm33_vm0, %v188_v13  ;;  %v830_v19 = vpack.c.bf16 %v708_v18, %v707_v17  ;;  %v710_v24 = vld [vmem:[%s1030_s1 + $0x38] sm:$0xff]  ;;  %v189_v25 = vld [vmem:[%s1032_s4 + $0x8] sm:$0xff]  ;;  %v27_v26 = vld [vmem:[%s1031_s2 + $0x10] sm:$0xff] }
   0x8   :  { %v190_v27 = vld [vmem:[%s1032_s4 + $0x10] sm:$0xff]  ;;  %v834_v29 = vpack.c.bf16 %v710_v24, %v709_v23  ;;  %v28_v30 = vld [vmem:[%s1031_s2 + $0x18] sm:$0xff]  ;;  %v690_v48 = vld [vmem:[%s1033_s3] ss:$0 sm:$0xff] }
   0x9   :  { %813 = vmatpush3.bf16.msra.mxu0 %v810_v8  ;;  %v191_v31 = vld [vmem:[%s1032_s4 + $0x18] sm:$0xff]  ;;  %v695_v49 = vld [vmem:[%s1034_s5] ss:$0 sm:$0xff] }
   0xa   :  { %821 = vmatpush3.bf16.msra.mxu1 %v818_v12  ;;  %823 = vmatprep.subr.bf16.mxu0 %v822_v16 }
   0xb   :  { %831 = vmatprep.subr.bf16.mxu1 %v830_v19 }
   0xc   :  { %759 = vmatmul.mubr.msk.f32.vlgmr.msra.gmra.mrb[0].mxu0 %vm33_vm0, %v26_v22 }
   0xd   :  { %773 = vmatmul.mubr.msk.f32.vlgmr.msra.gmra.mrb[0].mxu1 %vm33_vm0, %v189_v25  ;;  %761 = vmatprep.mubr.msk.f32.mxu0 %vm33_vm0, %v27_v26 }
   0xe   :  { %775 = vmatprep.mubr.msk.f32.mxu1 %vm33_vm0, %v190_v27  ;;  %825 = vmatpush3.bf16.msra.mxu0 %v822_v16 }
   0xf   :  { %833 = vmatpush3.bf16.msra.mxu1 %v830_v19  ;;  %827 = vmatprep.subr.bf16.mxu0 %v826_v28 }
  0x10   :  { %762 = vmatmul.mubr.msk.f32.gmra.mrb[2].mxu0 %vm33_vm0, %v28_v30  ;;  %835 = vmatprep.subr.bf16.mxu1 %v834_v29 }
  0x11   :  { %776 = vmatmul.mubr.msk.f32.gmra.mrb[2].mxu1 %vm33_vm0, %v191_v31  ;;  %786 = vmatprep.mubr.msk.f32.mxu0 %vm33_vm0, %v25_v11 }
  0x12   :  { %829 = vmatpush3.bf16.msra.mxu0 %v826_v28  ;;  %800 = vmatprep.mubr.msk.f32.mxu1 %vm33_vm0, %v188_v13 }
  0x13   :  { %837 = vmatpush3.bf16.msra.mxu1 %v834_v29 }
  0x15   :  { %787 = vmatmul.mubr.msk.f32.vlgmr.msra.gmra.mrb[4].mxu0 %vm33_vm0, %v26_v22 }
  0x16   :  { %801 = vmatmul.mubr.msk.f32.vlgmr.msra.gmra.mrb[4].mxu1 %vm33_vm0, %v189_v25  ;;  %789 = vmatprep.mubr.msk.f32.mxu0 %vm33_vm0, %v27_v26 }
  0x17   :  { %803 = vmatprep.mubr.msk.f32.mxu1 %vm33_vm0, %v190_v27 }
  0x19   :  { %790 = vmatmul.mubr.msk.f32.gmra.mrb[6].mxu0 %vm33_vm0, %v28_v30 }
  0x1a   :  { %804 = vmatmul.mubr.msk.f32.gmra.mrb[6].mxu1 %vm33_vm0, %v191_v31 }
  0xdf   :  { %v760_v32 = vpop.f32.mrb[0].mxu0 }
  0xe0   :  { %v774_v33 = vpop.f32.mrb[0].mxu1  ;;  %v112_v34 = vpop.f32.mrb[1].mxu0 }
  0xe1   :  { %v274_v35 = vpop.f32.mrb[1].mxu1  ;;  %131 = vxpose.xlu0.b32.start [1/4] (short) (narrow) %v112_v34, 16 }
  0xe2   :  { %293 = vxpose.xlu1.b32.start [1/4] (short) (narrow) %v274_v35, 16 }
  0xe3   :  { %v763_v36 = vpop.f32.mrb[2].mxu0 }
  0xe4   :  { %v777_v37 = vpop.f32.mrb[2].mxu1  ;;  %v122_v38 = vpop.f32.mrb[3].mxu0 }
  0xe5   :  { %132 = vxpose.xlu0.b32.cont [2/4] (short) (narrow) %v760_v32, 16  ;;  %v284_v39 = vpop.f32.mrb[3].mxu1 }
  0xe6   :  { %294 = vxpose.xlu1.b32.cont [2/4] (short) (narrow) %v774_v33, 16 }
  0xe8   :  { %v788_v40 = vpop.f32.mrb[4].mxu0 }
  0xe9   :  { %133 = vxpose.xlu0.b32.cont [3/4] (short) (narrow) %v122_v38, 16  ;;  %v802_v41 = vpop.f32.mrb[4].mxu1  ;;  %v437_v42 = vpop.f32.mrb[5].mxu0 }
  0xea   :  { %295 = vxpose.xlu1.b32.cont [3/4] (short) (narrow) %v284_v39, 16  ;;  %v601_v43 = vpop.f32.mrb[5].mxu1 }
  0xec   :  { %v791_v44 = vpop.f32.mrb[6].mxu0 }
  0xed   :  { %134 = vxpose.xlu0.b32.end [4/4] (short) (narrow) %v763_v36, 16  ;;  %v805_v45 = vpop.f32.mrb[6].mxu1  ;;  %v447_v46 = vpop.f32.mrb[7].mxu0 }
  0xee   :  { %296 = vxpose.xlu1.b32.end [4/4] (short) (narrow) %v777_v37, 16  ;;  %v611_v47 = vpop.f32.mrb[7].mxu1 }
  0xf1   :  { %456 = vxpose.xlu0.b32.start [1/4] (short) (narrow) %v437_v42, 16 }
  0xf2   :  { %620 = vxpose.xlu1.b32.start [1/4] (short) (narrow) %v601_v43, 16 }
  0xf5   :  { %457 = vxpose.xlu0.b32.cont [2/4] (short) (narrow) %v788_v40, 16 }
  0xf6   :  { %621 = vxpose.xlu1.b32.cont [2/4] (short) (narrow) %v802_v41, 16 }
  0xf9   :  { %458 = vxpose.xlu0.b32.cont [3/4] (short) (narrow) %v447_v46, 16 }
  0xfa   :  { %622 = vxpose.xlu1.b32.cont [3/4] (short) (narrow) %v611_v47, 16 }
  0xfd   :  { %459 = vxpose.xlu0.b32.end [4/4] (short) (narrow) %v791_v44, 16 }
  0xfe   :  { %623 = vxpose.xlu1.b32.end [4/4] (short) (narrow) %v805_v45, 16 }
 0x161   :  { %v147_v50 = vpop.trf.xlu0 }
 0x162   :  { %v309_v51 = vpop.trf.xlu1  ;;  %v170_v52 = vadd.f32 %v690_v48, %v147_v50 }
 0x163   :  { %v332_v53 = vadd.f32 %v695_v49, %v309_v51 }
 0x164   :  { %v172_v54 = vmul.f32 %v170_v52, %v170_v52 }
 0x165   :  { %v148_v55 = vpop.trf.xlu0  ;;  %v334_v56 = vmul.f32 %v332_v53, %v332_v53 }
 0x166   :  { %v171_v57 = vadd.f32 %v690_v48, %v148_v55  ;;  %v174_v58 = vsel %vm33_vm0, %v172_v54, 0.0  ;;  %v310_v59 = vpop.trf.xlu1 }
 0x167   :  { %175 = vadd.xlane.f32.xlu1 %v174_v58  ;;  %v336_v60 = vsel %vm33_vm0, %v334_v56, 0.0  ;;  %v333_v61 = vadd.f32 %v695_v49, %v310_v59 }
 0x168   :  { %337 = vadd.xlane.f32.xlu0 %v336_v60  ;;  %v173_v62 = vmul.f32 %v171_v57, %v171_v57 }
 0x169   :  { %v335_v63 = vmul.f32 %v333_v61, %v333_v61 }
 0x16a   :  { %v177_v0 = vsel %vm33_vm0, %v173_v62, 0.0 }
 0x16b   :  { %178 = vadd.xlane.f32.xlu1 %v177_v0  ;;  %v339_v1 = vsel %vm33_vm0, %v335_v63, 0.0 }
 0x16f   :  { %340 = vadd.xlane.f32.xlu1 %v339_v1 }
 0x171   :  { %v472_v2 = vpop.trf.xlu0 }
 0x172   :  { %v636_v3 = vpop.trf.xlu1  ;;  %v495_v4 = vadd.f32 %v690_v48, %v472_v2 }
 0x173   :  { %v659_v5 = vadd.f32 %v695_v49, %v636_v3 }
 0x174   :  { %v497_v6 = vmul.f32 %v495_v4, %v495_v4 }
 0x175   :  { %v473_v7 = vpop.trf.xlu0  ;;  %v661_v8 = vmul.f32 %v659_v5, %v659_v5 }
 0x176   :  { %v496_v9 = vadd.f32 %v690_v48, %v473_v7  ;;  %v499_v10 = vsel %vm33_vm0, %v497_v6, 0.0  ;;  %v637_v11 = vpop.trf.xlu1 }
 0x177   :  { %v663_v12 = vsel %vm33_vm0, %v661_v8, 0.0  ;;  %500 = vadd.xlane.f32.xlu0 %v499_v10  ;;  %v660_v13 = vadd.f32 %v695_v49, %v637_v11 }
 0x178   :  { %664 = vadd.xlane.f32.xlu1 %v663_v12  ;;  %v498_v14 = vmul.f32 %v496_v9, %v496_v9 }
 0x179   :  { %v662_v15 = vmul.f32 %v660_v13, %v660_v13 }
 0x17a   :  { %v502_v16 = vsel %vm33_vm0, %v498_v14, 0.0 }
 0x17b   :  { %v666_v17 = vsel %vm33_vm0, %v662_v15, 0.0 }
 0x17c   :  { %503 = vadd.xlane.f32.xlu1 %v502_v16 }
 0x180   :  { %667 = vadd.xlane.f32.xlu1 %v666_v17 }
 0x1f4   :  { %v176_v18 = vpop.xlane.xlu1 %175 }
 0x1f5   :  { %v180_v19 = vmax.f32 %v176_v18, 1e-24  ;;  %v338_v20 = vpop.xlane.xlu0 %337 }
 0x1f6   :  { %v342_v21 = vmax.f32 %v338_v20, 1e-24 }
 0x1f7   :  { %839 = vrsqrt.f32 %v180_v19 }
 0x1f8   :  { %841 = vrsqrt.f32 %v342_v21  ;;  %v179_v22 = vpop.xlane.xlu1 %178 }
 0x1f9   :  { %v181_v23 = vmax.f32 %v179_v22, 1e-24 }
 0x1fb   :  { %843 = vrsqrt.f32 %v181_v23 }
 0x1fc   :  { %v341_v24 = vpop.xlane.xlu1 %340 }
 0x1fd   :  { %v343_v25 = vmax.f32 %v341_v24, 1e-24 }
 0x1ff   :  { %845 = vrsqrt.f32 %v343_v25 }
 0x201   :  { %v840_v26 = vpop.eup %839 }
 0x202   :  { %v842_v27 = vpop.eup %841  ;;  %v184_v28 = vmul.f32 %v840_v26, %v170_v52 }
 0x203   :  { %v346_v29 = vmul.f32 %v842_v27, %v332_v53 }
 0x204   :  { %186 = vst.msk [vmem:[%s1035_s6] sm:$0xff] %vm33_vm0, %v184_v28  ;;  %v501_v30 = vpop.xlane.xlu0 %500 }
 0x205   :  { %v844_v31 = vpop.eup %843  ;;  %348 = vst.msk [vmem:[%s1036_s7] sm:$0xff] %vm33_vm0, %v346_v29  ;;  %v665_v32 = vpop.xlane.xlu1 %664  ;;  %v505_v33 = vmax.f32 %v501_v30, 1e-24 }
 0x206   :  { %v185_v34 = vmul.f32 %v844_v31, %v171_v57  ;;  %v669_v35 = vmax.f32 %v665_v32, 1e-24 }
 0x207   :  { %847 = vrsqrt.f32 %v505_v33 }
 0x208   :  { %187 = vst.msk [vmem:[%s1035_s6 + $0x8] sm:$0xff] %vm33_vm0, %v185_v34  ;;  %849 = vrsqrt.f32 %v669_v35 }
 0x209   :  { %v846_v36 = vpop.eup %845  ;;  %v504_v37 = vpop.xlane.xlu1 %503 }
 0x20a   :  { %v347_v38 = vmul.f32 %v846_v36, %v333_v61  ;;  %v506_v39 = vmax.f32 %v504_v37, 1e-24 }
 0x20c   :  { %349 = vst.msk [vmem:[%s1036_s7 + $0x8] sm:$0xff] %vm33_vm0, %v347_v38  ;;  %851 = vrsqrt.f32 %v506_v39 }
 0x20d   :  { %v668_v40 = vpop.xlane.xlu1 %667 }
 0x20e   :  { %v670_v41 = vmax.f32 %v668_v40, 1e-24 }
 0x210   :  { %853 = vrsqrt.f32 %v670_v41 }
 0x211   :  { %v848_v42 = vpop.eup %847 }
 0x212   :  { %v850_v43 = vpop.eup %849  ;;  %v509_v44 = vmul.f32 %v848_v42, %v495_v4 }
 0x213   :  { %v673_v45 = vmul.f32 %v850_v43, %v659_v5 }
 0x214   :  { %705 = vst.msk [vmem:[%s1035_s6 + $0x10] sm:$0xff] %vm33_vm0, %v509_v44 }
 0x215   :  { %716 = vst.msk [vmem:[%s1036_s7 + $0x10] sm:$0xff] %vm33_vm0, %v673_v45 }
 0x216   :  { %v852_v46 = vpop.eup %851 }
 0x217   :  { %v510_v47 = vmul.f32 %v852_v46, %v496_v9 }
 0x219   :  { %706 = vst.msk [vmem:[%s1035_s6 + $0x18] sm:$0xff] %vm33_vm0, %v510_v47 }
 0x21a   :  { %v854_v48 = vpop.eup %853 }
 0x21b   :  { %v674_v49 = vmul.f32 %v854_v48, %v660_v13 }
 0x21d   :  { %717 = vst.msk [vmem:[%s1036_s7 + $0x18] sm:$0xff] %vm33_vm0, %v674_v49 }

// kernel: rank_model_forward.5
= control target key start
LH: loop header
LB: loop body
LE: loop exit
PB: predicated region body
PF: predicated region fallthrough
CT: control target
= control target key end

     0   :  { %s2116_s30 = smov 0   ;;  %s2538_s0 = inlined_call_operand.vmem [shape: f32[2,16,32], index: 0, kind: input, shape index: {}]   ;;  %s2539_s1 = inlined_call_operand.vmem [shape: f32[2,16,32], index: 1, kind: input, shape index: {}]   ;;  %s2540_s2 = inlined_call_operand.vmem [shape: f32[2,2,16,32], index: 2, kind: input, shape index: {}]   ;;  %s2541_s3 = inlined_call_operand.vmem [shape: f32[2,2,16,32], index: 3, kind: input, shape index: {}]   ;;  %s2542_s4 = inlined_call_operand.vmem [shape: f32[2,1,24], index: 4, kind: input, shape index: {}]   ;;  %s2543_s5 = inlined_call_operand.vmem [shape: f32[2,2,24], index: 5, kind: input, shape index: {}]   ;;  %s2544_s6 = inlined_call_operand.vmem [shape: f32[24,32], index: 6, kind: input, shape index: {}]   ;;  %s2545_s7 = inlined_call_operand.vmem [shape: f32[1,32], index: 7, kind: input, shape index: {}]   ;;  %s2546_s8 = inlined_call_operand.vmem [shape: f32[1,32], index: 8, kind: input, shape index: {}]   ;;  %s2547_s9 = inlined_call_operand.vmem [shape: f32[2,10,17], index: 9, kind: output, shape index: {}]  }
   0x1 LB: > { %s1823_s10 = sadd.s32 4294967295, %s2059_s30   ;;  %p1827_p0 = scmp.ge.s32.totalorder %s2059_s30, 1  ;;  %s2059_s30 = sphi %s2116_s30, %s19_s30  }
   0x2   : > { %p334_p1 = scmp.lt.s32.totalorder %s2059_s30, 3 }
   0x4   : > { %p335_p2 = pnand %p1827_p0, %p334_p1 }
   0x5   : > { %v425_v0 = vld [vmem:[%s2544_s6] sm:$0xff] (!%p335_p2)  ;;  %v426_v1 = vld [vmem:[%s2544_s6 + $0x8] sm:$0xff] (!%p335_p2)  ;;  %v513_v2 = vlaneseq (!%p335_p2)  ;;  %v2061_v3 = vmov (!%p335_p2), 0.0|0.0   ;;  %p392_p3 = scmp.lt.s32.totalorder (!%p335_p2), %s1823_s10, 1  ;;  %vm2062_vm0 = vmmov (!%p335_p2), 0   ;;  %v2063_v5 = vmov (!%p335_p2), 0.0  }
   0x6   : > { %338 = sbr.rel (%p335_p2) target bundleno = 1109 (0x455), region = 56  ;;  %1952 = vmatprep.subr.bf16.mxu0 (!%p335_p2), %v2061_v3  ;;  %1955 = vmatprep.subr.bf16.mxu1 (!%p335_p2), %v2061_v3  ;;  %v1953_v4 = vpack.c.bf16 (!%p335_p2), %v426_v1, %v425_v0  ;;  %v2142_v7 = vld [vmem:[%s2546_s8] sm:$0x1] (!%p335_p2)  ;;  %v427_v8 = vld [vmem:[%s2544_s6 + $0x10] sm:$0xff] (!%p335_p2)  ;;  %vm429_vm1 = vcmask (!%p335_p2), 195584   ;;  %vm612_vm2 = vcmask (!%p335_p2), 261120  }
   0x7   : > { %1898 = vmatprep.mubr.msk.f32.mxu0 (!%p335_p2), %vm2062_vm0, %v2063_v5  ;;  %1907 = vmatprep.mubr.msk.f32.mxu1 (!%p335_p2), %vm2062_vm0, %v2063_v5  ;;  %v2137_v6 = vshrl.u32 (!%p335_p2), %v513_v2, 7  ;;  %vm2203_vm3 = vmpackc.low (!%p335_p2), %vm612_vm2, %vm612_vm2  ;;  %v825_v48 = vand.u32 (!%p335_p2), 127, %v513_v2  ;;  %v428_v52 = vld [vmem:[%s2545_s7] sm:$0x1] (!%p335_p2)  ;;  %vm835_vm4 = vcmask (!%p335_p2), 130112   ;;  %vm592_vm5 = vcmask (!%p335_p2), 254976  }
   0x8   : > { %1954 = vmatpush3.bf16.msra.mxu0 (!%p335_p2), %v1953_v4  ;;  %1957 = vmatpush3.bf16.msra.mxu1 (!%p335_p2), %v1953_v4  ;;  %vm504_vm6 = vcmask (!%p335_p2), 253952   ;;  %vm846_vm7 = vcmask (!%p335_p2), 1041409   ;;  %vm849_vm8 = vcmask (!%p335_p2), 123904   ;;  %vm692_vm9 = vcmask (!%p335_p2), 122880  }
   0x9   : > { %1896 = vmatprep.subr.mxu0 (!%p335_p2), %v2063_v5  ;;  %1905 = vmatprep.subr.mxu1 (!%p335_p2), %v2063_v5  ;;  %v2150_v9 = vsub.s32 (!%p335_p2), 0, %v2137_v6  ;;  %v830_v51 = vadd.s32 (!%p335_p2), 4294967288, %v825_v48  ;;  %v2275_v55 = vsub.s32 (!%p335_p2), %v825_v48, %v2137_v6 }
   0xb   : > { %v802_v11 = vrot.slane (!%p335_p2), %v2142_v7, %v2150_v9  ;;  %v2278_v56 = vsub.s32 (!%p335_p2), %v830_v51, %v2137_v6  ;;  %v516_v57 = vrot.slane (!%p335_p2), %v428_v52, %v2150_v9 }
   0xc   : > { %1897 = vmatpush3.msra.mxu0 (!%p335_p2), %v427_v8  ;;  %1906 = vmatpush3.msra.mxu1 (!%p335_p2), %v427_v8 }
   0xd   : > { %s2551_s10 = smov (!%p392_p3, %s1823_s10), 1  ;;  %1962 = vmatprep.subr.bf16.mxu1 %v2061_v3  ;;  %1958 = vmatprep.subr.bf16.mxu0 %v2061_v3 }
   0xe   : > { %s414_s21 = scalar_lea.vmem %s2542_s4, %s2551_s10  ;;  %s1836_s22 = sshll.u32 %s2551_s10, 1 }
   0xf   : > { %v424_v10 = vld [vmem:[%s414_s21] sm:$0x1]  ;;  %s418_s25 = scalar_lea.vmem %s2543_s5, %s1836_s22  ;;  %s1863_s26 = sshll.u32 %s2551_s10, 5 }
  0x10   : > { %v511_v12 = vld [vmem:[%s418_s25] sm:$0x3]  ;;  %s406_s29 = scalar_lea.vmem %s2540_s2, %s1863_s26  ;;  %s2166_s13 = scalar_lea.vmem %s2541_s3, %s1863_s26  ;;  %1899 = vmatmul.mubr.msk.f32.vlgmr.msra.gmra.mrb[0].mxu0 %vm429_vm1, %v424_v10 }
  0x11   : > { %1908 = vmatmul.mubr.msk.f32.vlgmr.msra.gmra.mrb[0].mxu1 %vm429_vm1, %v511_v12  ;;  %v2168_v13 = vld [vmem:[%s406_s29 + $0x10] sm:$0xff]  ;;  %v2170_v14 = vld [vmem:[%s406_s29] sm:$0xff]  ;;  %v2172_v15 = vld [vmem:[%s406_s29 + $0x18] sm:$0xff]  ;;  %s2174_s14 = sshll.u32 %s2551_s10, 4  ;;  %1914 = vmatprep.mubr.msk.f32.mxu0 %vm2062_vm0, %v2063_v5  ;;  %s2065_s22 = smov 16  }
  0x12   : > { %v806_v16 = vmul.f32 %v802_v11, %v2168_v13  ;;  %v804_v17 = vmul.f32 %v802_v11, %v2170_v14  ;;  %v807_v18 = vmul.f32 %v802_v11, %v2172_v15  ;;  %v2179_v19 = vld [vmem:[%s406_s29 + $0x8] sm:$0xff]  ;;  %s401_s17 = scalar_lea.vmem %s2539_s1, %s2174_s14  ;;  %1921 = vmatprep.mubr.msk.f32.mxu1 %vm2062_vm0, %v2063_v5  ;;  %v2193_v22 = vld [vmem:[%s2166_s13] sm:$0xff]  ;;  %v2213_v33 = vld [vmem:[%s2166_s13 + $0x18] sm:$0xff]  ;;  %s396_s19 = scalar_lea.vmem %s2538_s0, %s2174_s14 }
  0x13   : > { %v2182_v20 = vld [vmem:[%s2166_s13 + $0x8] sm:$0xff]  ;;  %v805_v21 = vmul.f32 %v802_v11, %v2179_v19  ;;  %v601_v23 = vld [vmem:[%s401_s17] sm:$0xff]  ;;  %v931_v31 = vmul.f32 %v802_v11, %v2193_v22  ;;  %v2216_v34 = vld [vmem:[%s2166_s13 + $0x10] sm:$0xff]  ;;  %v934_v37 = vmul.f32 %v802_v11, %v2213_v33  ;;  %s423_s25 = scalar_lea.vmem %s2547_s9, %s2174_s14 }
  0x14   : > { %v814_v24 = vsel %vm612_vm2, %v806_v16, 0.0  ;;  %v808_v25 = vsel %vm612_vm2, %v804_v17, 0.0  ;;  %v602_v26 = vld [vmem:[%s401_s17 + $0x8] sm:$0xff]  ;;  %v932_v27 = vmul.f32 %v802_v11, %v2182_v20  ;;  %v817_v29 = vsel %vm612_vm2, %v807_v18, 0.0  ;;  %v599_v41 = vld [vmem:[%s396_s19] sm:$0xff] }
  0x15   : > { %815 = vadd.xlane.f32.xlu1 %v814_v24  ;;  %809 = vadd.xlane.f32.xlu0 %v808_v25  ;;  %v811_v30 = vsel %vm612_vm2, %v805_v21, 0.0  ;;  %v2210_v32 = vpack.c.bf16 %v602_v26, %v601_v23  ;;  %v935_v36 = vsel %vm612_vm2, %v931_v31, 0.0  ;;  %v933_v38 = vmul.f32 %v802_v11, %v2216_v34  ;;  %v600_v42 = vld [vmem:[%s396_s19 + $0x8] sm:$0xff] }
  0x16   : > { %v938_v35 = vsel %vm612_vm2, %v932_v27, 0.0  ;;  %v944_v39 = vsel %vm612_vm2, %v934_v37, 0.0  ;;  %v2240_v43 = vpack.c.bf16 %v600_v42, %v599_v41  ;;  %v2314_v41 = vsub.s32 1, %v2137_v6 }
  0x17   : > { %1965 = vmatpush3.bf16.xpose.msk.msra.mxu1 %vm2203_vm3, %v2210_v32  ;;  %v941_v40 = vsel %vm612_vm2, %v933_v38, 0.0 }
  0x18   : > { %1970 = vmatprep.subr.bf16.mxu1 %v2061_v3  ;;  %1961 = vmatpush3.bf16.xpose.msk.msra.mxu0 %vm2203_vm3, %v2240_v43 }
  0x19   : > { %818 = vadd.xlane.f32.xlu1 %v817_v29  ;;  %812 = vadd.xlane.f32.xlu0 %v811_v30  ;;  %v2064_v30 = vmov 0  }
  0x1a   : > { %1966 = vmatprep.subr.bf16.mxu0 %v2061_v3  ;;  %1996 = vset.pattern.permute.xlu1 %v2064_v30 }
  0x1b   : > { %1995 = vset.pattern.permute.xlu0 %v2064_v30 }
  0x1d   : > { %939 = vadd.xlane.f32.xlu1 %v938_v35  ;;  %936 = vadd.xlane.f32.xlu0 %v935_v36 }
  0x1e   : > { %1922 = vmatmul.mubr.msk.f32.vlgmr.msra.gmra.mrb[2].mxu1 %vm612_vm2, %v2142_v7 }
  0x1f   : > { %1973 = vmatpush3.bf16.xpose.msk.msra.mxu1 %vm2203_vm3, %v2210_v32  ;;  %1935 = vmatprep.mubr.msk.f32.mxu1 %vm2062_vm0, %v2063_v5 }
  0x20   : > { %1978 = vmatprep.subr.bf16.mxu1 %v2061_v3  ;;  %1915 = vmatmul.mubr.msk.f32.vlgmr.msra.gmra.mrb[2].mxu0 %vm612_vm2, %v2142_v7 }
  0x21   : > { %945 = vadd.xlane.f32.xlu1 %v944_v39  ;;  %942 = vadd.xlane.f32.xlu0 %v941_v40 }
  0x22   : > { %1969 = vmatpush3.bf16.xpose.msk.msra.mxu0 %vm2203_vm3, %v2240_v43  ;;  %1928 = vmatprep.mubr.msk.f32.mxu0 %vm2062_vm0, %v2063_v5 }
  0x23   : > { %1974 = vmatprep.subr.bf16.mxu0 %v2061_v3 }
  0xa2   : > { %v2254_v44 = vpop.xlane.xlu1 %815  ;;  %v2256_v45 = vpop.xlane.xlu0 %809 }
  0xa3   : > { %v840_v62 = vrot.slane %v2254_v44, %v2275_v55  ;;  %v829_v63 = vrot.slane %v2256_v45, %v2275_v55 }
  0xa6   : > { %v2258_v46 = vpop.xlane.xlu1 %818  ;;  %v2260_v47 = vpop.xlane.xlu0 %812 }
  0xa7   : > { %v844_v0 = vrot.slane %v2258_v46, %v2278_v56  ;;  %v834_v1 = vrot.slane %v2260_v47, %v2278_v56 }
  0xa9   : > { %v836_v18 = vsel %vm835_vm4, %v834_v1, %v829_v63  ;;  %v845_v21 = vsel %vm835_vm4, %v844_v0, %v840_v62 }
  0xaa   : > { %v2263_v49 = vpop.xlane.xlu1 %939  ;;  %v2265_v50 = vpop.xlane.xlu0 %936  ;;  %v847_v26 = vsel %vm846_vm7, %v845_v21, %v836_v18 }
  0xab   : > { %v958_v58 = vrot.slane %v2263_v49, %v2278_v56  ;;  %v954_v59 = vrot.slane %v2265_v50, %v2275_v55  ;;  %v850_v29 = vsel %vm849_vm8, %v847_v26, -inf }
  0xad   : > { %v959_v10 = vsel %vm835_vm4, %v958_v58, %v954_v59 }
  0xae   : > { %v2270_v53 = vpop.xlane.xlu1 %945  ;;  %v2272_v54 = vpop.xlane.xlu0 %942 }
  0xaf   : > { %v967_v60 = vrot.slane %v2270_v53, %v2278_v56  ;;  %v963_v61 = vrot.slane %v2272_v54, %v2275_v55 }
  0xb1   : > { %v968_v11 = vsel %vm835_vm4, %v967_v60, %v963_v61 }
  0xb2   : > { %v969_v23 = vsel %vm846_vm7, %v968_v11, %v959_v10 }
  0xb3   : > { %v971_v27 = vsel %vm849_vm8, %v969_v23, -inf }
  0xe3   : > { %v499_v2 = vpop.f32.mrb[0].mxu0 }
  0xe4   : > { %v587_v3 = vpop.f32.mrb[0].mxu1  ;;  %v500_v4 = vadd.f32 %v499_v2, %v428_v52  ;;  %v1900_v8 = vpop.f32.mrb[1].mxu0 }
  0xe5   : > { %v2297_v7 = vadd.f32 %v587_v3, %v516_v57  ;;  %v1909_v12 = vpop.f32.mrb[1].mxu1 }
  0xe6   : > { %v503_v17 = vmul.f32 %v500_v4, %v500_v4 }
  0xe7   : > { %v591_v16 = vmul.f32 %v2297_v7, %v2297_v7 }
  0xe8   : > { %v505_v25 = vsel %vm504_vm6, %v503_v17, 0.0 }
  0xe9   : > { %v593_v24 = vsel %vm592_vm5, %v591_v16, 0.0  ;;  %506 = vadd.xlane.f32.xlu0 %v505_v25 }
  0xea   : > { %594 = vadd.xlane.f32.xlu1 %v593_v24 }
  0xed   : > { %851 = vmax.xlane.f32.xlu0 %v850_v29 }
  0xee   : > { %972 = vmax.xlane.f32.xlu1 %v971_v27 }
  0xf1   : > { %v2309_v31 = vpop.f32.mrb[2].mxu1 }
  0xf2   : > { %v1923_v35 = vpop.f32.mrb[3].mxu1  ;;  %v780_v18 = vsel %vm692_vm9, %v2309_v31, -inf }
  0xf3   : > { %v2311_v36 = vpop.f32.mrb[2].mxu0 }
  0xf4   : > { %v1916_v37 = vpop.f32.mrb[3].mxu0 }
 0x176   : > { %v507_v38 = vpop.xlane.xlu0 %506 }
 0x177   : > { %v508_v39 = vmax.f32 %v507_v38, 1e-24  ;;  %v595_v40 = vpop.xlane.xlu1 %594 }
 0x178   : > { %v596_v51 = vmax.f32 %v595_v40, 1e-24 }
 0x179   : > { %1997 = vrsqrt.f32 %v508_v39 }
 0x17a   : > { %v852_v42 = vpop.xlane.xlu0 %851  ;;  %1999 = vrsqrt.f32 %v596_v51 }
 0x17b   : > { %v857_v48 = vrot.slane %v852_v42, %v2150_v9  ;;  %v861_v52 = vrot.slane %v852_v42, %v2314_v41  ;;  %v973_v62 = vpop.xlane.xlu1 %972 }
 0x17c   : > { %v978_v0 = vrot.slane %v973_v62, %v2150_v9  ;;  %v982_v3 = vrot.slane %v973_v62, %v2314_v41 }
 0x17d   : > { %v864_v57 = vsub.f32 %v2256_v45, %v857_v48  ;;  %v865_v58 = vsub.f32 %v2260_v47, %v857_v48  ;;  %v866_v60 = vsub.f32 %v2254_v44, %v861_v52  ;;  %v867_v1 = vsub.f32 %v2258_v46, %v861_v52 }
 0x17e   : > { %v985_v45 = vsub.f32 %v2265_v50, %v978_v0 }
 0x17f   : > { %v868_v59 = vmul.f32 1.442695, %v864_v57  ;;  %v870_v61 = vmul.f32 1.442695, %v865_v58  ;;  %v872_v2 = vmul.f32 1.442695, %v866_v60 }
 0x180   : > { %v874_v46 = vmul.f32 1.442695, %v867_v1 }
 0x181   : > { %2001 = vpow2.f32 %v868_v59 }
 0x182   : > { %2003 = vpow2.f32 %v870_v61 }
 0x183   : > { %v1998_v63 = vpop.eup %1997  ;;  %2005 = vpow2.f32 %v872_v2 }
 0x184   : > { %v510_v6 = vmul.f32 %v1998_v63, %v500_v4  ;;  %v2000_v44 = vpop.eup %1999  ;;  %v989_v4 = vmul.f32 1.442695, %v985_v45  ;;  %2007 = vpow2.f32 %v874_v46 }
 0x185   : > { %v598_v47 = vmul.f32 %v2000_v44, %v2297_v7 }
 0x186   : > { %1929 = vmatmul.mubr.msk.f32.vlgmr.msra.gmra.mrb[4].mxu0 %vm612_vm2, %v510_v6  ;;  %1936 = vmatmul.mubr.msk.f32.vlgmr.msra.gmra.mrb[4].mxu1 %vm612_vm2, %v510_v6  ;;  %2009 = vpow2.f32 %v989_v4  ;;  %v1341_v17 = vrot.slane %v510_v6, %v2150_v9 }
 0x187   : > { %1977 = vmatpush3.bf16.xpose.msk.msra.mxu0 %vm2203_vm3, %v2240_v43  ;;  %1981 = vmatpush3.bf16.xpose.msk.msra.mxu1 %vm2203_vm3, %v2210_v32  ;;  %v986_v43 = vsub.f32 %v2263_v49, %v978_v0  ;;  %v987_v32 = vsub.f32 %v2272_v54, %v982_v3  ;;  %v988_v49 = vsub.f32 %v2270_v53, %v982_v3 }
 0x188   : > { %1942 = vmatprep.mubr.msk.f32.mxu0 %vm2062_vm0, %v2063_v5  ;;  %1949 = vmatprep.mubr.msk.f32.mxu1 %vm2062_vm0, %v2063_v5  ;;  %v1342_v21 = vmul.f32 %v1341_v17, %v2170_v14  ;;  %v1344_v24 = vmul.f32 %v1341_v17, %v2168_v13  ;;  %v1358_v26 = vmul.f32 %v1341_v17, %v2193_v22  ;;  %v693_v14 = vsel %vm692_vm9, %v2311_v36, -inf }
 0x189   : > { %v991_v50 = vmul.f32 1.442695, %v986_v43  ;;  %v993_v8 = vmul.f32 1.442695, %v987_v32  ;;  %v995_v11 = vmul.f32 1.442695, %v988_v49  ;;  %v1360_v29 = vmul.f32 %v1341_v17, %v2216_v34 }
 0x18a   : > { %v1346_v23 = vsel %vm612_vm2, %v1342_v21, 0.0  ;;  %v1352_v25 = vsel %vm612_vm2, %v1344_v24, 0.0  ;;  %v1362_v27 = vsel %vm612_vm2, %v1358_v26, 0.0  ;;  %v1343_v35 = vmul.f32 %v1341_v17, %v2179_v19 }
 0x18b   : > { %v2339_v28 = vpop.eup %2001  ;;  %2011 = vpow2.f32 %v991_v50  ;;  %v1368_v30 = vsel %vm612_vm2, %v1360_v29, 0.0  ;;  %v1345_v37 = vmul.f32 %v1341_v17, %v2172_v15  ;;  %v1359_v38 = vmul.f32 %v1341_v17, %v2182_v20 }
 0x18c   : > { %v2343_v5 = vpop.eup %2003  ;;  %881 = vperm.xlu0 %1995, %v2339_v28   ;;  %2013 = vpow2.f32 %v993_v8  ;;  %v1349_v13 = vsel %vm612_vm2, %v1343_v35, 0.0  ;;  %v1361_v39 = vmul.f32 %v1341_v17, %v2213_v33 }
 0x18d   : > { %884 = vperm.xlu1 %1996, %v2343_v5   ;;  %v2348_v7 = vpop.eup %2005  ;;  %2015 = vpow2.f32 %v995_v11  ;;  %v1355_v22 = vsel %vm612_vm2, %v1345_v37, 0.0  ;;  %v1365_v34 = vsel %vm612_vm2, %v1359_v38, 0.0 }
 0x18e   : > { %1943 = vmatmul.mubr.msk.f32.vlgmr.msra.gmra.mrb[6].mxu0 %vm612_vm2, %v598_v47  ;;  %1950 = vmatmul.mubr.msk.f32.vlgmr.msra.gmra.mrb[6].mxu1 %vm612_vm2, %v598_v47  ;;  %v2352_v10 = vpop.eup %2007  ;;  %v1371_v40 = vsel %vm612_vm2, %v1361_v39, 0.0 }
 0x190   : > { %v2355_v12 = vpop.eup %2009 }
 0x191   : > { %887 = vperm.xlu1 %1996, %v2348_v7  }
 0x195   : > { %890 = vperm.xlu1 %1996, %v2352_v10   ;;  %v2358_v54 = vpop.eup %2011 }
 0x196   : > { %v2361_v16 = vpop.eup %2013 }
 0x197   : > { %v2364_v53 = vpop.eup %2015 }
 0x199   : > { %1002 = vperm.xlu1 %1996, %v2355_v12  }
 0x19d   : > { %1005 = vperm.xlu1 %1996, %v2358_v54  }
 0x1a1   : > { %1008 = vperm.xlu1 %1996, %v2361_v16  }
 0x1a5   : > { %1011 = vperm.xlu1 %1996, %v2364_v53  }
 0x1ab   : > { %781 = vmax.xlane.f32.xlu0 %v780_v18 }
 0x1af   : > { %1347 = vadd.xlane.f32.xlu0 %v1346_v23 }
 0x1b3   : > { %1353 = vadd.xlane.f32.xlu0 %v1352_v25 }
 0x1b7   : > { %1363 = vadd.xlane.f32.xlu0 %v1362_v27 }
 0x1bb   : > { %1369 = vadd.xlane.f32.xlu0 %v1368_v30 }
 0x1c9   : > { %694 = vmax.xlane.f32.xlu1 %v693_v14 }
 0x1cd   : > { %1350 = vadd.xlane.f32.xlu1 %v1349_v13 }
 0x1d1   : > { %1356 = vadd.xlane.f32.xlu1 %v1355_v22 }
 0x1d5   : > { %1366 = vadd.xlane.f32.xlu1 %v1365_v34 }
 0x1d9   : > { %1372 = vadd.xlane.f32.xlu1 %v1371_v40 }
 0x20b   : > { %v882_v42 = vpop.permute.xlu0 %881 }
 0x20c   : > { %v885_v19 = vpop.permute.xlu1 %884  ;;  %v895_v15 = vrot.slane %v882_v42, %v2275_v55 }
 0x20d   : > { %v899_v51 = vrot.slane %v885_v19, %v2278_v56 }
 0x20f   : > { %v900_v58 = vsel %vm835_vm4, %v899_v51, %v895_v15 }
 0x210   : > { %v888_v48 = vpop.permute.xlu1 %887 }
 0x211   : > { %v904_v57 = vrot.slane %v888_v48, %v2275_v55 }
 0x214   : > { %v891_v52 = vpop.permute.xlu1 %890 }
 0x215   : > { %v908_v20 = vrot.slane %v891_v52, %v2278_v56 }
 0x217   : > { %v909_v33 = vsel %vm835_vm4, %v908_v20, %v904_v57 }
 0x218   : > { %v1003_v59 = vpop.permute.xlu1 %1002  ;;  %v910_v60 = vsel %vm846_vm7, %v909_v33, %v900_v58 }
 0x219   : > { %v912_v61 = vsel %vm849_vm8, %v910_v60, 0.0  ;;  %v1016_v1 = vrot.slane %v1003_v59, %v2275_v55 }
 0x21a   : > { %913 = vadd.xlane.f32.xlu0 %v912_v61 }
 0x21c   : > { %v1006_v62 = vpop.permute.xlu1 %1005 }
 0x21d   : > { %v1020_v6 = vrot.slane %v1006_v62, %v2278_v56 }
 0x21f   : > { %v1021_v45 = vsel %vm835_vm4, %v1020_v6, %v1016_v1 }
 0x220   : > { %v1009_v63 = vpop.permute.xlu1 %1008 }
 0x221   : > { %v1025_v2 = vrot.slane %v1009_v63, %v2275_v55 }
 0x224   : > { %v1012_v0 = vpop.permute.xlu1 %1011 }
 0x225   : > { %v1029_v44 = vrot.slane %v1012_v0, %v2278_v56 }
 0x227   : > { %v1030_v46 = vsel %vm835_vm4, %v1029_v44, %v1025_v2 }
 0x228   : > { %v1031_v47 = vsel %vm846_vm7, %v1030_v46, %v1021_v45 }
 0x229   : > { %v1033_v3 = vsel %vm849_vm8, %v1031_v47, 0.0 }
 0x22a   : > { %1034 = vadd.xlane.f32.xlu1 %v1033_v3 }
 0x238   : > { %v782_v43 = vpop.xlane.xlu0 %781 }
 0x239   : > { %v783_v4 = vsub.f32 %v2309_v31, %v782_v43 }
 0x23b   : > { %v784_v32 = vmul.f32 1.442695, %v783_v4 }
 0x23c   : > { %v1348_v14 = vpop.xlane.xlu0 %1347 }
 0x23d   : > { %2017 = vpow2.f32 %v784_v32  ;;  %v1514_v13 = vmul.f32 2.0, %v1348_v14 }
 0x23f   : > { %v1518_v22 = vsub.f32 2.0, %v1514_v13 }
 0x240   : > { %v1354_v35 = vpop.xlane.xlu0 %1353 }
 0x241   : > { %v1516_v37 = vmul.f32 2.0, %v1354_v35  ;;  %v1522_v19 = vmax.f32 %v1518_v22, 0.0 }
 0x243   : > { %v1520_v39 = vsub.f32 2.0, %v1516_v37  ;;  %vm1528_vm10 = vcmp.eq.f32.partialorder %v1522_v19, inf  ;;  %vm1530_vm11 = vcmp.eq.f32.partialorder %v1522_v19, 0.0 }
 0x244   : > { %v1364_v40 = vpop.xlane.xlu0 %1363 }
 0x245   : > { %v1524_v51 = vmax.f32 %v1520_v39, 0.0  ;;  %v1597_v58 = vmul.f32 2.0, %v1364_v40 }
 0x247   : > { %v2405_v50 = vpop.eup %2017  ;;  %v1601_v63 = vsub.f32 2.0, %v1597_v58  ;;  %vm1542_vm12 = vcmp.eq.f32.partialorder %v1524_v51, inf  ;;  %vm1544_vm13 = vcmp.eq.f32.partialorder %v1524_v51, 0.0  ;;  %v1545_v13 = vand.u32 2147483648, %v1524_v51 }
 0x248   : > { %v786_v49 = vsel %vm692_vm9, %v2405_v50, 0.0  ;;  %v1370_v20 = vpop.xlane.xlu0 %1369 }
 0x249   : > { %787 = vadd.xlane.f32.xlu1 %v786_v49  ;;  %v1599_v62 = vmul.f32 2.0, %v1370_v20  ;;  %v2425_v44 = vmax.f32 %v1601_v63, 0.0 }
 0x24b   : > { %v1603_v2 = vsub.f32 2.0, %v1599_v62  ;;  %vm1611_vm3 = vcmp.eq.f32.partialorder %v2425_v44, inf  ;;  %vm1613_vm5 = vcmp.eq.f32.partialorder %v2425_v44, 0.0 }
 0x24d   : > { %v2429_v4 = vmax.f32 %v1603_v2, 0.0 }
 0x24f   : > { %vm1625_vm6 = vcmp.eq.f32.partialorder %v2429_v4, inf }
 0x256   : > { %v695_v8 = vpop.xlane.xlu1 %694 }
 0x257   : > { %v696_v17 = vsub.f32 %v2311_v36, %v695_v8 }
 0x259   : > { %v2409_v11 = vpop.f32.mrb[4].mxu1  ;;  %v2412_v18 = vpop.f32.mrb[4].mxu0  ;;  %v697_v24 = vmul.f32 1.442695, %v696_v17 }
 0x25a   : > { %v1937_v21 = vpop.f32.mrb[5].mxu1  ;;  %v1930_v23 = vpop.f32.mrb[5].mxu0 }
 0x25b   : > { %2019 = vpow2.f32 %v697_v24  ;;  %v1351_v36 = vpop.xlane.xlu1 %1350 }
 0x25c   : > { %v1515_v38 = vmul.f32 2.0, %v1351_v36  ;;  %2021 = vrsqrt.f32 %v1522_v19 }
 0x25d   : > { %2023 = vrsqrt.f32 %v1524_v51 }
 0x25e   : > { %v1519_v42 = vsub.f32 2.0, %v1515_v38 }
 0x25f   : > { %v1357_v34 = vpop.xlane.xlu1 %1356 }
 0x260   : > { %v1517_v48 = vmul.f32 2.0, %v1357_v34  ;;  %v1523_v52 = vmax.f32 %v1519_v42, 0.0 }
 0x261   : > { %v2414_v31 = vpop.f32.mrb[6].mxu0  ;;  %v2416_v25 = vpop.f32.mrb[6].mxu1 }
 0x262   : > { %v1944_v26 = vpop.f32.mrb[7].mxu0  ;;  %v1951_v27 = vpop.f32.mrb[7].mxu1  ;;  %v1521_v57 = vsub.f32 2.0, %v1517_v48  ;;  %2025 = vrsqrt.f32 %v1523_v52  ;;  %vm1535_vm14 = vcmp.eq.f32.partialorder %v1523_v52, inf  ;;  %vm1537_vm15 = vcmp.eq.f32.partialorder %v1523_v52, 0.0 }
 0x263   : > { %v1367_v15 = vpop.xlane.xlu1 %1366  ;;  %v1531_v27 = vand.u32 2147483648, %v1522_v19 }
 0x264   : > { %v2422_v33 = vmax.f32 %v1521_v57, 0.0  ;;  %v1598_v59 = vmul.f32 2.0, %v1367_v15 }
 0x265   : > { %v2418_v29 = vpop.eup %2019 }
 0x266   : > { %v699_v30 = vsel %vm692_vm9, %v2418_v29, 0.0  ;;  %v1602_v0 = vsub.f32 2.0, %v1598_v59  ;;  %v2022_v1 = vpop.eup %2021  ;;  %vm1549_vm0 = vcmp.eq.f32.partialorder %v2422_v33, inf  ;;  %v1552_v57 = vand.u32 2147483648, %v2422_v33 }
 0x267   : > { %700 = vadd.xlane.f32.xlu0 %v699_v30  ;;  %v1373_v60 = vpop.xlane.xlu1 %1372  ;;  %v2024_v46 = vpop.eup %2023  ;;  %v1527_v3 = vmul.f32 %v2022_v1, %v1522_v19  ;;  %vm1551_vm1 = vcmp.eq.f32.partialorder %v2422_v33, 0.0 }
 0x268   : > { %v1600_v6 = vmul.f32 2.0, %v1373_v60  ;;  %v2427_v47 = vmax.f32 %v1602_v0, 0.0  ;;  %v1541_v49 = vmul.f32 %v2024_v46, %v1524_v51 }
 0x269   : > { %v1529_v21 = vsel %vm1528_vm10, %v1522_v19, %v1527_v3 }
 0x26a   : > { %v1604_v45 = vsub.f32 2.0, %v1600_v6  ;;  %v1543_v36 = vsel %vm1542_vm12, %v1524_v51, %v1541_v49  ;;  %v1532_v35 = vsel %vm1530_vm11, %v1531_v27, %v1529_v21  ;;  %vm1618_vm2 = vcmp.eq.f32.partialorder %v2427_v47, inf }
 0x26b   : > { %v1546_v40 = vsel %vm1544_vm13, %v1545_v13, %v1543_v36  ;;  %v1621_v2 = vand.u32 2147483648, %v2427_v47  ;;  %vm1620_vm10 = vcmp.eq.f32.partialorder %v2427_v47, 0.0  ;;  %vm1627_vm13 = vcmp.eq.f32.partialorder %v2429_v4, 0.0 }
 0x26c   : > { %v2026_v43 = vpop.eup %2025  ;;  %v2432_v32 = vmax.f32 %v1604_v45, 0.0  ;;  %v1614_v45 = vand.u32 2147483648, %v2425_v44  ;;  %v1458_v36 = vmul.f32 2.0, %v2412_v18 }
 0x26d   : > { %v1534_v24 = vmul.f32 %v2026_v43, %v1523_v52 }
 0x26e   : > { %vm1632_vm11 = vcmp.eq.f32.partialorder %v2432_v32, inf  ;;  %vm1634_vm12 = vcmp.eq.f32.partialorder %v2432_v32, 0.0 }
 0x26f   : > { %v1536_v34 = vsel %vm1535_vm14, %v1523_v52, %v1534_v24 }
 0x2a7   : > { %v914_v61 = vpop.xlane.xlu0 %913 }
 0x2a8   : > { %2027 = vrcp.f32 %v914_v61 }
 0x2a9   : > { %2029 = vrsqrt.f32 %v2422_v33 }
 0x2aa   : > { %2031 = vrsqrt.f32 %v2425_v44 }
 0x2ab   : > { %2033 = vrsqrt.f32 %v2427_v47 }
 0x2ac   : > { %2035 = vrsqrt.f32 %v2429_v4 }
 0x2ad   : > { %2037 = vrsqrt.f32 %v2432_v32 }
 0x2b2   : > { %v2028_v8 = vpop.eup %2027 }
 0x2b3   : > { %v920_v17 = vrot.slane %v2028_v8, %v2150_v9  ;;  %v924_v23 = vrot.slane %v2028_v8, %v2314_v41  ;;  %v2030_v26 = vpop.eup %2029 }
 0x2b4   : > { %v1548_v39 = vmul.f32 %v2030_v26, %v2422_v33  ;;  %v2032_v42 = vpop.eup %2031 }
 0x2b5   : > { %v927_v30 = vmul.f32 %v2339_v28, %v920_v17  ;;  %v2441_v14 = vmul.f32 %v2348_v7, %v924_v23  ;;  %v2444_v38 = vmul.f32 %v2343_v5, %v920_v17  ;;  %v1538_v28 = vand.u32 2147483648, %v1523_v52  ;;  %v2034_v15 = vpop.eup %2033 }
 0x2b6   : > { %v930_v5 = vmul.f32 %v2352_v10, %v924_v23  ;;  %v1550_v51 = vsel %vm1549_vm0, %v2422_v33, %v1548_v39  ;;  %v2036_v20 = vpop.eup %2035  ;;  %v1617_v60 = vmul.f32 %v2034_v15, %v2427_v47  ;;  %v1610_v61 = vmul.f32 %v2032_v42, %v2425_v44 }
 0x2b7   : > { %1382 = vperm.xlu0 %1995, %v927_v30   ;;  %v1035_v37 = vpop.xlane.xlu1 %1034  ;;  %v1554_v22 = vmul.f32 %v1532_v35, %v927_v30  ;;  %v1556_v7 = vmul.f32 %v1546_v40, %v2441_v14  ;;  %v1539_v19 = vsel %vm1537_vm15, %v1538_v28, %v1536_v34  ;;  %v1553_v58 = vsel %vm1551_vm1, %v1552_v57, %v1550_v51  ;;  %v2038_v52 = vpop.eup %2037 }
 0x2b8   : > { %2039 = vrcp.f32 %v1035_v37  ;;  %v1555_v48 = vmul.f32 %v1539_v19, %v2444_v38  ;;  %v1557_v59 = vmul.f32 %v1553_v58, %v930_v5  ;;  %v1631_v10 = vmul.f32 %v2038_v52, %v2432_v32 }
 0x2b9   : > { %1563 = vperm.xlu1 %1996, %v1554_v22   ;;  %v1624_v63 = vmul.f32 %v2036_v20, %v2429_v4  ;;  %v1619_v6 = vsel %vm1618_vm2, %v2427_v47, %v1617_v60  ;;  %v1612_v0 = vsel %vm1611_vm3, %v2425_v44, %v1610_v61  ;;  %v1628_v47 = vand.u32 2147483648, %v2429_v4 }
 0x2ba   : > { %v1622_v43 = vsel %vm1620_vm10, %v1621_v2, %v1619_v6  ;;  %v1615_v49 = vsel %vm1613_vm5, %v1614_v45, %v1612_v0  ;;  %v1459_v37 = vsub.f32 2.0, %v1458_v36 }
 0x2bb   : > { %1569 = vperm.xlu0 %1995, %v1556_v7   ;;  %v1626_v8 = vsel %vm1625_vm6, %v2429_v4, %v1624_v63  ;;  %vm1450_vm6 = vcmask 1040384  }
 0x2bc   : > { %v1629_v24 = vsel %vm1627_vm13, %v1628_v47, %v1626_v8  ;;  %vm1456_vm13 = vcmask 1045504  }
 0x2bd   : > { %1566 = vperm.xlu1 %1996, %v1555_v48  }
 0x2c1   : > { %1572 = vperm.xlu1 %1996, %v1557_v59  }
 0x2c2   : > { %v2040_v62 = vpop.eup %2039 }
 0x2c3   : > { %v1041_v33 = vrot.slane %v2040_v62, %v2150_v9  ;;  %v1045_v1 = vrot.slane %v2040_v62, %v2314_v41  ;;  %v1633_v41 = vsel %vm1632_vm11, %v2432_v32, %v1631_v10  ;;  %vm1452_vm11 = vcmask 1041408  }
 0x2c5   : > { %v1049_v46 = vmul.f32 %v2358_v54, %v1041_v33  ;;  %v1048_v3 = vmul.f32 %v2355_v12, %v1041_v33  ;;  %v1051_v44 = vmul.f32 %v2364_v53, %v1045_v1  ;;  %v1050_v23 = vmul.f32 %v2361_v16, %v1045_v1 }
 0x2c6   : > { %v1635_v54 = vand.u32 2147483648, %v2432_v32  ;;  %v1472_v16 = vmul.f32 2.0, %v2409_v11  ;;  %v1500_v53 = vmul.f32 2.0, %v2416_v25  ;;  %v1460_v11 = vmax.f32 %v1459_v37, 0.0 }
 0x2c7   : > { %v1638_v17 = vmul.f32 %v1622_v43, %v1049_v46  ;;  %v1637_v21 = vmul.f32 %v1615_v49, %v1048_v3  ;;  %v1639_v27 = vmul.f32 %v1629_v24, %v1050_v23 }
 0x2c8   : > { %v1636_v12 = vsel %vm1634_vm12, %v1635_v54, %v1633_v41  ;;  %v1473_v32 = vsub.f32 2.0, %v1472_v16  ;;  %v1501_v4 = vsub.f32 2.0, %v1500_v53  ;;  %vm1463_vm2 = vcmp.eq.f32.partialorder %v1460_v11, inf }
 0x2c9   : > { %1649 = vperm.xlu1 %1996, %v1638_v17   ;;  %1646 = vperm.xlu0 %1995, %v1637_v21   ;;  %v1640_v26 = vmul.f32 %v1636_v12, %v1051_v44  ;;  %vm1465_vm3 = vcmp.eq.f32.partialorder %v1460_v11, 0.0  ;;  %v1466_v10 = vand.u32 2147483648, %v1460_v11  ;;  %vm1454_vm12 = vcmask 1043456  }
 0x2ca   : > { %v1474_v30 = vmax.f32 %v1473_v32, 0.0  ;;  %v1502_v35 = vmax.f32 %v1501_v4, 0.0 }
 0x2cc   : > { %2041 = vrsqrt.f32 %v1474_v30  ;;  %vm1477_vm14 = vcmp.eq.f32.partialorder %v1474_v30, inf  ;;  %vm1479_vm15 = vcmp.eq.f32.partialorder %v1474_v30, 0.0  ;;  %vm1505_vm0 = vcmp.eq.f32.partialorder %v1502_v35, inf }
 0x2cd   : > { %1655 = vperm.xlu1 %1996, %v1640_v26   ;;  %1652 = vperm.xlu0 %1995, %v1639_v27   ;;  %2043 = vrsqrt.f32 %v1502_v35  ;;  %v1508_v20 = vand.u32 2147483648, %v1502_v35  ;;  %vm1507_vm1 = vcmp.eq.f32.partialorder %v1502_v35, 0.0 }
 0x2d1   : > { %1388 = vperm.xlu1 %1996, %v2441_v14   ;;  %1385 = vperm.xlu0 %1995, %v2444_v38   ;;  %v1486_v14 = vmul.f32 2.0, %v2414_v31  ;;  %v1480_v31 = vand.u32 2147483648, %v1474_v30 }
 0x2d3   : > { %v1487_v22 = vsub.f32 2.0, %v1486_v14 }
 0x2d5   : > { %1419 = vperm.xlu1 %1996, %v1048_v3   ;;  %1391 = vperm.xlu0 %1995, %v930_v5   ;;  %v1488_v38 = vmax.f32 %v1487_v22, 0.0 }
 0x2d6   : > { %v788_v13 = vpop.xlane.xlu1 %787  ;;  %v2042_v34 = vpop.eup %2041 }
 0x2d7   : > { %2045 = vrcp.f32 %v788_v13  ;;  %v2044_v25 = vpop.eup %2043  ;;  %v1476_v39 = vmul.f32 %v2042_v34, %v1474_v30  ;;  %vm1491_vm5 = vcmp.eq.f32.partialorder %v1488_v38, inf  ;;  %vm1493_vm10 = vcmp.eq.f32.partialorder %v1488_v38, 0.0 }
 0x2d8   : > { %2047 = vrsqrt.f32 %v1460_v11  ;;  %v1504_v19 = vmul.f32 %v2044_v25, %v1502_v35  ;;  %v1494_v2 = vand.u32 2147483648, %v1488_v38 }
 0x2d9   : > { %1425 = vperm.xlu1 %1996, %v1050_v23   ;;  %1422 = vperm.xlu0 %1995, %v1049_v46   ;;  %2049 = vrsqrt.f32 %v1488_v38  ;;  %v1478_v7 = vsel %vm1477_vm14, %v1474_v30, %v1476_v39 }
 0x2da   : > { %v1481_v48 = vsel %vm1479_vm15, %v1480_v31, %v1478_v7  ;;  %v1506_v15 = vsel %vm1505_vm0, %v1502_v35, %v1504_v19 }
 0x2db   : > { %v1509_v52 = vsel %vm1507_vm1, %v1508_v20, %v1506_v15 }
 0x2dd   : > { %1428 = vperm.xlu0 %1995, %v1051_v44  }
 0x2e1   : > { %v2046_v40 = vpop.eup %2045 }
 0x2e2   : > { %v790_v18 = vmul.f32 %v2046_v40, %v2405_v50  ;;  %v2048_v42 = vpop.eup %2047 }
 0x2e3   : > { %v2050_v57 = vpop.eup %2049  ;;  %v1462_v58 = vmul.f32 %v2048_v42, %v1460_v11 }
 0x2e4   : > { %v1482_v5 = vmul.f32 %v1481_v48, %v790_v18  ;;  %v798_v51 = vrot.slane %v790_v18, %v2150_v9  ;;  %v1490_v60 = vmul.f32 %v2050_v57, %v1488_v38  ;;  %v1375_v0 = vrot.slane %v790_v18, 7 }
 0x2e5   : > { %v1464_v61 = vsel %vm1463_vm2, %v1460_v11, %v1462_v58 }
 0x2e6   : > { %v1483_v59 = vsel %vm692_vm9, %v1482_v5, 0.0  ;;  %v1510_v50 = vmul.f32 %v1509_v52, %v798_v51  ;;  %v1492_v6 = vsel %vm1491_vm5, %v1488_v38, %v1490_v60  ;;  %v1467_v1 = vsel %vm1465_vm3, %v1466_v10, %v1464_v61 }
 0x2e7   : > { %v1495_v43 = vsel %vm1493_vm10, %v1494_v2, %v1492_v6 }
 0x2e8   : > { %v1511_v63 = vsel %vm849_vm8, %v1510_v50, 0.0 }
 0x2f4   : > { %v701_v28 = vpop.xlane.xlu0 %700 }
 0x2f5   : > { %2051 = vrcp.f32 %v701_v28 }
 0x2fd   : > { %1484 = vadd.xlane.f32.xlu1 %v1483_v59 }
 0x2ff   : > { %v2052_v62 = vpop.eup %2051 }
 0x300   : > { %v703_v33 = vmul.f32 %v2052_v62, %v2418_v29 }
 0x301   : > { %1512 = vadd.xlane.f32.xlu1 %v1511_v63 }
 0x302   : > { %v1468_v45 = vmul.f32 %v1467_v1, %v703_v33  ;;  %v794_v46 = vrot.slane %v703_v33, %v2150_v9  ;;  %v1451_v3 = vsel %vm1450_vm6, %v703_v33, %v1375_v0 }
 0x304   : > { %v1469_v49 = vsel %vm692_vm9, %v1468_v45, 0.0  ;;  %v1496_v41 = vmul.f32 %v1495_v43, %v794_v46  ;;  %v1453_v8 = vsel %vm1452_vm11, %v1451_v3, %v794_v46  ;;  %vm1411_vm9 = vcmask 1047559  }
 0x305   : > { %1470 = vadd.xlane.f32.xlu0 %v1469_v49  ;;  %v1455_v29 = vsel %vm1454_vm12, %v1453_v8, %v798_v51 }
 0x306   : > { %v1497_v17 = vsel %vm849_vm8, %v1496_v41, 0.0 }
 0x309   : > { %1498 = vadd.xlane.f32.xlu0 %v1497_v17 }
 0x336   : > { %v1383_v21 = vpop.permute.xlu0 %1382 }
 0x337   : > { %v1396_v40 = vrot.slane %v1383_v21, %v2275_v55 }
 0x338   : > { %v1564_v44 = vpop.permute.xlu1 %1563 }
 0x339   : > { %v1577_v12 = vrot.slane %v1564_v44, %v2275_v55 }
 0x33a   : > { %v1570_v54 = vpop.permute.xlu0 %1569 }
 0x33b   : > { %v1586_v24 = vrot.slane %v1570_v54, %v2275_v55 }
 0x33c   : > { %v1567_v23 = vpop.permute.xlu1 %1566 }
 0x33d   : > { %v1581_v9 = vrot.slane %v1567_v23, %v2278_v56 }
 0x33f   : > { %v1582_v27 = vsel %vm835_vm4, %v1581_v9, %v1577_v12 }
 0x340   : > { %v1573_v47 = vpop.permute.xlu1 %1572 }
 0x341   : > { %v1590_v26 = vrot.slane %v1573_v47, %v2278_v56 }
 0x343   : > { %v1591_v16 = vsel %vm835_vm4, %v1590_v26, %v1586_v24 }
 0x344   : > { %v1592_v53 = vsel %vm846_vm7, %v1591_v16, %v1582_v27 }
 0x345   : > { %v1594_v32 = vsel %vm849_vm8, %v1592_v53, 0.0 }
 0x346   : > { %1595 = vadd.xlane.f32.xlu0 %v1594_v32 }
 0x348   : > { %v1647_v4 = vpop.permute.xlu0 %1646  ;;  %v1650_v30 = vpop.permute.xlu1 %1649 }
 0x349   : > { %v1660_v36 = vrot.slane %v1647_v4, %v2275_v55  ;;  %v1664_v35 = vrot.slane %v1650_v30, %v2278_v56 }
 0x34b   : > { %v1665_v11 = vsel %vm835_vm4, %v1664_v35, %v1660_v36 }
 0x34c   : > { %v1653_v14 = vpop.permute.xlu0 %1652  ;;  %v1656_v13 = vpop.permute.xlu1 %1655 }
 0x34d   : > { %v1669_v37 = vrot.slane %v1653_v14, %v2275_v55  ;;  %v1673_v22 = vrot.slane %v1656_v13, %v2278_v56 }
 0x34f   : > { %v1674_v38 = vsel %vm835_vm4, %v1673_v22, %v1669_v37 }
 0x350   : > { %v1386_v34 = vpop.permute.xlu0 %1385  ;;  %v1389_v25 = vpop.permute.xlu1 %1388  ;;  %v1675_v39 = vsel %vm846_vm7, %v1674_v38, %v1665_v11 }
 0x351   : > { %v1400_v28 = vrot.slane %v1386_v34, %v2278_v56  ;;  %v1677_v18 = vsel %vm849_vm8, %v1675_v39, 0.0  ;;  %v1405_v42 = vrot.slane %v1389_v25, %v2275_v55  ;;  %vm1709_vm8 = vcmask 132096  }
 0x352   : > { %1678 = vadd.xlane.f32.xlu1 %v1677_v18 }
 0x353   : > { %v1401_v7 = vsel %vm835_vm4, %v1400_v28, %v1396_v40 }
 0x354   : > { %v1392_v19 = vpop.permute.xlu0 %1391  ;;  %v1420_v31 = vpop.permute.xlu1 %1419 }
 0x355   : > { %v1409_v48 = vrot.slane %v1392_v19, %v2278_v56  ;;  %v1433_v57 = vrot.slane %v1420_v31, %v2275_v55 }
 0x357   : > { %v1410_v5 = vsel %vm835_vm4, %v1409_v48, %v1405_v42 }
 0x358   : > { %v1423_v51 = vpop.permute.xlu0 %1422  ;;  %v1412_v15 = vsel %vm1411_vm9, %v1410_v5, %v1401_v7  ;;  %v1426_v52 = vpop.permute.xlu1 %1425 }
 0x359   : > { %v1437_v20 = vrot.slane %v1423_v51, %v2278_v56  ;;  %v1457_v58 = vsel %vm1456_vm13, %v1455_v29, %v1412_v15  ;;  %v1442_v60 = vrot.slane %v1426_v52, %v2275_v55 }
 0x35b   : > { %v1438_v59 = vsel %vm835_vm4, %v1437_v20, %v1433_v57 }
 0x35c   : > { %v1429_v50 = vpop.permute.xlu0 %1428 }
 0x35d   : > { %v1446_v61 = vrot.slane %v1429_v50, %v2278_v56 }
 0x35f   : > { %v1447_v62 = vsel %vm835_vm4, %v1446_v61, %v1442_v60  ;;  %vm1704_vm4 = vcmask 130048  }
 0x360   : > { %v1448_v10 = vsel %vm846_vm7, %v1447_v62, %v1438_v59  ;;  %vm1707_vm7 = vcmask 138240  }
 0x38a   : > { %v1485_v33 = vpop.xlane.xlu1 %1484 }
 0x38b   : > { %v1681_v1 = vrot.slane %v1485_v33, 7 }
 0x38e   : > { %v1513_v2 = vpop.xlane.xlu1 %1512 }
 0x38f   : > { %v1687_v3 = vrot.slane %v1513_v2, 4 }
 0x392   : > { %v1471_v63 = vpop.xlane.xlu0 %1470 }
 0x393   : > { %v1692_v45 = vsel %vm1450_vm6, %v1471_v63, %v1681_v1 }
 0x396   : > { %v1499_v6 = vpop.xlane.xlu0 %1498 }
 0x397   : > { %v1684_v0 = vrot.slane %v1499_v6, 6 }
 0x399   : > { %v1693_v46 = vsel %vm1452_vm11, %v1692_v45, %v1684_v0 }
 0x39a   : > { %v1694_v56 = vsel %vm1454_vm12, %v1693_v46, %v1687_v3 }
 0x3d3   : > { %v1596_v43 = vpop.xlane.xlu0 %1595 }
 0x3d4   : > { %v1690_v55 = vrot.slane %v1596_v43, 2 }
 0x3d6   : > { %v1695_v49 = vsel %vm1456_vm13, %v1694_v56, %v1690_v55 }
 0x3d7   : > { %1698 = vrot.lane.b32.xlu0 %v1695_v49, %s2065_s22 }
 0x3df   : > { %v1679_v41 = vpop.xlane.xlu1 %1678 }
 0x3e0   : > { %1700 = vrot.lane.b32.xlu1 %v1679_v41, %s2065_s22 }
 0x449   : > { %v1699_v8 = vpop.permute.xlu0 %1698 }
 0x44a   : > { %v1705_v29 = vsel %vm1704_vm4, %v1457_v58, %v1699_v8 }
 0x44b   : > { %1708 = vst.msk [vmem:[%s423_s25] sm:$0xff] %vm1707_vm7, %v1705_v29 }
 0x452   : > { %v1701_v17 = vpop.permute.xlu1 %1700 }
 0x453   : > { %v1706_v21 = vsel %vm1704_vm4, %v1448_v10, %v1701_v17 }
 0x454   : > { %1710 = vst.msk [vmem:[%s423_s25 + $0x8] sm:$0x3] %vm1709_vm8, %v1706_v21 }
 0x455 PF: > { %s19_s30 = sadd.s32 1, %s2059_s30  }
 0x456   : > { %p16_p4 = scmp.ge.s32.totalorder %s19_s30, 4  }
 0x458   :  { %18 = sbr.rel (!%p16_p4) target bundleno = 1 (0x1), region = 101 }

</bundles_post_ra>
